<compile_context>
chip_gen: v6e
topology: v6e:2x2x1
jax: 0.10.0
libtpu: 0.0.40
codegen_flags: <defaults>
</compile_context>

<pallas_src>
import math
import functools

import jax
import jax.numpy as jnp
from jax.experimental import pallas as pl
from jax.experimental.pallas import tpu as pltpu

LRELU_SLOPE = 0.1            # matches the PyTorch module's c = 0.1
BN_EPS = 1e-5
LANE = 128
TM_CAP = 512                 # M-tile cap (rows per grid step)
TK_CAP = 2048                # K-tile cap when K must be split
K_SINGLE_MAX = 2048          # keep the whole reduction in one block up to this K
VMEM_LIMIT = 32 * 1024 * 1024  # scoped-VMEM budget, safe on v5e/v6e/v7x


def _round_up(x, m):
    return (x + m - 1) // m * m


def _largest_divisor(n, cap, mult):
    """Largest divisor of n that is <= cap and a multiple of `mult` (0 if none)."""
    t = min(cap, n)
    t -= t % mult
    while t >= mult:
        if n % t == 0:
            return t
        t -= mult
    return 0


def _pick_m_tile(m, cap=TM_CAP):
    if m <= cap:
        return m                       # full dim -> always a legal block
    for mult in (256, 128, 16):        # MXU-friendly first, bf16-sublane last
        t = _largest_divisor(m, cap, mult)
        if t:
            return t
    return m                           # fallback: single big tile (legal: full dim)


def _pick_k_tile(k_pad, cap=TK_CAP):
    t = _largest_divisor(k_pad, cap, LANE)
    return t if t else k_pad


# ----------------------------------------------------------------------------
# Pallas kernels
# ----------------------------------------------------------------------------
def _conv_single_k_kernel(p_ref, w_ref, b_ref, o_ref, *maybe_stat,
                          slope, collect_stats):
    """Conv tile with the whole reduction in one block (grid = M tiles only)."""
    y = jnp.dot(p_ref[...], w_ref[...], preferred_element_type=jnp.float32)
    y = y + b_ref[...]
    if slope is not None:
        y = jnp.where(y > 0, y, slope * y)
    o_ref[...] = y.astype(o_ref.dtype)
    if collect_stats:
        (stat_ref,) = maybe_stat       # per-M-tile partial stats -> no race, M stays parallel
        stat_ref[...] = jnp.concatenate(
            [jnp.sum(y, axis=0, keepdims=True),
             jnp.sum(y * y, axis=0, keepdims=True)], axis=0)


def _conv_multi_k_kernel(p_ref, w_ref, b_ref, o_ref, *rest,
                         slope, k_steps, collect_stats):
    """Conv tile with a tiled K reduction (grid = (M tiles, K tiles))."""
    if collect_stats:
        stat_ref, acc_ref = rest
    else:
        (acc_ref,) = rest

    k = pl.program_id(1)               # bound at top level only (interpret-safe)

    @pl.when(k == 0)
    def _():
        acc_ref[...] = jnp.zeros_like(acc_ref)

    acc_ref[...] += jnp.dot(p_ref[...], w_ref[...],
                            preferred_element_type=jnp.float32)

    @pl.when(k == k_steps - 1)
    def _():
        y = acc_ref[...] + b_ref[...]
        if slope is not None:
            y = jnp.where(y > 0, y, slope * y)
        o_ref[...] = y.astype(o_ref.dtype)
        if collect_stats:
            stat_ref[...] = jnp.concatenate(
                [jnp.sum(y, axis=0, keepdims=True),
                 jnp.sum(y * y, axis=0, keepdims=True)], axis=0)


def _bn_lrelu_kernel(x_ref, stat_ref, g_ref, b_ref, o_ref, *, count, eps, slope):
    """Tiled BatchNorm-apply (from precomputed sum/sumsq) + LeakyReLU."""
    x = x_ref[...].astype(jnp.float32)
    inv_n = 1.0 / count
    mean = stat_ref[0:1, :] * inv_n
    var = jnp.maximum(stat_ref[1:2, :] * inv_n - mean * mean, 0.0)
    scale = jax.lax.rsqrt(var + eps) * g_ref[...]
    y = (x - mean) * scale + b_ref[...]
    o_ref[...] = jnp.where(y > 0, y, slope * y).astype(o_ref.dtype)


def _bn_lrelu_head_kernel(x_ref, g_ref, b_ref, w5_ref, b5_ref, o_ref, *, eps, slope):
    """Fused BN + LeakyReLU + final 4x4 conv (cout=1) as a per-image reduction.

    x: [N, P=16, C] (layer-4 conv output), w5: [1, P, C], out: [N, 1].
    """
    x = x_ref[...].astype(jnp.float32)
    mean = jnp.mean(jnp.mean(x, axis=1, keepdims=True), axis=0, keepdims=True)
    msq = jnp.mean(jnp.mean(x * x, axis=1, keepdims=True), axis=0, keepdims=True)
    var = jnp.maximum(msq - mean * mean, 0.0)
    y = (x - mean) * (jax.lax.rsqrt(var + eps) * g_ref[...]) + b_ref[...]
    y = jnp.where(y > 0, y, slope * y)
    s = jnp.sum(y * w5_ref[...], axis=2, keepdims=True)   # (N, P, 1)
    o_ref[...] = (jnp.sum(s, axis=1) + b5_ref[...]).astype(o_ref.dtype)


# ----------------------------------------------------------------------------
# Layer wrappers (glue in plain JAX, hot path in Pallas)
# ----------------------------------------------------------------------------
def _im2col(x_nhwc, k, stride, pad):
    """x: [N, H, W, C] -> patches [N*Ho*Wo, k*k*C] ordered (kh, kw, Cin)."""
    n, h, w, c = x_nhwc.shape
    if pad:
        x_nhwc = jnp.pad(x_nhwc, ((0, 0), (pad, pad), (pad, pad), (0, 0)))
    ho = (h + 2 * pad - k) // stride + 1
    wo = (w + 2 * pad - k) // stride + 1
    cols = []
    for i in range(k):
        for j in range(k):
            cols.append(x_nhwc[:, i:i + stride * ho:stride, j:j + stride * wo:stride, :])
    patches = jnp.stack(cols, axis=3)                      # [N, Ho, Wo, k*k, C]
    return patches.reshape(n * ho * wo, k * k * c), (n, ho, wo)


def conv2d_pallas(x_nhwc, w_oihw, bias, *, stride, pad, slope=None, collect_stats=False):
    """Conv2d (PyTorch semantics) via bf16 im2col + tiled Pallas MXU matmul."""
    cout, cin, kh, kw = w_oihw.shape
    patches, (n, ho, wo) = _im2col(x_nhwc.astype(jnp.bfloat16), kh, stride, pad)
    m, k_dim = patches.shape
    c_pad = _round_up(cout, LANE)

    single_k = k_dim <= K_SINGLE_MAX
    if single_k:
        # No K padding (e.g. layer 1: K = 4*4*3 = 48) -> full-K block is legal.
        k_pad, k_steps = k_dim, 1
        tk = k_dim
    else:
        k_pad = _round_up(k_dim, LANE)
        if k_pad != k_dim:
            patches = jnp.pad(patches, ((0, 0), (0, k_pad - k_dim)))
        tk = _pick_k_tile(k_pad)
        k_steps = k_pad // tk

    w_mat = jnp.transpose(w_oihw, (2, 3, 1, 0)).reshape(k_dim, cout)
    w_mat = jnp.pad(w_mat, ((0, k_pad - k_dim), (0, c_pad - cout))).astype(jnp.bfloat16)
    b_row = jnp.pad(bias, (0, c_pad - cout)).reshape(1, c_pad).astype(jnp.float32)

    tm = _pick_m_tile(m)
    m_tiles = m // tm if m % tm == 0 else 1
    if m % tm:
        tm = m
        m_tiles = 1

    out_shapes = [jax.ShapeDtypeStruct((m, c_pad), jnp.bfloat16)]

    if single_k:
        grid = (m_tiles,)
        semantics = ("parallel",)
        in_specs = [
            pl.BlockSpec((tm, k_pad), lambda i: (i, 0)),
            pl.BlockSpec((k_pad, c_pad), lambda i: (0, 0)),
            pl.BlockSpec((1, c_pad), lambda i: (0, 0)),
        ]
        out_specs = [pl.BlockSpec((tm, c_pad), lambda i: (i, 0))]
        scratch = []
        kernel = functools.partial(_conv_single_k_kernel, slope=slope,
                                   collect_stats=collect_stats)
        if collect_stats:
            out_shapes.append(jax.ShapeDtypeStruct((m_tiles, 2, c_pad), jnp.float32))
            out_specs.append(pl.BlockSpec((None, 2, c_pad), lambda i: (i, 0, 0)))
    else:
        grid = (m_tiles, k_steps)
        semantics = ("parallel", "arbitrary")
        in_specs = [
            pl.BlockSpec((tm, tk), lambda i, k: (i, k)),
            pl.BlockSpec((tk, c_pad), lambda i, k: (k, 0)),
            pl.BlockSpec((1, c_pad), lambda i, k: (0, 0)),
        ]
        out_specs = [pl.BlockSpec((tm, c_pad), lambda i, k: (i, 0))]
        scratch = [pltpu.VMEM((tm, c_pad), jnp.float32)]
        kernel = functools.partial(_conv_multi_k_kernel, slope=slope,
                                   k_steps=k_steps, collect_stats=collect_stats)
        if collect_stats:
            out_shapes.append(jax.ShapeDtypeStruct((m_tiles, 2, c_pad), jnp.float32))
            out_specs.append(pl.BlockSpec((None, 2, c_pad), lambda i, k: (i, 0, 0)))

    res = pl.pallas_call(
        kernel,
        out_shape=tuple(out_shapes) if collect_stats else out_shapes[0],
        grid_spec=pltpu.PrefetchScalarGridSpec(
            num_scalar_prefetch=0,
            grid=grid,
            in_specs=in_specs,
            out_specs=out_specs if collect_stats else out_specs[0],
            scratch_shapes=scratch,
        ),
        compiler_params=pltpu.CompilerParams(
            dimension_semantics=semantics,
            vmem_limit_bytes=VMEM_LIMIT,
        ),
    )(patches, w_mat, b_row)

    if collect_stats:
        conv_out, partial_stats = res
        stats = jnp.sum(partial_stats, axis=0)          # tiny (2, c_pad) reduce
    else:
        conv_out, stats = res, None
    return conv_out, stats, (n, ho, wo), cout, c_pad


def bn_lrelu_pallas(conv_out, stats, gamma, beta, cout, c_pad):
    """Tiled BatchNorm2d (batch stats precomputed in the conv) + LeakyReLU."""
    m = conv_out.shape[0]
    tm = _pick_m_tile(m)
    if m % tm:
        tm = m
    g_row = jnp.pad(gamma, (0, c_pad - cout)).reshape(1, c_pad).astype(jnp.float32)
    b_row = jnp.pad(beta, (0, c_pad - cout)).reshape(1, c_pad).astype(jnp.float32)
    return pl.pallas_call(
        functools.partial(_bn_lrelu_kernel, count=float(m), eps=BN_EPS,
                          slope=LRELU_SLOPE),
        out_shape=jax.ShapeDtypeStruct((m, c_pad), jnp.bfloat16),
        grid_spec=pltpu.PrefetchScalarGridSpec(
            num_scalar_prefetch=0,
            grid=(m // tm,),
            in_specs=[
                pl.BlockSpec((tm, c_pad), lambda i: (i, 0)),
                pl.BlockSpec((2, c_pad), lambda i: (0, 0)),
                pl.BlockSpec((1, c_pad), lambda i: (0, 0)),
                pl.BlockSpec((1, c_pad), lambda i: (0, 0)),
            ],
            out_specs=pl.BlockSpec((tm, c_pad), lambda i: (i, 0)),
        ),
        compiler_params=pltpu.CompilerParams(
            dimension_semantics=("parallel",),
            vmem_limit_bytes=VMEM_LIMIT,
        ),
    )(conv_out, stats, g_row, b_row)


def bn_lrelu_conv5_head(conv_out, gamma, beta, w5, b5, n, channels, c_pad):
    """Fused BN(8d) + LeakyReLU + final 4x4/stride-1 conv -> [N, 1]."""
    p = conv_out.shape[0] // n                       # spatial positions per image (16)
    x = conv_out.reshape(n, p, c_pad)
    g = jnp.pad(gamma, (0, c_pad - channels)).reshape(1, 1, c_pad).astype(jnp.float32)
    b = jnp.pad(beta, (0, c_pad - channels)).reshape(1, 1, c_pad).astype(jnp.float32)
    # w5: [1, cin, 4, 4] -> [p = h*4 + w, cin], zero-padded channels
    w5_mat = jnp.transpose(w5[0], (1, 2, 0)).reshape(p, channels)
    w5_mat = jnp.pad(w5_mat, ((0, 0), (0, c_pad - channels)))
    w5_mat = w5_mat.reshape(1, p, c_pad).astype(jnp.float32)
    b5_mat = b5.reshape(1, 1).astype(jnp.float32)

    vmem = pl.BlockSpec(memory_space=pltpu.MemorySpace.VMEM)
    return pl.pallas_call(
        functools.partial(_bn_lrelu_head_kernel, eps=BN_EPS, slope=LRELU_SLOPE),
        out_shape=jax.ShapeDtypeStruct((n, 1), jnp.float32),
        in_specs=[vmem] * 5,
        out_specs=vmem,
        compiler_params=pltpu.CompilerParams(vmem_limit_bytes=VMEM_LIMIT),
    )(x, g, b, w5_mat, b5_mat)


# ----------------------------------------------------------------------------
# Model: parameter init + forward
# ----------------------------------------------------------------------------
def init_params(key, d=16):
    """Deterministic init matching the module's shapes (PyTorch default-style bounds)."""
    channel_pairs = [(d, 3), (2 * d, d), (4 * d, 2 * d), (8 * d, 4 * d), (1, 8 * d)]
    params = {}
    keys = jax.random.split(key, 2 * len(channel_pairs))
    for idx, (cout, cin) in enumerate(channel_pairs):
        fan_in = cin * 4 * 4
        bound = 1.0 / math.sqrt(fan_in)
        params[f"w{idx + 1}"] = jax.random.uniform(
            keys[2 * idx], (cout, cin, 4, 4), jnp.float32, -bound, bound)
        params[f"b{idx + 1}"] = jax.random.uniform(
            keys[2 * idx + 1], (cout,), jnp.float32, -bound, bound)
    for i, cout in zip((2, 3, 4), (2 * d, 4 * d, 8 * d)):
        params[f"g{i}"] = jnp.ones((cout,), jnp.float32)    # BN weight
        params[f"be{i}"] = jnp.zeros((cout,), jnp.float32)  # BN bias
    return params


def netd_dcgan_forward(x_nchw, params):
    """Input NCHW [N, 3, 64, 64] -> output NCHW [N, 1, 1, 1]."""
    x = jnp.transpose(x_nchw, (0, 2, 3, 1))                            # NHWC
    # layer 1: conv(3 -> d, 4, 2, 1) + LeakyReLU(0.1) fused in the matmul epilogue
    y, _, (n, ho, wo), cout, _ = conv2d_pallas(
        x, params["w1"], params["b1"], stride=2, pad=1, slope=LRELU_SLOPE)
    x = y[:, :cout].reshape(n, ho, wo, cout)
    # layers 2-3: conv (+ fused per-tile BN stats) -> tiled BN + LeakyReLU
    for i in (2, 3):
        y, stats, (n, ho, wo), cout, c_pad = conv2d_pallas(
            x, params[f"w{i}"], params[f"b{i}"], stride=2, pad=1, collect_stats=True)
        y = bn_lrelu_pallas(y, stats, params[f"g{i}"], params[f"be{i}"], cout, c_pad)
        x = y[:, :cout].reshape(n, ho, wo, cout)
    # layer 4: conv, then fused BN + LeakyReLU + layer-5 conv (per-image reduction)
    y, _, (n, ho, wo), cout, c_pad = conv2d_pallas(
        x, params["w4"], params["b4"], stride=2, pad=1)
    out = bn_lrelu_conv5_head(y, params["g4"], params["be4"],
                              params["w5"], params["b5"], n, cout, c_pad)
    return out.reshape(n, 1, 1, 1)                                      # NCHW


if __name__ == "__main__":
    d = 16          # small version of the module's d=128
    batch = 2
    key = jax.random.PRNGKey(0)
    k_in, k_par = jax.random.split(key)

    x = jax.random.normal(k_in, (batch, 3, 64, 64), jnp.float32)        # NCHW, DCGAN 64x64
    params = init_params(k_par, d=d)

    out = jax.jit(netd_dcgan_forward)(x, params)
    out = jax.block_until_ready(out)
    assert out.shape == (batch, 1, 1, 1), out.shape
    assert bool(jnp.all(jnp.isfinite(out)))
    print("KERNEL_OK")
</pallas_src>

<mosaic_0001>
module attributes {stable_mosaic.version = 11 : i64} {
  func.func @_conv_single_k_kernel(%arg0: i32, %arg1: memref<512x48xbf16, #tpu.memory_space<vmem>>, %arg2: memref<48x128xbf16, #tpu.memory_space<vmem>>, %arg3: memref<1x128xf32, #tpu.memory_space<vmem>>, %arg4: memref<512x128xbf16, #tpu.memory_space<vmem>>) attributes {dimension_semantics = [#tpu.dimension_semantics<parallel>], iteration_bounds = array<i64: 4>, scalar_prefetch = 0 : i64, scratch_operands = 0 : i64, tpu.core_type = #tpu.core_type<tc>, window_params = [{transform_indices = @transform_0, window_bounds = array<i64: 512, 48>}, {pipeline_mode = #tpu.pipeline_mode<synchronous>, transform_indices = @transform_1, window_bounds = array<i64: 48, 128>}, {pipeline_mode = #tpu.pipeline_mode<synchronous>, transform_indices = @transform_2, window_bounds = array<i64: 1, 128>}, {transform_indices = @transform_3, window_bounds = array<i64: 512, 128>}]} {
    %c0 = arith.constant 0 : index
    %c0_0 = arith.constant 0 : index
    %0 = vector.load %arg1[%c0, %c0_0] : memref<512x48xbf16, #tpu.memory_space<vmem>>, vector<512x48xbf16>
    %c0_1 = arith.constant 0 : index
    %c0_2 = arith.constant 0 : index
    %1 = vector.load %arg2[%c0_1, %c0_2] : memref<48x128xbf16, #tpu.memory_space<vmem>>, vector<48x128xbf16>
    %cst = arith.constant dense<0.000000e+00> : vector<512x128xf32>
    %2 = tpu.matmul %0, %1, %cst {dimension_numbers = #tpu.dot_dimension_numbers<[1], [0], [0], [1], [0, 0, 1, 1], [], []>} : vector<512x48xbf16>, vector<48x128xbf16>, vector<512x128xf32> -> vector<512x128xf32>
    %c0_3 = arith.constant 0 : index
    %c0_4 = arith.constant 0 : index
    %3 = vector.load %arg3[%c0_3, %c0_4] : memref<1x128xf32, #tpu.memory_space<vmem>>, vector<1x128xf32>
    %4 = vector.broadcast %3 : vector<1x128xf32> to vector<512x128xf32>
    %5 = arith.addf %2, %4 : vector<512x128xf32>
    %cst_5 = arith.constant 0.000000e+00 : f32
    %6 = vector.broadcast %cst_5 : f32 to vector<512x128xf32>
    %7 = arith.cmpf ogt, %5, %6 : vector<512x128xf32>
    %cst_6 = arith.constant 1.000000e-01 : f32
    %8 = vector.broadcast %cst_6 : f32 to vector<512x128xf32>
    %9 = arith.mulf %8, %5 : vector<512x128xf32>
    %10 = arith.select %7, %5, %9 : vector<512x128xi1>, vector<512x128xf32>
    %11 = arith.truncf %10 : vector<512x128xf32> to vector<512x128xbf16>
    %c0_7 = arith.constant 0 : index
    %c0_8 = arith.constant 0 : index
    %12 = vector.load %arg4[%c0_7, %c0_8] : memref<512x128xbf16, #tpu.memory_space<vmem>>, vector<512x128xbf16>
    tpu.vector_store %arg4[%c0_7, %c0_8], %11 {strides = array<i32>} : memref<512x128xbf16, #tpu.memory_space<vmem>>, vector<512x128xbf16>,
    return
  }
  func.func @transform_0(%arg0: i32) -> (i32, i32) {
    %c0_i32 = arith.constant 0 : i32
    %c0_i32_0 = arith.constant 0 : i32
    return %arg0, %c0_i32 : i32, i32
  }
  func.func @transform_1(%arg0: i32) -> (i32, i32) {
    %c0_i32 = arith.constant 0 : i32
    %c0_i32_0 = arith.constant 0 : i32
    %c0_i32_1 = arith.constant 0 : i32
    return %c0_i32, %c0_i32_0 : i32, i32
  }
  func.func @transform_2(%arg0: i32) -> (i32, i32) {
    %c0_i32 = arith.constant 0 : i32
    %c0_i32_0 = arith.constant 0 : i32
    %c0_i32_1 = arith.constant 0 : i32
    return %c0_i32, %c0_i32_0 : i32, i32
  }
  func.func @transform_3(%arg0: i32) -> (i32, i32) {
    %c0_i32 = arith.constant 0 : i32
    %c0_i32_0 = arith.constant 0 : i32
    return %arg0, %c0_i32 : i32, i32
  }
}

module attributes {stable_mosaic.version = 11 : i64} {
  func.func @_conv_single_k_kernel(%arg0: i32, %arg1: memref<512x256xbf16, #tpu.memory_space<vmem>>, %arg2: memref<256x128xbf16, #tpu.memory_space<vmem>>, %arg3: memref<1x128xf32, #tpu.memory_space<vmem>>, %arg4: memref<512x128xbf16, #tpu.memory_space<vmem>>, %arg5: memref<1x2x128xf32, #tpu.memory_space<vmem>>) attributes {dimension_semantics = [#tpu.dimension_semantics<parallel>], iteration_bounds = array<i64: 1>, scalar_prefetch = 0 : i64, scratch_operands = 0 : i64, tpu.core_type = #tpu.core_type<tc>, window_params = [{transform_indices = @transform_0, window_bounds = array<i64: 512, 256>}, {pipeline_mode = #tpu.pipeline_mode<synchronous>, transform_indices = @transform_1, window_bounds = array<i64: 256, 128>}, {pipeline_mode = #tpu.pipeline_mode<synchronous>, transform_indices = @transform_2, window_bounds = array<i64: 1, 128>}, {transform_indices = @transform_3, window_bounds = array<i64: 512, 128>}, {transform_indices = @transform_4, window_bounds = array<i64: 1, 2, 128>}]} {
    %c0 = arith.constant 0 : index
    %c0_0 = arith.constant 0 : index
    %0 = vector.load %arg1[%c0, %c0_0] : memref<512x256xbf16, #tpu.memory_space<vmem>>, vector<512x256xbf16>
    %c0_1 = arith.constant 0 : index
    %c0_2 = arith.constant 0 : index
    %1 = vector.load %arg2[%c0_1, %c0_2] : memref<256x128xbf16, #tpu.memory_space<vmem>>, vector<256x128xbf16>
    %cst = arith.constant dense<0.000000e+00> : vector<512x128xf32>
    %2 = tpu.matmul %0, %1, %cst {dimension_numbers = #tpu.dot_dimension_numbers<[1], [0], [0], [1], [0, 0, 1, 1], [], []>} : vector<512x256xbf16>, vector<256x128xbf16>, vector<512x128xf32> -> vector<512x128xf32>
    %c0_3 = arith.constant 0 : index
    %c0_4 = arith.constant 0 : index
    %3 = vector.load %arg3[%c0_3, %c0_4] : memref<1x128xf32, #tpu.memory_space<vmem>>, vector<1x128xf32>
    %4 = vector.broadcast %3 : vector<1x128xf32> to vector<512x128xf32>
    %5 = arith.addf %2, %4 : vector<512x128xf32>
    %6 = arith.truncf %5 : vector<512x128xf32> to vector<512x128xbf16>
    %c0_5 = arith.constant 0 : index
    %c0_6 = arith.constant 0 : index
    %7 = vector.load %arg4[%c0_5, %c0_6] : memref<512x128xbf16, #tpu.memory_space<vmem>>, vector<512x128xbf16>
    tpu.vector_store %arg4[%c0_5, %c0_6], %6 {strides = array<i32>} : memref<512x128xbf16, #tpu.memory_space<vmem>>, vector<512x128xbf16>,
    %cst_7 = arith.constant dense<0.000000e+00> : vector<128xf32>
    %8 = vector.multi_reduction <add>, %5, %cst_7 [0] : vector<512x128xf32> to vector<128xf32>
    %9 = vector.shape_cast %8 : vector<128xf32> to vector<1x128xf32>
    %10 = arith.mulf %5, %5 : vector<512x128xf32>
    %cst_8 = arith.constant dense<0.000000e+00> : vector<128xf32>
    %11 = vector.multi_reduction <add>, %10, %cst_8 [0] : vector<512x128xf32> to vector<128xf32>
    %12 = vector.shape_cast %11 : vector<128xf32> to vector<1x128xf32>
    %13 = tpu.concatenate %9, %12 in 0 : vector<1x128xf32>, vector<1x128xf32> -> vector<2x128xf32>
    %c0_9 = arith.constant 0 : index
    %c0_10 = arith.constant 0 : index
    %c0_11 = arith.constant 0 : index
    %14 = vector.load %arg5[%c0_9, %c0_10, %c0_11] : memref<1x2x128xf32, #tpu.memory_space<vmem>>, vector<1x2x128xf32>
    %15 = vector.shape_cast %14 : vector<1x2x128xf32> to vector<2x128xf32>
    %16 = vector.shape_cast %13 : vector<2x128xf32> to vector<1x2x128xf32>
    tpu.vector_store %arg5[%c0_9, %c0_10, %c0_11], %16 {strides = array<i32>} : memref<1x2x128xf32, #tpu.memory_space<vmem>>, vector<1x2x128xf32>,
    return
  }
  func.func @transform_0(%arg0: i32) -> (i32, i32) {
    %c0_i32 = arith.constant 0 : i32
    %c0_i32_0 = arith.constant 0 : i32
    return %arg0, %c0_i32 : i32, i32
  }
  func.func @transform_1(%arg0: i32) -> (i32, i32) {
    %c0_i32 = arith.constant 0 : i32
    %c0_i32_0 = arith.constant 0 : i32
    %c0_i32_1 = arith.constant 0 : i32
    return %c0_i32, %c0_i32_0 : i32, i32
  }
  func.func @transform_2(%arg0: i32) -> (i32, i32) {
    %c0_i32 = arith.constant 0 : i32
    %c0_i32_0 = arith.constant 0 : i32
    %c0_i32_1 = arith.constant 0 : i32
    return %c0_i32, %c0_i32_0 : i32, i32
  }
  func.func @transform_3(%arg0: i32) -> (i32, i32) {
    %c0_i32 = arith.constant 0 : i32
    %c0_i32_0 = arith.constant 0 : i32
    return %arg0, %c0_i32 : i32, i32
  }
  func.func @transform_4(%arg0: i32) -> (i32, i32, i32) {
    %c0_i32 = arith.constant 0 : i32
    %c0_i32_0 = arith.constant 0 : i32
    %c0_i32_1 = arith.constant 0 : i32
    return %arg0, %c0_i32, %c0_i32_0 : i32, i32, i32
  }
}

module attributes {stable_mosaic.version = 11 : i64} {
  func.func @_bn_lrelu_kernel(%arg0: i32, %arg1: memref<512x128xbf16, #tpu.memory_space<vmem>>, %arg2: memref<2x128xf32, #tpu.memory_space<vmem>>, %arg3: memref<1x128xf32, #tpu.memory_space<vmem>>, %arg4: memref<1x128xf32, #tpu.memory_space<vmem>>, %arg5: memref<512x128xbf16, #tpu.memory_space<vmem>>) attributes {dimension_semantics = [#tpu.dimension_semantics<parallel>], iteration_bounds = array<i64: 1>, scalar_prefetch = 0 : i64, scratch_operands = 0 : i64, tpu.core_type = #tpu.core_type<tc>, window_params = [{transform_indices = @transform_0, window_bounds = array<i64: 512, 128>}, {pipeline_mode = #tpu.pipeline_mode<synchronous>, transform_indices = @transform_1, window_bounds = array<i64: 2, 128>}, {pipeline_mode = #tpu.pipeline_mode<synchronous>, transform_indices = @transform_2, window_bounds = array<i64: 1, 128>}, {pipeline_mode = #tpu.pipeline_mode<synchronous>, transform_indices = @transform_3, window_bounds = array<i64: 1, 128>}, {transform_indices = @transform_4, window_bounds = array<i64: 512, 128>}]} {
    %c0 = arith.constant 0 : index
    %c0_0 = arith.constant 0 : index
    %0 = vector.load %arg1[%c0, %c0_0] : memref<512x128xbf16, #tpu.memory_space<vmem>>, vector<512x128xbf16>
    %1 = arith.extf %0 : vector<512x128xbf16> to vector<512x128xf32>
    %c0_1 = arith.constant 0 : index
    %c0_2 = arith.constant 0 : index
    %2 = vector.load %arg2[%c0_1, %c0_2] : memref<2x128xf32, #tpu.memory_space<vmem>>, vector<1x128xf32>
    %cst = arith.constant 0.001953125 : f32
    %3 = vector.broadcast %cst : f32 to vector<1x128xf32>
    %4 = arith.mulf %2, %3 : vector<1x128xf32>
    %c1 = arith.constant 1 : index
    %c0_3 = arith.constant 0 : index
    %5 = vector.load %arg2[%c1, %c0_3] : memref<2x128xf32, #tpu.memory_space<vmem>>, vector<1x128xf32>
    %cst_4 = arith.constant 0.001953125 : f32
    %6 = vector.broadcast %cst_4 : f32 to vector<1x128xf32>
    %7 = arith.mulf %5, %6 : vector<1x128xf32>
    %8 = arith.mulf %4, %4 : vector<1x128xf32>
    %9 = arith.subf %7, %8 : vector<1x128xf32>
    %cst_5 = arith.constant 0.000000e+00 : f32
    %10 = vector.broadcast %cst_5 : f32 to vector<1x128xf32>
    %11 = arith.maximumf %9, %10 : vector<1x128xf32>
    %cst_6 = arith.constant 9.99999974E-6 : f32
    %12 = vector.broadcast %cst_6 : f32 to vector<1x128xf32>
    %13 = arith.addf %11, %12 : vector<1x128xf32>
    %14 = math.rsqrt %13 : vector<1x128xf32>
    %c0_7 = arith.constant 0 : index
    %c0_8 = arith.constant 0 : index
    %15 = vector.load %arg3[%c0_7, %c0_8] : memref<1x128xf32, #tpu.memory_space<vmem>>, vector<1x128xf32>
    %16 = arith.mulf %14, %15 : vector<1x128xf32>
    %17 = vector.broadcast %4 : vector<1x128xf32> to vector<512x128xf32>
    %18 = arith.subf %1, %17 : vector<512x128xf32>
    %19 = vector.broadcast %16 : vector<1x128xf32> to vector<512x128xf32>
    %20 = arith.mulf %18, %19 : vector<512x128xf32>
    %c0_9 = arith.constant 0 : index
    %c0_10 = arith.constant 0 : index
    %21 = vector.load %arg4[%c0_9, %c0_10] : memref<1x128xf32, #tpu.memory_space<vmem>>, vector<1x128xf32>
    %22 = vector.broadcast %21 : vector<1x128xf32> to vector<512x128xf32>
    %23 = arith.addf %20, %22 : vector<512x128xf32>
    %cst_11 = arith.constant 0.000000e+00 : f32
    %24 = vector.broadcast %cst_11 : f32 to vector<512x128xf32>
    %25 = arith.cmpf ogt, %23, %24 : vector<512x128xf32>
    %cst_12 = arith.constant 1.000000e-01 : f32
    %26 = vector.broadcast %cst_12 : f32 to vector<512x128xf32>
    %27 = arith.mulf %26, %23 : vector<512x128xf32>
    %28 = arith.select %25, %23, %27 : vector<512x128xi1>, vector<512x128xf32>
    %29 = arith.truncf %28 : vector<512x128xf32> to vector<512x128xbf16>
    %c0_13 = arith.constant 0 : index
    %c0_14 = arith.constant 0 : index
    %30 = vector.load %arg5[%c0_13, %c0_14] : memref<512x128xbf16, #tpu.memory_space<vmem>>, vector<512x128xbf16>
    tpu.vector_store %arg5[%c0_13, %c0_14], %29 {strides = array<i32>} : memref<512x128xbf16, #tpu.memory_space<vmem>>, vector<512x128xbf16>,
    return
  }
  func.func @transform_0(%arg0: i32) -> (i32, i32) {
    %c0_i32 = arith.constant 0 : i32
    %c0_i32_0 = arith.constant 0 : i32
    return %arg0, %c0_i32 : i32, i32
  }
  func.func @transform_1(%arg0: i32) -> (i32, i32) {
    %c0_i32 = arith.constant 0 : i32
    %c0_i32_0 = arith.constant 0 : i32
    %c0_i32_1 = arith.constant 0 : i32
    return %c0_i32, %c0_i32_0 : i32, i32
  }
  func.func @transform_2(%arg0: i32) -> (i32, i32) {
    %c0_i32 = arith.constant 0 : i32
    %c0_i32_0 = arith.constant 0 : i32
    %c0_i32_1 = arith.constant 0 : i32
    return %c0_i32, %c0_i32_0 : i32, i32
  }
  func.func @transform_3(%arg0: i32) -> (i32, i32) {
    %c0_i32 = arith.constant 0 : i32
    %c0_i32_0 = arith.constant 0 : i32
    %c0_i32_1 = arith.constant 0 : i32
    return %c0_i32, %c0_i32_0 : i32, i32
  }
  func.func @transform_4(%arg0: i32) -> (i32, i32) {
    %c0_i32 = arith.constant 0 : i32
    %c0_i32_0 = arith.constant 0 : i32
    return %arg0, %c0_i32 : i32, i32
  }
}

module attributes {stable_mosaic.version = 11 : i64} {
  func.func @_conv_single_k_kernel(%arg0: i32, %arg1: memref<128x512xbf16, #tpu.memory_space<vmem>>, %arg2: memref<512x128xbf16, #tpu.memory_space<vmem>>, %arg3: memref<1x128xf32, #tpu.memory_space<vmem>>, %arg4: memref<128x128xbf16, #tpu.memory_space<vmem>>, %arg5: memref<1x2x128xf32, #tpu.memory_space<vmem>>) attributes {dimension_semantics = [#tpu.dimension_semantics<parallel>], iteration_bounds = array<i64: 1>, scalar_prefetch = 0 : i64, scratch_operands = 0 : i64, tpu.core_type = #tpu.core_type<tc>, window_params = [{transform_indices = @transform_0, window_bounds = array<i64: 128, 512>}, {pipeline_mode = #tpu.pipeline_mode<synchronous>, transform_indices = @transform_1, window_bounds = array<i64: 512, 128>}, {pipeline_mode = #tpu.pipeline_mode<synchronous>, transform_indices = @transform_2, window_bounds = array<i64: 1, 128>}, {transform_indices = @transform_3, window_bounds = array<i64: 128, 128>}, {transform_indices = @transform_4, window_bounds = array<i64: 1, 2, 128>}]} {
    %c0 = arith.constant 0 : index
    %c0_0 = arith.constant 0 : index
    %0 = vector.load %arg1[%c0, %c0_0] : memref<128x512xbf16, #tpu.memory_space<vmem>>, vector<128x512xbf16>
    %c0_1 = arith.constant 0 : index
    %c0_2 = arith.constant 0 : index
    %1 = vector.load %arg2[%c0_1, %c0_2] : memref<512x128xbf16, #tpu.memory_space<vmem>>, vector<512x128xbf16>
    %cst = arith.constant dense<0.000000e+00> : vector<128x128xf32>
    %2 = tpu.matmul %0, %1, %cst {dimension_numbers = #tpu.dot_dimension_numbers<[1], [0], [0], [1], [0, 0, 1, 1], [], []>} : vector<128x512xbf16>, vector<512x128xbf16>, vector<128x128xf32> -> vector<128x128xf32>
    %c0_3 = arith.constant 0 : index
    %c0_4 = arith.constant 0 : index
    %3 = vector.load %arg3[%c0_3, %c0_4] : memref<1x128xf32, #tpu.memory_space<vmem>>, vector<1x128xf32>
    %4 = vector.broadcast %3 : vector<1x128xf32> to vector<128x128xf32>
    %5 = arith.addf %2, %4 : vector<128x128xf32>
    %6 = arith.truncf %5 : vector<128x128xf32> to vector<128x128xbf16>
    %c0_5 = arith.constant 0 : index
    %c0_6 = arith.constant 0 : index
    %7 = vector.load %arg4[%c0_5, %c0_6] : memref<128x128xbf16, #tpu.memory_space<vmem>>, vector<128x128xbf16>
    tpu.vector_store %arg4[%c0_5, %c0_6], %6 {strides = array<i32>} : memref<128x128xbf16, #tpu.memory_space<vmem>>, vector<128x128xbf16>,
    %cst_7 = arith.constant dense<0.000000e+00> : vector<128xf32>
    %8 = vector.multi_reduction <add>, %5, %cst_7 [0] : vector<128x128xf32> to vector<128xf32>
    %9 = vector.shape_cast %8 : vector<128xf32> to vector<1x128xf32>
    %10 = arith.mulf %5, %5 : vector<128x128xf32>
    %cst_8 = arith.constant dense<0.000000e+00> : vector<128xf32>
    %11 = vector.multi_reduction <add>, %10, %cst_8 [0] : vector<128x128xf32> to vector<128xf32>
    %12 = vector.shape_cast %11 : vector<128xf32> to vector<1x128xf32>
    %13 = tpu.concatenate %9, %12 in 0 : vector<1x128xf32>, vector<1x128xf32> -> vector<2x128xf32>
    %c0_9 = arith.constant 0 : index
    %c0_10 = arith.constant 0 : index
    %c0_11 = arith.constant 0 : index
    %14 = vector.load %arg5[%c0_9, %c0_10, %c0_11] : memref<1x2x128xf32, #tpu.memory_space<vmem>>, vector<1x2x128xf32>
    %15 = vector.shape_cast %14 : vector<1x2x128xf32> to vector<2x128xf32>
    %16 = vector.shape_cast %13 : vector<2x128xf32> to vector<1x2x128xf32>
    tpu.vector_store %arg5[%c0_9, %c0_10, %c0_11], %16 {strides = array<i32>} : memref<1x2x128xf32, #tpu.memory_space<vmem>>, vector<1x2x128xf32>,
    return
  }
  func.func @transform_0(%arg0: i32) -> (i32, i32) {
    %c0_i32 = arith.constant 0 : i32
    %c0_i32_0 = arith.constant 0 : i32
    return %arg0, %c0_i32 : i32, i32
  }
  func.func @transform_1(%arg0: i32) -> (i32, i32) {
    %c0_i32 = arith.constant 0 : i32
    %c0_i32_0 = arith.constant 0 : i32
    %c0_i32_1 = arith.constant 0 : i32
    return %c0_i32, %c0_i32_0 : i32, i32
  }
  func.func @transform_2(%arg0: i32) -> (i32, i32) {
    %c0_i32 = arith.constant 0 : i32
    %c0_i32_0 = arith.constant 0 : i32
    %c0_i32_1 = arith.constant 0 : i32
    return %c0_i32, %c0_i32_0 : i32, i32
  }
  func.func @transform_3(%arg0: i32) -> (i32, i32) {
    %c0_i32 = arith.constant 0 : i32
    %c0_i32_0 = arith.constant 0 : i32
    return %arg0, %c0_i32 : i32, i32
  }
  func.func @transform_4(%arg0: i32) -> (i32, i32, i32) {
    %c0_i32 = arith.constant 0 : i32
    %c0_i32_0 = arith.constant 0 : i32
    %c0_i32_1 = arith.constant 0 : i32
    return %arg0, %c0_i32, %c0_i32_0 : i32, i32, i32
  }
}

module attributes {stable_mosaic.version = 11 : i64} {
  func.func @_bn_lrelu_kernel(%arg0: i32, %arg1: memref<128x128xbf16, #tpu.memory_space<vmem>>, %arg2: memref<2x128xf32, #tpu.memory_space<vmem>>, %arg3: memref<1x128xf32, #tpu.memory_space<vmem>>, %arg4: memref<1x128xf32, #tpu.memory_space<vmem>>, %arg5: memref<128x128xbf16, #tpu.memory_space<vmem>>) attributes {dimension_semantics = [#tpu.dimension_semantics<parallel>], iteration_bounds = array<i64: 1>, scalar_prefetch = 0 : i64, scratch_operands = 0 : i64, tpu.core_type = #tpu.core_type<tc>, window_params = [{transform_indices = @transform_0, window_bounds = array<i64: 128, 128>}, {pipeline_mode = #tpu.pipeline_mode<synchronous>, transform_indices = @transform_1, window_bounds = array<i64: 2, 128>}, {pipeline_mode = #tpu.pipeline_mode<synchronous>, transform_indices = @transform_2, window_bounds = array<i64: 1, 128>}, {pipeline_mode = #tpu.pipeline_mode<synchronous>, transform_indices = @transform_3, window_bounds = array<i64: 1, 128>}, {transform_indices = @transform_4, window_bounds = array<i64: 128, 128>}]} {
    %c0 = arith.constant 0 : index
    %c0_0 = arith.constant 0 : index
    %0 = vector.load %arg1[%c0, %c0_0] : memref<128x128xbf16, #tpu.memory_space<vmem>>, vector<128x128xbf16>
    %1 = arith.extf %0 : vector<128x128xbf16> to vector<128x128xf32>
    %c0_1 = arith.constant 0 : index
    %c0_2 = arith.constant 0 : index
    %2 = vector.load %arg2[%c0_1, %c0_2] : memref<2x128xf32, #tpu.memory_space<vmem>>, vector<1x128xf32>
    %cst = arith.constant 7.812500e-03 : f32
    %3 = vector.broadcast %cst : f32 to vector<1x128xf32>
    %4 = arith.mulf %2, %3 : vector<1x128xf32>
    %c1 = arith.constant 1 : index
    %c0_3 = arith.constant 0 : index
    %5 = vector.load %arg2[%c1, %c0_3] : memref<2x128xf32, #tpu.memory_space<vmem>>, vector<1x128xf32>
    %cst_4 = arith.constant 7.812500e-03 : f32
    %6 = vector.broadcast %cst_4 : f32 to vector<1x128xf32>
    %7 = arith.mulf %5, %6 : vector<1x128xf32>
    %8 = arith.mulf %4, %4 : vector<1x128xf32>
    %9 = arith.subf %7, %8 : vector<1x128xf32>
    %cst_5 = arith.constant 0.000000e+00 : f32
    %10 = vector.broadcast %cst_5 : f32 to vector<1x128xf32>
    %11 = arith.maximumf %9, %10 : vector<1x128xf32>
    %cst_6 = arith.constant 9.99999974E-6 : f32
    %12 = vector.broadcast %cst_6 : f32 to vector<1x128xf32>
    %13 = arith.addf %11, %12 : vector<1x128xf32>
    %14 = math.rsqrt %13 : vector<1x128xf32>
    %c0_7 = arith.constant 0 : index
    %c0_8 = arith.constant 0 : index
    %15 = vector.load %arg3[%c0_7, %c0_8] : memref<1x128xf32, #tpu.memory_space<vmem>>, vector<1x128xf32>
    %16 = arith.mulf %14, %15 : vector<1x128xf32>
    %17 = vector.broadcast %4 : vector<1x128xf32> to vector<128x128xf32>
    %18 = arith.subf %1, %17 : vector<128x128xf32>
    %19 = vector.broadcast %16 : vector<1x128xf32> to vector<128x128xf32>
    %20 = arith.mulf %18, %19 : vector<128x128xf32>
    %c0_9 = arith.constant 0 : index
    %c0_10 = arith.constant 0 : index
    %21 = vector.load %arg4[%c0_9, %c0_10] : memref<1x128xf32, #tpu.memory_space<vmem>>, vector<1x128xf32>
    %22 = vector.broadcast %21 : vector<1x128xf32> to vector<128x128xf32>
    %23 = arith.addf %20, %22 : vector<128x128xf32>
    %cst_11 = arith.constant 0.000000e+00 : f32
    %24 = vector.broadcast %cst_11 : f32 to vector<128x128xf32>
    %25 = arith.cmpf ogt, %23, %24 : vector<128x128xf32>
    %cst_12 = arith.constant 1.000000e-01 : f32
    %26 = vector.broadcast %cst_12 : f32 to vector<128x128xf32>
    %27 = arith.mulf %26, %23 : vector<128x128xf32>
    %28 = arith.select %25, %23, %27 : vector<128x128xi1>, vector<128x128xf32>
    %29 = arith.truncf %28 : vector<128x128xf32> to vector<128x128xbf16>
    %c0_13 = arith.constant 0 : index
    %c0_14 = arith.constant 0 : index
    %30 = vector.load %arg5[%c0_13, %c0_14] : memref<128x128xbf16, #tpu.memory_space<vmem>>, vector<128x128xbf16>
    tpu.vector_store %arg5[%c0_13, %c0_14], %29 {strides = array<i32>} : memref<128x128xbf16, #tpu.memory_space<vmem>>, vector<128x128xbf16>,
    return
  }
  func.func @transform_0(%arg0: i32) -> (i32, i32) {
    %c0_i32 = arith.constant 0 : i32
    %c0_i32_0 = arith.constant 0 : i32
    return %arg0, %c0_i32 : i32, i32
  }
  func.func @transform_1(%arg0: i32) -> (i32, i32) {
    %c0_i32 = arith.constant 0 : i32
    %c0_i32_0 = arith.constant 0 : i32
    %c0_i32_1 = arith.constant 0 : i32
    return %c0_i32, %c0_i32_0 : i32, i32
  }
  func.func @transform_2(%arg0: i32) -> (i32, i32) {
    %c0_i32 = arith.constant 0 : i32
    %c0_i32_0 = arith.constant 0 : i32
    %c0_i32_1 = arith.constant 0 : i32
    return %c0_i32, %c0_i32_0 : i32, i32
  }
  func.func @transform_3(%arg0: i32) -> (i32, i32) {
    %c0_i32 = arith.constant 0 : i32
    %c0_i32_0 = arith.constant 0 : i32
    %c0_i32_1 = arith.constant 0 : i32
    return %c0_i32, %c0_i32_0 : i32, i32
  }
  func.func @transform_4(%arg0: i32) -> (i32, i32) {
    %c0_i32 = arith.constant 0 : i32
    %c0_i32_0 = arith.constant 0 : i32
    return %arg0, %c0_i32 : i32, i32
  }
}

module attributes {stable_mosaic.version = 11 : i64} {
  func.func @_conv_single_k_kernel(%arg0: i32, %arg1: memref<32x1024xbf16, #tpu.memory_space<vmem>>, %arg2: memref<1024x128xbf16, #tpu.memory_space<vmem>>, %arg3: memref<1x128xf32, #tpu.memory_space<vmem>>, %arg4: memref<32x128xbf16, #tpu.memory_space<vmem>>) attributes {dimension_semantics = [#tpu.dimension_semantics<parallel>], iteration_bounds = array<i64: 1>, scalar_prefetch = 0 : i64, scratch_operands = 0 : i64, tpu.core_type = #tpu.core_type<tc>, window_params = [{transform_indices = @transform_0, window_bounds = array<i64: 32, 1024>}, {pipeline_mode = #tpu.pipeline_mode<synchronous>, transform_indices = @transform_1, window_bounds = array<i64: 1024, 128>}, {pipeline_mode = #tpu.pipeline_mode<synchronous>, transform_indices = @transform_2, window_bounds = array<i64: 1, 128>}, {transform_indices = @transform_3, window_bounds = array<i64: 32, 128>}]} {
    %c0 = arith.constant 0 : index
    %c0_0 = arith.constant 0 : index
    %0 = vector.load %arg1[%c0, %c0_0] : memref<32x1024xbf16, #tpu.memory_space<vmem>>, vector<32x1024xbf16>
    %c0_1 = arith.constant 0 : index
    %c0_2 = arith.constant 0 : index
    %1 = vector.load %arg2[%c0_1, %c0_2] : memref<1024x128xbf16, #tpu.memory_space<vmem>>, vector<1024x128xbf16>
    %cst = arith.constant dense<0.000000e+00> : vector<32x128xf32>
    %2 = tpu.matmul %0, %1, %cst {dimension_numbers = #tpu.dot_dimension_numbers<[1], [0], [0], [1], [0, 0, 1, 1], [], []>} : vector<32x1024xbf16>, vector<1024x128xbf16>, vector<32x128xf32> -> vector<32x128xf32>
    %c0_3 = arith.constant 0 : index
    %c0_4 = arith.constant 0 : index
    %3 = vector.load %arg3[%c0_3, %c0_4] : memref<1x128xf32, #tpu.memory_space<vmem>>, vector<1x128xf32>
    %4 = vector.broadcast %3 : vector<1x128xf32> to vector<32x128xf32>
    %5 = arith.addf %2, %4 : vector<32x128xf32>
    %6 = arith.truncf %5 : vector<32x128xf32> to vector<32x128xbf16>
    %c0_5 = arith.constant 0 : index
    %c0_6 = arith.constant 0 : index
    %7 = vector.load %arg4[%c0_5, %c0_6] : memref<32x128xbf16, #tpu.memory_space<vmem>>, vector<32x128xbf16>
    tpu.vector_store %arg4[%c0_5, %c0_6], %6 {strides = array<i32>} : memref<32x128xbf16, #tpu.memory_space<vmem>>, vector<32x128xbf16>,
    return
  }
  func.func @transform_0(%arg0: i32) -> (i32, i32) {
    %c0_i32 = arith.constant 0 : i32
    %c0_i32_0 = arith.constant 0 : i32
    return %arg0, %c0_i32 : i32, i32
  }
  func.func @transform_1(%arg0: i32) -> (i32, i32) {
    %c0_i32 = arith.constant 0 : i32
    %c0_i32_0 = arith.constant 0 : i32
    %c0_i32_1 = arith.constant 0 : i32
    return %c0_i32, %c0_i32_0 : i32, i32
  }
  func.func @transform_2(%arg0: i32) -> (i32, i32) {
    %c0_i32 = arith.constant 0 : i32
    %c0_i32_0 = arith.constant 0 : i32
    %c0_i32_1 = arith.constant 0 : i32
    return %c0_i32, %c0_i32_0 : i32, i32
  }
  func.func @transform_3(%arg0: i32) -> (i32, i32) {
    %c0_i32 = arith.constant 0 : i32
    %c0_i32_0 = arith.constant 0 : i32
    return %arg0, %c0_i32 : i32, i32
  }
}

module attributes {stable_mosaic.version = 11 : i64} {
  func.func @_bn_lrelu_head_kernel(%arg0: memref<2x16x128xbf16, #tpu.memory_space<vmem>>, %arg1: memref<1x1x128xf32, #tpu.memory_space<vmem>>, %arg2: memref<1x1x128xf32, #tpu.memory_space<vmem>>, %arg3: memref<1x16x128xf32, #tpu.memory_space<vmem>>, %arg4: memref<1x1xf32, #tpu.memory_space<vmem>>, %arg5: memref<2x1xf32, #tpu.memory_space<vmem>>) attributes {dimension_semantics = [], scalar_prefetch = 0 : i64, scratch_operands = 0 : i64, tpu.core_type = #tpu.core_type<tc>} {
    %c0 = arith.constant 0 : index
    %c0_0 = arith.constant 0 : index
    %c0_1 = arith.constant 0 : index
    %0 = vector.load %arg0[%c0, %c0_0, %c0_1] : memref<2x16x128xbf16, #tpu.memory_space<vmem>>, vector<2x16x128xbf16>
    %1 = arith.extf %0 : vector<2x16x128xbf16> to vector<2x16x128xf32>
    %cst = arith.constant dense<0.000000e+00> : vector<2x128xf32>
    %2 = vector.multi_reduction <add>, %1, %cst [1] : vector<2x16x128xf32> to vector<2x128xf32>
    %3 = vector.shape_cast %2 : vector<2x128xf32> to vector<2x1x128xf32>
    %cst_2 = arith.constant 1.600000e+01 : f32
    %4 = vector.broadcast %cst_2 : f32 to vector<2x1x128xf32>
    %5 = arith.divf %3, %4 : vector<2x1x128xf32>
    %cst_3 = arith.constant dense<0.000000e+00> : vector<1x128xf32>
    %6 = vector.multi_reduction <add>, %5, %cst_3 [0] : vector<2x1x128xf32> to vector<1x128xf32>
    %7 = vector.shape_cast %6 : vector<1x128xf32> to vector<1x1x128xf32>
    %cst_4 = arith.constant 2.000000e+00 : f32
    %8 = vector.broadcast %cst_4 : f32 to vector<1x1x128xf32>
    %9 = arith.divf %7, %8 : vector<1x1x128xf32>
    %10 = arith.mulf %1, %1 : vector<2x16x128xf32>
    %cst_5 = arith.constant dense<0.000000e+00> : vector<2x128xf32>
    %11 = vector.multi_reduction <add>, %10, %cst_5 [1] : vector<2x16x128xf32> to vector<2x128xf32>
    %12 = vector.shape_cast %11 : vector<2x128xf32> to vector<2x1x128xf32>
    %cst_6 = arith.constant 1.600000e+01 : f32
    %13 = vector.broadcast %cst_6 : f32 to vector<2x1x128xf32>
    %14 = arith.divf %12, %13 : vector<2x1x128xf32>
    %cst_7 = arith.constant dense<0.000000e+00> : vector<1x128xf32>
    %15 = vector.multi_reduction <add>, %14, %cst_7 [0] : vector<2x1x128xf32> to vector<1x128xf32>
    %16 = vector.shape_cast %15 : vector<1x128xf32> to vector<1x1x128xf32>
    %cst_8 = arith.constant 2.000000e+00 : f32
    %17 = vector.broadcast %cst_8 : f32 to vector<1x1x128xf32>
    %18 = arith.divf %16, %17 : vector<1x1x128xf32>
    %19 = arith.mulf %9, %9 : vector<1x1x128xf32>
    %20 = arith.subf %18, %19 : vector<1x1x128xf32>
    %cst_9 = arith.constant 0.000000e+00 : f32
    %21 = vector.broadcast %cst_9 : f32 to vector<1x1x128xf32>
    %22 = arith.maximumf %20, %21 : vector<1x1x128xf32>
    %23 = vector.broadcast %9 : vector<1x1x128xf32> to vector<2x16x128xf32>
    %24 = arith.subf %1, %23 : vector<2x16x128xf32>
    %cst_10 = arith.constant 9.99999974E-6 : f32
    %25 = vector.broadcast %cst_10 : f32 to vector<1x1x128xf32>
    %26 = arith.addf %22, %25 : vector<1x1x128xf32>
    %27 = math.rsqrt %26 : vector<1x1x128xf32>
    %c0_11 = arith.constant 0 : index
    %c0_12 = arith.constant 0 : index
    %c0_13 = arith.constant 0 : index
    %28 = vector.load %arg1[%c0_11, %c0_12, %c0_13] : memref<1x1x128xf32, #tpu.memory_space<vmem>>, vector<1x1x128xf32>
    %29 = arith.mulf %27, %28 : vector<1x1x128xf32>
    %30 = vector.broadcast %29 : vector<1x1x128xf32> to vector<2x16x128xf32>
    %31 = arith.mulf %24, %30 : vector<2x16x128xf32>
    %c0_14 = arith.constant 0 : index
    %c0_15 = arith.constant 0 : index
    %c0_16 = arith.constant 0 : index
    %32 = vector.load %arg2[%c0_14, %c0_15, %c0_16] : memref<1x1x128xf32, #tpu.memory_space<vmem>>, vector<1x1x128xf32>
    %33 = vector.broadcast %32 : vector<1x1x128xf32> to vector<2x16x128xf32>
    %34 = arith.addf %31, %33 : vector<2x16x128xf32>
    %cst_17 = arith.constant 0.000000e+00 : f32
    %35 = vector.broadcast %cst_17 : f32 to vector<2x16x128xf32>
    %36 = arith.cmpf ogt, %34, %35 : vector<2x16x128xf32>
    %cst_18 = arith.constant 1.000000e-01 : f32
    %37 = vector.broadcast %cst_18 : f32 to vector<2x16x128xf32>
    %38 = arith.mulf %37, %34 : vector<2x16x128xf32>
    %39 = arith.select %36, %34, %38 : vector<2x16x128xi1>, vector<2x16x128xf32>
    %c0_19 = arith.constant 0 : index
    %c0_20 = arith.constant 0 : index
    %c0_21 = arith.constant 0 : index
    %40 = vector.load %arg3[%c0_19, %c0_20, %c0_21] : memref<1x16x128xf32, #tpu.memory_space<vmem>>, vector<1x16x128xf32>
    %41 = vector.broadcast %40 : vector<1x16x128xf32> to vector<2x16x128xf32>
    %42 = arith.mulf %39, %41 : vector<2x16x128xf32>
    %cst_22 = arith.constant dense<0.000000e+00> : vector<2x16xf32>
    %43 = vector.multi_reduction <add>, %42, %cst_22 [2] : vector<2x16x128xf32> to vector<2x16xf32>
    %44 = vector.shape_cast %43 : vector<2x16xf32> to vector<2x16x1xf32>
    %cst_23 = arith.constant dense<0.000000e+00> : vector<2x1xf32>
    %45 = vector.multi_reduction <add>, %44, %cst_23 [1] : vector<2x16x1xf32> to vector<2x1xf32>
    %c0_24 = arith.constant 0 : index
    %c0_25 = arith.constant 0 : index
    %46 = vector.load %arg4[%c0_24, %c0_25] : memref<1x1xf32, #tpu.memory_space<vmem>>, vector<1x1xf32>
    %47 = vector.broadcast %46 : vector<1x1xf32> to vector<2x1xf32>
    %48 = arith.addf %45, %47 : vector<2x1xf32>
    %c0_26 = arith.constant 0 : index
    %c0_27 = arith.constant 0 : index
    %49 = vector.load %arg5[%c0_26, %c0_27] : memref<2x1xf32, #tpu.memory_space<vmem>>, vector<2x1xf32>
    tpu.vector_store %arg5[%c0_26, %c0_27], %48 {strides = array<i32>} : memref<2x1xf32, #tpu.memory_space<vmem>>, vector<2x1xf32>,
    return
  }
}

</mosaic_0001>

<bundles_post_ra>
// kernel: netd_dcgan_forward.7
= control target key start
LH: loop header
LB: loop body
LE: loop exit
PB: predicated region body
PF: predicated region fallthrough
CT: control target
= control target key end

     0   :  { %s1964_s12 = smov 0   ;;  %s2169_s0 = inlined_call_operand.vmem [shape: bf16[2048,48], index: 0, kind: input, shape index: {}]   ;;  %s2170_s1 = inlined_call_operand.vmem [shape: bf16[48,128], index: 1, kind: input, shape index: {}]   ;;  %s2171_s2 = inlined_call_operand.vmem [shape: f32[1,128], index: 2, kind: input, shape index: {}]   ;;  %s2172_s3 = inlined_call_operand.vmem [shape: bf16[2048,128], index: 3, kind: output, shape index: {}]  }
   0x1 LB: > { %s1384_s13 = sadd.s32 4294967295, %s1942_s12   ;;  %p1388_p0 = scmp.ge.s32.totalorder %s1942_s12, 1  ;;  %s1942_s12 = sphi %s1964_s12, %s13_s12  }
   0x2   : > { %p138_p1 = scmp.lt.s32.totalorder %s1942_s12, 5 }
   0x4   : > { %p139_p2 = pnand %p1388_p0, %p138_p1 }
   0x5   : > { %s1389_s16 = sshll.u32 (!%p139_p2), %s1384_s13, 6 }
   0x6   : > { %142 = sbr.rel (%p139_p2) target bundleno = 294 (0x126), region = 32  ;;  %p163_p3 = scmp.lt.s32.totalorder (!%p139_p2), %s1389_s16, 255 }
   0xb   : > { %v1901_v0 = vld [vmem:[%s2170_s1 + $0x10] sm:$0xff]   ;;  %v1902_v1 = vld [vmem:[%s2170_s1 + $0x8] sm:$0xff]   ;;  %s2174_s16 = smov (!%p163_p3, %s1389_s16), 255  ;;  %v1903_v2 = vld [vmem:[%s2170_s1] sm:$0xff]   ;;  %vm430_vm0 = vcmask 392192  }
   0xc   : > { %1817 = vmatprep.subr.bf16.mxu0 %v1901_v0  ;;  %1887 = vmatprep.subr.bf16.mxu1 %v1901_v0  ;;  %s1390_s21 = sshll.u32 %s2174_s16, 2  ;;  %v2058_v35 = vld [vmem:[%s2171_s2] ss:$0 sm:$0xff] }
   0xd   : > { %1818 = vmatpush3.bf16.msra.mxu0 %v1901_v0  ;;  %1890 = vmatpush3.bf16.msra.mxu1 %v1901_v0  ;;  %s1989_s24 = scalar_lea.vmem %s2169_s0, %s1390_s21  ;;  %s2073_s29 = scalar_lea.vmem %s2172_s3, %s1390_s21 }
   0xe   : > { %1819 = vmatprep.subr.bf16.mxu0 %v1902_v1  ;;  %1888 = vmatprep.subr.bf16.mxu1 %v1902_v1  ;;  %v1904_v3 = vld [vmem:[%s1989_s24] sm:$0xff]   ;;  %v1906_v5 = vld [vmem:[%s1989_s24 + $0x8] sm:$0xff]   ;;  %v1908_v7 = vld [vmem:[%s1989_s24 + $0x10] sm:$0xff]  }
   0xf   : > { %v1905_v4 = vld [vmem:[%s1989_s24 + $0x80] sm:$0xff]   ;;  %1823 = vmatprep.mubr.msk.bf16.mxu0 %vm430_vm0, %v1904_v3  ;;  %v1907_v6 = vld [vmem:[%s1989_s24 + $0x88] sm:$0xff]   ;;  %v1909_v8 = vld [vmem:[%s1989_s24 + $0x90] sm:$0xff]  }
  0x10   : > { %1855 = vmatprep.mubr.msk.bf16.mxu1 %vm430_vm0, %v1905_v4  ;;  %v1910_v9 = vld [vmem:[%s1989_s24 + $0x18] sm:$0xff]   ;;  %v1912_v11 = vld [vmem:[%s1989_s24 + $0x20] sm:$0xff]   ;;  %v1914_v13 = vld [vmem:[%s1989_s24 + $0x28] sm:$0xff]  }
  0x11   : > { %1820 = vmatpush3.bf16.msra.mxu0 %v1902_v1  ;;  %1891 = vmatpush3.bf16.msra.mxu1 %v1902_v1  ;;  %v1911_v10 = vld [vmem:[%s1989_s24 + $0x98] sm:$0xff]   ;;  %v1913_v12 = vld [vmem:[%s1989_s24 + $0xa0] sm:$0xff]   ;;  %v1915_v14 = vld [vmem:[%s1989_s24 + $0xa8] sm:$0xff]  }
  0x12   : > { %1821 = vmatprep.subr.bf16.mxu0 %v1903_v2  ;;  %1889 = vmatprep.subr.bf16.mxu1 %v1903_v2  ;;  %v1916_v15 = vld [vmem:[%s1989_s24 + $0x30] sm:$0xff]   ;;  %v1918_v17 = vld [vmem:[%s1989_s24 + $0x38] sm:$0xff]   ;;  %v1920_v19 = vld [vmem:[%s1989_s24 + $0x40] sm:$0xff]  }
  0x13   : > { %v1917_v16 = vld [vmem:[%s1989_s24 + $0xb0] sm:$0xff]   ;;  %v1919_v18 = vld [vmem:[%s1989_s24 + $0xb8] sm:$0xff]   ;;  %v1921_v20 = vld [vmem:[%s1989_s24 + $0xc0] sm:$0xff]  }
  0x14   : > { %v1922_v21 = vld [vmem:[%s1989_s24 + $0x48] sm:$0xff]   ;;  %v1924_v23 = vld [vmem:[%s1989_s24 + $0x50] sm:$0xff]   ;;  %v1926_v25 = vld [vmem:[%s1989_s24 + $0x58] sm:$0xff]  }
  0x15   : > { %1822 = vmatpush3.bf16.msra.mxu0 %v1903_v2  ;;  %1892 = vmatpush3.bf16.msra.mxu1 %v1903_v2  ;;  %v1923_v22 = vld [vmem:[%s1989_s24 + $0xc8] sm:$0xff]   ;;  %v1925_v24 = vld [vmem:[%s1989_s24 + $0xd0] sm:$0xff]   ;;  %v1927_v26 = vld [vmem:[%s1989_s24 + $0xd8] sm:$0xff]  }
  0x16   : > { %v1928_v27 = vld [vmem:[%s1989_s24 + $0x60] sm:$0xff]   ;;  %v1930_v29 = vld [vmem:[%s1989_s24 + $0x68] sm:$0xff]   ;;  %v1932_v31 = vld [vmem:[%s1989_s24 + $0x70] sm:$0xff]  }
  0x17   : > { %v1929_v28 = vld [vmem:[%s1989_s24 + $0xe0] sm:$0xff]   ;;  %v1931_v30 = vld [vmem:[%s1989_s24 + $0xe8] sm:$0xff]   ;;  %v1933_v32 = vld [vmem:[%s1989_s24 + $0xf0] sm:$0xff]  }
  0x18   : > { %1824 = vmatmul.mubr.msk.bf16.vlgmr.msra.gmra.mxu0 %vm430_vm0, %v1906_v5  ;;  %1856 = vmatmul.mubr.msk.bf16.vlgmr.msra.gmra.mxu1 %vm430_vm0, %v1907_v6  ;;  %v1934_v33 = vld [vmem:[%s1989_s24 + $0x78] sm:$0xff]  }
  0x19   : > { %1827 = vmatprep.mubr.msk.bf16.mxu0 %vm430_vm0, %v1908_v7  ;;  %1859 = vmatprep.mubr.msk.bf16.mxu1 %vm430_vm0, %v1909_v8  ;;  %v1935_v34 = vld [vmem:[%s1989_s24 + $0xf8] sm:$0xff]  }
  0x20   : > { %1828 = vmatmul.mubr.msk.bf16.gmra.mxu0 %vm430_vm0, %v1910_v9  ;;  %1860 = vmatmul.mubr.msk.bf16.gmra.mxu1 %vm430_vm0, %v1911_v10 }
  0x21   : > { %1831 = vmatprep.mubr.msk.bf16.mxu0 %vm430_vm0, %v1912_v11  ;;  %1863 = vmatprep.mubr.msk.bf16.mxu1 %vm430_vm0, %v1913_v12 }
  0x28   : > { %1832 = vmatmul.mubr.msk.bf16.gmra.mxu0 %vm430_vm0, %v1914_v13  ;;  %1864 = vmatmul.mubr.msk.bf16.gmra.mxu1 %vm430_vm0, %v1915_v14 }
  0x29   : > { %1835 = vmatprep.mubr.msk.bf16.mxu0 %vm430_vm0, %v1916_v15  ;;  %1867 = vmatprep.mubr.msk.bf16.mxu1 %vm430_vm0, %v1917_v16 }
  0x30   : > { %1836 = vmatmul.mubr.msk.bf16.gmra.mxu0 %vm430_vm0, %v1918_v17  ;;  %1868 = vmatmul.mubr.msk.bf16.gmra.mxu1 %vm430_vm0, %v1919_v18 }
  0x31   : > { %1839 = vmatprep.mubr.msk.bf16.mxu0 %vm430_vm0, %v1920_v19  ;;  %1871 = vmatprep.mubr.msk.bf16.mxu1 %vm430_vm0, %v1921_v20 }
  0x38   : > { %1840 = vmatmul.mubr.msk.bf16.gmra.mxu0 %vm430_vm0, %v1922_v21  ;;  %1872 = vmatmul.mubr.msk.bf16.gmra.mxu1 %vm430_vm0, %v1923_v22 }
  0x39   : > { %1843 = vmatprep.mubr.msk.bf16.mxu0 %vm430_vm0, %v1924_v23  ;;  %1875 = vmatprep.mubr.msk.bf16.mxu1 %vm430_vm0, %v1925_v24 }
  0x40   : > { %1844 = vmatmul.mubr.msk.bf16.gmra.mxu0 %vm430_vm0, %v1926_v25  ;;  %1876 = vmatmul.mubr.msk.bf16.gmra.mxu1 %vm430_vm0, %v1927_v26 }
  0x41   : > { %1847 = vmatprep.mubr.msk.bf16.mxu0 %vm430_vm0, %v1928_v27  ;;  %1879 = vmatprep.mubr.msk.bf16.mxu1 %vm430_vm0, %v1929_v28 }
  0x48   : > { %1848 = vmatmul.mubr.msk.bf16.gmra.mxu0 %vm430_vm0, %v1930_v29  ;;  %1880 = vmatmul.mubr.msk.bf16.gmra.mxu1 %vm430_vm0, %v1931_v30 }
  0x49   : > { %1851 = vmatprep.mubr.msk.bf16.mxu0 %vm430_vm0, %v1932_v31  ;;  %1883 = vmatprep.mubr.msk.bf16.mxu1 %vm430_vm0, %v1933_v32 }
  0x50   : > { %1852 = vmatmul.mubr.msk.bf16.gmra.mxu0 %vm430_vm0, %v1934_v33  ;;  %1884 = vmatmul.mubr.msk.bf16.gmra.mxu1 %vm430_vm0, %v1935_v34 }
  0xd8   : > { %v1825_v36 = vpop.f32.mrf.mxu0  ;;  %v1857_v37 = vpop.f32.mrf.mxu1 }
  0xd9   : > { %v570_v38 = vadd.f32 %v1825_v36, %v2058_v35  ;;  %v698_v39 = vadd.f32 %v1857_v37, %v2058_v35 }
  0xda   : > { %v561_v40 = vpop.f32.mrf.mxu0  ;;  %v689_v41 = vpop.f32.mrf.mxu1 }
  0xdb   : > { %vm818_vm1 = vcmp.gt.f32.partialorder %v570_v38, 0.0  ;;  %v882_v42 = vmul.f32 0.1, %v570_v38  ;;  %vm850_vm2 = vcmp.gt.f32.partialorder %v698_v39, 0.0  ;;  %v914_v43 = vmul.f32 0.1, %v698_v39 }
  0xdc   : > { %v562_v44 = vadd.f32 %v2058_v35, %v561_v40  ;;  %v690_v45 = vadd.f32 %v2058_v35, %v689_v41  ;;  %v1826_v46 = vpop.f32.mrf.mxu0  ;;  %v1858_v47 = vpop.f32.mrf.mxu1 }
  0xdd   : > { %v946_v48 = vsel %vm818_vm1, %v570_v38, %v882_v42  ;;  %v573_v49 = vadd.f32 %v1826_v46, %v2058_v35  ;;  %v701_v50 = vadd.f32 %v1858_v47, %v2058_v35  ;;  %v978_v51 = vsel %vm850_vm2, %v698_v39, %v914_v43 }
  0xde   : > { %vm816_vm3 = vcmp.gt.f32.partialorder %v562_v44, 0.0  ;;  %v880_v52 = vmul.f32 0.1, %v562_v44  ;;  %vm848_vm4 = vcmp.gt.f32.partialorder %v690_v45, 0.0  ;;  %v564_v53 = vpop.f32.mrf.mxu0  ;;  %v692_v54 = vpop.f32.mrf.mxu1  ;;  %v912_v58 = vmul.f32 0.1, %v690_v45 }
  0xdf   : > { %vm819_vm5 = vcmp.gt.f32.partialorder %v573_v49, 0.0  ;;  %v883_v55 = vmul.f32 0.1, %v573_v49  ;;  %vm851_vm6 = vcmp.gt.f32.partialorder %v701_v50, 0.0  ;;  %v915_v56 = vmul.f32 0.1, %v701_v50 }
  0xe0   : > { %v944_v57 = vsel %vm816_vm3, %v562_v44, %v880_v52  ;;  %v565_v59 = vadd.f32 %v2058_v35, %v564_v53  ;;  %v693_v60 = vadd.f32 %v2058_v35, %v692_v54  ;;  %v1829_v61 = vpop.f32.mrf.mxu0  ;;  %v1861_v62 = vpop.f32.mrf.mxu1  ;;  %v976_v10 = vsel %vm848_vm4, %v690_v45, %v912_v58 }
  0xe1   : > { %v947_v63 = vsel %vm819_vm5, %v573_v49, %v883_v55  ;;  %v979_v0 = vsel %vm851_vm6, %v701_v50, %v915_v56  ;;  %v586_v1 = vadd.f32 %v1829_v61, %v2058_v35  ;;  %v714_v2 = vadd.f32 %v1861_v62, %v2058_v35 }
  0xe2   : > { %v1599_v3 = vpack.c.bf16 %v947_v63, %v946_v48  ;;  %v1679_v4 = vpack.c.bf16 %v979_v0, %v978_v51  ;;  %vm817_vm7 = vcmp.gt.f32.partialorder %v565_v59, 0.0  ;;  %v881_v5 = vmul.f32 0.1, %v565_v59  ;;  %v577_v6 = vpop.f32.mrf.mxu0  ;;  %v705_v7 = vpop.f32.mrf.mxu1 }
  0xe3   : > { %vm849_vm8 = vcmp.gt.f32.partialorder %v693_v60, 0.0  ;;  %v913_v8 = vmul.f32 0.1, %v693_v60  ;;  %vm822_vm9 = vcmp.gt.f32.partialorder %v586_v1, 0.0  ;;  %v886_v9 = vmul.f32 0.1, %v586_v1 }
  0xe4   : > { %1751 = vst [vmem:[%s2073_s29 + $0x8] sm:$0xff] %v1599_v3   ;;  %1767 = vst [vmem:[%s2073_s29 + $0x88] sm:$0xff] %v1679_v4   ;;  %v945_v11 = vsel %vm817_vm7, %v565_v59, %v881_v5  ;;  %v918_v12 = vmul.f32 0.1, %v714_v2  ;;  %v578_v13 = vadd.f32 %v2058_v35, %v577_v6  ;;  %v1830_v14 = vpop.f32.mrf.mxu0  ;;  %v1862_v15 = vpop.f32.mrf.mxu1  ;;  %vm854_vm10 = vcmp.gt.f32.partialorder %v714_v2, 0.0 }
  0xe5   : > { %v1594_v16 = vpack.c.bf16 %v945_v11, %v944_v57  ;;  %v977_v17 = vsel %vm849_vm8, %v693_v60, %v913_v8  ;;  %v706_v18 = vadd.f32 %v2058_v35, %v705_v7  ;;  %v950_v20 = vsel %vm822_vm9, %v586_v1, %v886_v9 }
  0xe6   : > { %v1674_v19 = vpack.c.bf16 %v977_v17, %v976_v10  ;;  %vm820_vm11 = vcmp.gt.f32.partialorder %v578_v13, 0.0  ;;  %v884_v21 = vmul.f32 0.1, %v578_v13  ;;  %v580_v22 = vpop.f32.mrf.mxu0  ;;  %v708_v23 = vpop.f32.mrf.mxu1  ;;  %v589_v25 = vadd.f32 %v1830_v14, %v2058_v35 }
  0xe7   : > { %1595 = vst [vmem:[%s2073_s29] sm:$0xff] %v1594_v16   ;;  %vm852_vm12 = vcmp.gt.f32.partialorder %v706_v18, 0.0  ;;  %v916_v24 = vmul.f32 0.1, %v706_v18  ;;  %v717_v26 = vadd.f32 %v1862_v15, %v2058_v35  ;;  %v982_v27 = vsel %vm854_vm10, %v714_v2, %v918_v12 }
  0xe8   : > { %1766 = vst [vmem:[%s2073_s29 + $0x80] sm:$0xff] %v1674_v19   ;;  %v948_v28 = vsel %vm820_vm11, %v578_v13, %v884_v21  ;;  %v581_v29 = vadd.f32 %v2058_v35, %v580_v22  ;;  %v709_v30 = vadd.f32 %v2058_v35, %v708_v23  ;;  %v1833_v31 = vpop.f32.mrf.mxu0  ;;  %v1865_v32 = vpop.f32.mrf.mxu1  ;;  %vm823_vm13 = vcmp.gt.f32.partialorder %v589_v25, 0.0 }
  0xe9   : > { %v980_v33 = vsel %vm852_vm12, %v706_v18, %v916_v24  ;;  %v887_v34 = vmul.f32 0.1, %v589_v25  ;;  %vm855_vm14 = vcmp.gt.f32.partialorder %v717_v26, 0.0  ;;  %v919_v36 = vmul.f32 0.1, %v717_v26 }
  0xea   : > { %vm821_vm15 = vcmp.gt.f32.partialorder %v581_v29, 0.0  ;;  %v885_v37 = vmul.f32 0.1, %v581_v29  ;;  %vm853_vm0 = vcmp.gt.f32.partialorder %v709_v30, 0.0  ;;  %v593_v38 = vpop.f32.mrf.mxu0  ;;  %v721_v39 = vpop.f32.mrf.mxu1  ;;  %v917_v41 = vmul.f32 0.1, %v709_v30 }
  0xeb   : > { %v951_v40 = vsel %vm823_vm13, %v589_v25, %v887_v34  ;;  %v602_v42 = vadd.f32 %v1833_v31, %v2058_v35  ;;  %v730_v43 = vadd.f32 %v1865_v32, %v2058_v35  ;;  %v983_v45 = vsel %vm855_vm14, %v717_v26, %v919_v36 }
  0xec   : > { %v1609_v44 = vpack.c.bf16 %v951_v40, %v950_v20  ;;  %v949_v46 = vsel %vm821_vm15, %v581_v29, %v885_v37  ;;  %v594_v47 = vadd.f32 %v2058_v35, %v593_v38  ;;  %v1834_v48 = vpop.f32.mrf.mxu0  ;;  %v1866_v49 = vpop.f32.mrf.mxu1  ;;  %v1689_v50 = vpack.c.bf16 %v983_v45, %v982_v27 }
  0xed   : > { %v1604_v51 = vpack.c.bf16 %v949_v46, %v948_v28  ;;  %v981_v52 = vsel %vm853_vm0, %v709_v30, %v917_v41  ;;  %vm826_vm1 = vcmp.gt.f32.partialorder %v602_v42, 0.0  ;;  %v890_v54 = vmul.f32 0.1, %v602_v42 }
  0xee   : > { %1753 = vst [vmem:[%s2073_s29 + $0x18] sm:$0xff] %v1609_v44   ;;  %v1684_v53 = vpack.c.bf16 %v981_v52, %v980_v33  ;;  %vm858_vm2 = vcmp.gt.f32.partialorder %v730_v43, 0.0  ;;  %v922_v55 = vmul.f32 0.1, %v730_v43  ;;  %v596_v56 = vpop.f32.mrf.mxu0  ;;  %v724_v57 = vpop.f32.mrf.mxu1  ;;  %1769 = vst [vmem:[%s2073_s29 + $0x98] sm:$0xff] %v1689_v50   ;;  %vm824_vm3 = vcmp.gt.f32.partialorder %v594_v47, 0.0 }
  0xef   : > { %1752 = vst [vmem:[%s2073_s29 + $0x10] sm:$0xff] %v1604_v51   ;;  %v888_v58 = vmul.f32 0.1, %v594_v47  ;;  %v722_v59 = vadd.f32 %v2058_v35, %v721_v39  ;;  %v605_v60 = vadd.f32 %v1834_v48, %v2058_v35  ;;  %v954_v61 = vsel %vm826_vm1, %v602_v42, %v890_v54 }
  0xf0   : > { %1768 = vst [vmem:[%s2073_s29 + $0x90] sm:$0xff] %v1684_v53   ;;  %v986_v62 = vsel %vm858_vm2, %v730_v43, %v922_v55  ;;  %v733_v63 = vadd.f32 %v1866_v49, %v2058_v35  ;;  %v597_v0 = vadd.f32 %v2058_v35, %v596_v56  ;;  %v1837_v1 = vpop.f32.mrf.mxu0  ;;  %v1869_v2 = vpop.f32.mrf.mxu1  ;;  %v725_v11 = vadd.f32 %v2058_v35, %v724_v57 }
  0xf1   : > { %v952_v3 = vsel %vm824_vm3, %v594_v47, %v888_v58  ;;  %vm856_vm4 = vcmp.gt.f32.partialorder %v722_v59, 0.0  ;;  %v920_v4 = vmul.f32 0.1, %v722_v59  ;;  %vm827_vm5 = vcmp.gt.f32.partialorder %v605_v60, 0.0 }
  0xf2   : > { %v891_v5 = vmul.f32 0.1, %v605_v60  ;;  %vm859_vm6 = vcmp.gt.f32.partialorder %v733_v63, 0.0  ;;  %v923_v6 = vmul.f32 0.1, %v733_v63  ;;  %vm825_vm7 = vcmp.gt.f32.partialorder %v597_v0, 0.0  ;;  %v609_v7 = vpop.f32.mrf.mxu0  ;;  %v737_v8 = vpop.f32.mrf.mxu1 }
  0xf3   : > { %v984_v9 = vsel %vm856_vm4, %v722_v59, %v920_v4  ;;  %v889_v10 = vmul.f32 0.1, %v597_v0  ;;  %v618_v12 = vadd.f32 %v1837_v1, %v2058_v35  ;;  %v746_v15 = vadd.f32 %v1869_v2, %v2058_v35 }
  0xf4   : > { %v955_v13 = vsel %vm827_vm5, %v605_v60, %v891_v5  ;;  %v987_v14 = vsel %vm859_vm6, %v733_v63, %v923_v6  ;;  %v610_v16 = vadd.f32 %v2058_v35, %v609_v7  ;;  %v1838_v17 = vpop.f32.mrf.mxu0  ;;  %v1870_v18 = vpop.f32.mrf.mxu1  ;;  %vm857_vm8 = vcmp.gt.f32.partialorder %v725_v11, 0.0 }
  0xf5   : > { %v1619_v19 = vpack.c.bf16 %v955_v13, %v954_v61  ;;  %v1699_v20 = vpack.c.bf16 %v987_v14, %v986_v62  ;;  %v953_v21 = vsel %vm825_vm7, %v597_v0, %v889_v10  ;;  %v921_v23 = vmul.f32 0.1, %v725_v11 }
  0xf6   : > { %v1614_v22 = vpack.c.bf16 %v953_v21, %v952_v3  ;;  %vm830_vm9 = vcmp.gt.f32.partialorder %v618_v12, 0.0  ;;  %v894_v24 = vmul.f32 0.1, %v618_v12  ;;  %v612_v25 = vpop.f32.mrf.mxu0  ;;  %v740_v26 = vpop.f32.mrf.mxu1  ;;  %vm862_vm10 = vcmp.gt.f32.partialorder %v746_v15, 0.0 }
  0xf7   : > { %1755 = vst [vmem:[%s2073_s29 + $0x28] sm:$0xff] %v1619_v19   ;;  %1771 = vst [vmem:[%s2073_s29 + $0xa8] sm:$0xff] %v1699_v20   ;;  %v926_v27 = vmul.f32 0.1, %v746_v15  ;;  %vm828_vm11 = vcmp.gt.f32.partialorder %v610_v16, 0.0  ;;  %v985_v29 = vsel %vm857_vm8, %v725_v11, %v921_v23  ;;  %v738_v31 = vadd.f32 %v2058_v35, %v737_v8 }
  0xf8   : > { %v892_v28 = vmul.f32 0.1, %v610_v16  ;;  %1754 = vst [vmem:[%s2073_s29 + $0x20] sm:$0xff] %v1614_v22   ;;  %v958_v30 = vsel %vm830_vm9, %v618_v12, %v894_v24  ;;  %v621_v32 = vadd.f32 %v1838_v17, %v2058_v35  ;;  %v1841_v33 = vpop.f32.mrf.mxu0  ;;  %v1873_v34 = vpop.f32.mrf.mxu1  ;;  %v1694_v36 = vpack.c.bf16 %v985_v29, %v984_v9 }
  0xf9   : > { %v990_v37 = vsel %vm862_vm10, %v746_v15, %v926_v27  ;;  %v749_v39 = vadd.f32 %v1870_v18, %v2058_v35  ;;  %vm860_vm12 = vcmp.gt.f32.partialorder %v738_v31, 0.0  ;;  %v924_v40 = vmul.f32 0.1, %v738_v31 }
  0xfa   : > { %v956_v38 = vsel %vm828_vm11, %v610_v16, %v892_v28  ;;  %vm831_vm13 = vcmp.gt.f32.partialorder %v621_v32, 0.0  ;;  %v895_v41 = vmul.f32 0.1, %v621_v32  ;;  %v625_v42 = vpop.f32.mrf.mxu0  ;;  %v753_v43 = vpop.f32.mrf.mxu1  ;;  %1770 = vst [vmem:[%s2073_s29 + $0xa0] sm:$0xff] %v1694_v36   ;;  %v613_v45 = vadd.f32 %v2058_v35, %v612_v25 }
  0xfb   : > { %vm863_vm14 = vcmp.gt.f32.partialorder %v749_v39, 0.0  ;;  %v927_v44 = vmul.f32 0.1, %v749_v39  ;;  %v741_v46 = vadd.f32 %v2058_v35, %v740_v26  ;;  %v988_v47 = vsel %vm860_vm12, %v738_v31, %v924_v40 }
  0xfc   : > { %v959_v48 = vsel %vm831_vm13, %v621_v32, %v895_v41  ;;  %v634_v49 = vadd.f32 %v1841_v33, %v2058_v35  ;;  %v762_v50 = vadd.f32 %v1873_v34, %v2058_v35  ;;  %v1842_v51 = vpop.f32.mrf.mxu0  ;;  %v1874_v52 = vpop.f32.mrf.mxu1  ;;  %vm829_vm15 = vcmp.gt.f32.partialorder %v613_v45, 0.0 }
  0xfd   : > { %v1629_v53 = vpack.c.bf16 %v959_v48, %v958_v30  ;;  %v991_v54 = vsel %vm863_vm14, %v749_v39, %v927_v44  ;;  %v893_v55 = vmul.f32 0.1, %v613_v45  ;;  %vm861_vm0 = vcmp.gt.f32.partialorder %v741_v46, 0.0 }
  0xfe   : > { %v1709_v56 = vpack.c.bf16 %v991_v54, %v990_v37  ;;  %v925_v57 = vmul.f32 0.1, %v741_v46  ;;  %vm834_vm1 = vcmp.gt.f32.partialorder %v634_v49, 0.0  ;;  %v628_v58 = vpop.f32.mrf.mxu0  ;;  %v756_v59 = vpop.f32.mrf.mxu1  ;;  %v898_v61 = vmul.f32 0.1, %v634_v49 }
  0xff   : > { %1757 = vst [vmem:[%s2073_s29 + $0x38] sm:$0xff] %v1629_v53   ;;  %v957_v60 = vsel %vm829_vm15, %v613_v45, %v893_v55  ;;  %vm866_vm2 = vcmp.gt.f32.partialorder %v762_v50, 0.0  ;;  %v930_v62 = vmul.f32 0.1, %v762_v50  ;;  %v626_v1 = vadd.f32 %v2058_v35, %v625_v42 }
 0x100   : > { %1773 = vst [vmem:[%s2073_s29 + $0xb8] sm:$0xff] %v1709_v56   ;;  %v1624_v63 = vpack.c.bf16 %v957_v60, %v956_v38  ;;  %v989_v0 = vsel %vm861_vm0, %v741_v46, %v925_v57  ;;  %v754_v2 = vadd.f32 %v2058_v35, %v753_v43  ;;  %v1845_v3 = vpop.f32.mrf.mxu0  ;;  %v1877_v4 = vpop.f32.mrf.mxu1  ;;  %v962_v6 = vsel %vm834_vm1, %v634_v49, %v898_v61 }
 0x101   : > { %v1704_v5 = vpack.c.bf16 %v989_v0, %v988_v47  ;;  %v994_v7 = vsel %vm866_vm2, %v762_v50, %v930_v62  ;;  %v637_v8 = vadd.f32 %v1842_v51, %v2058_v35  ;;  %vm832_vm3 = vcmp.gt.f32.partialorder %v626_v1, 0.0 }
 0x102   : > { %1756 = vst [vmem:[%s2073_s29 + $0x30] sm:$0xff] %v1624_v63   ;;  %v896_v9 = vmul.f32 0.1, %v626_v1  ;;  %vm864_vm4 = vcmp.gt.f32.partialorder %v754_v2, 0.0  ;;  %v928_v10 = vmul.f32 0.1, %v754_v2  ;;  %v641_v11 = vpop.f32.mrf.mxu0  ;;  %v769_v12 = vpop.f32.mrf.mxu1  ;;  %v765_v14 = vadd.f32 %v1874_v52, %v2058_v35 }
 0x103   : > { %1772 = vst [vmem:[%s2073_s29 + $0xb0] sm:$0xff] %v1704_v5   ;;  %vm835_vm5 = vcmp.gt.f32.partialorder %v637_v8, 0.0  ;;  %v899_v13 = vmul.f32 0.1, %v637_v8  ;;  %v629_v15 = vadd.f32 %v2058_v35, %v628_v58  ;;  %v757_v18 = vadd.f32 %v2058_v35, %v756_v59 }
 0x104   : > { %v960_v16 = vsel %vm832_vm3, %v626_v1, %v896_v9  ;;  %v992_v17 = vsel %vm864_vm4, %v754_v2, %v928_v10  ;;  %v650_v19 = vadd.f32 %v1845_v3, %v2058_v35  ;;  %v1846_v20 = vpop.f32.mrf.mxu0  ;;  %v1878_v21 = vpop.f32.mrf.mxu1  ;;  %vm867_vm6 = vcmp.gt.f32.partialorder %v765_v14, 0.0 }
 0x105   : > { %v963_v22 = vsel %vm835_vm5, %v637_v8, %v899_v13  ;;  %v931_v23 = vmul.f32 0.1, %v765_v14  ;;  %vm833_vm7 = vcmp.gt.f32.partialorder %v629_v15, 0.0  ;;  %v897_v25 = vmul.f32 0.1, %v629_v15 }
 0x106   : > { %v1639_v24 = vpack.c.bf16 %v963_v22, %v962_v6  ;;  %vm865_vm8 = vcmp.gt.f32.partialorder %v757_v18, 0.0  ;;  %v929_v26 = vmul.f32 0.1, %v757_v18  ;;  %v644_v27 = vpop.f32.mrf.mxu0  ;;  %v772_v28 = vpop.f32.mrf.mxu1  ;;  %vm838_vm9 = vcmp.gt.f32.partialorder %v650_v19, 0.0 }
 0x107   : > { %v995_v29 = vsel %vm867_vm6, %v765_v14, %v931_v23  ;;  %v902_v30 = vmul.f32 0.1, %v650_v19  ;;  %v778_v31 = vadd.f32 %v1877_v4, %v2058_v35  ;;  %v961_v33 = vsel %vm833_vm7, %v629_v15, %v897_v25 }
 0x108   : > { %1759 = vst [vmem:[%s2073_s29 + $0x48] sm:$0xff] %v1639_v24   ;;  %v1719_v32 = vpack.c.bf16 %v995_v29, %v994_v7  ;;  %v993_v34 = vsel %vm865_vm8, %v757_v18, %v929_v26  ;;  %v642_v36 = vadd.f32 %v2058_v35, %v641_v11  ;;  %v1849_v37 = vpop.f32.mrf.mxu0  ;;  %v1881_v38 = vpop.f32.mrf.mxu1  ;;  %v1634_v39 = vpack.c.bf16 %v961_v33, %v960_v16 }
 0x109   : > { %v1714_v40 = vpack.c.bf16 %v993_v34, %v992_v17  ;;  %v966_v41 = vsel %vm838_vm9, %v650_v19, %v902_v30  ;;  %vm870_vm10 = vcmp.gt.f32.partialorder %v778_v31, 0.0  ;;  %v934_v42 = vmul.f32 0.1, %v778_v31 }
 0x10a   : > { %1775 = vst [vmem:[%s2073_s29 + $0xc8] sm:$0xff] %v1719_v32   ;;  %vm836_vm11 = vcmp.gt.f32.partialorder %v642_v36, 0.0  ;;  %v900_v43 = vmul.f32 0.1, %v642_v36  ;;  %v770_v44 = vadd.f32 %v2058_v35, %v769_v12  ;;  %v657_v45 = vpop.f32.mrf.mxu0  ;;  %v785_v46 = vpop.f32.mrf.mxu1  ;;  %1758 = vst [vmem:[%s2073_s29 + $0x40] sm:$0xff] %v1634_v39   ;;  %v653_v47 = vadd.f32 %v1846_v20, %v2058_v35 }
 0x10b   : > { %1774 = vst [vmem:[%s2073_s29 + $0xc0] sm:$0xff] %v1714_v40   ;;  %v781_v48 = vadd.f32 %v1878_v21, %v2058_v35  ;;  %v645_v49 = vadd.f32 %v2058_v35, %v644_v27  ;;  %v773_v50 = vadd.f32 %v2058_v35, %v772_v28  ;;  %v998_v51 = vsel %vm870_vm10, %v778_v31, %v934_v42 }
 0x10c   : > { %v964_v52 = vsel %vm836_vm11, %v642_v36, %v900_v43  ;;  %vm868_vm12 = vcmp.gt.f32.partialorder %v770_v44, 0.0  ;;  %v932_v53 = vmul.f32 0.1, %v770_v44  ;;  %v1850_v54 = vpop.f32.mrf.mxu0  ;;  %v1882_v55 = vpop.f32.mrf.mxu1  ;;  %vm839_vm13 = vcmp.gt.f32.partialorder %v653_v47, 0.0 }
 0x10d   : > { %v903_v56 = vmul.f32 0.1, %v653_v47  ;;  %vm871_vm14 = vcmp.gt.f32.partialorder %v781_v48, 0.0  ;;  %v935_v57 = vmul.f32 0.1, %v781_v48  ;;  %vm837_vm15 = vcmp.gt.f32.partialorder %v645_v49, 0.0 }
 0x10e   : > { %v996_v58 = vsel %vm868_vm12, %v770_v44, %v932_v53  ;;  %v901_v59 = vmul.f32 0.1, %v645_v49  ;;  %vm869_vm0 = vcmp.gt.f32.partialorder %v773_v50, 0.0  ;;  %v660_v60 = vpop.f32.mrf.mxu0  ;;  %v788_v61 = vpop.f32.mrf.mxu1  ;;  %v933_v0 = vmul.f32 0.1, %v773_v50 }
 0x10f   : > { %v967_v62 = vsel %vm839_vm13, %v653_v47, %v903_v56  ;;  %v999_v63 = vsel %vm871_vm14, %v781_v48, %v935_v57  ;;  %v666_v1 = vadd.f32 %v1849_v37, %v2058_v35  ;;  %v794_v5 = vadd.f32 %v1881_v38, %v2058_v35 }
 0x110   : > { %v1649_v2 = vpack.c.bf16 %v967_v62, %v966_v41  ;;  %v1729_v3 = vpack.c.bf16 %v999_v63, %v998_v51  ;;  %v965_v4 = vsel %vm837_vm15, %v645_v49, %v901_v59  ;;  %v1853_v6 = vpop.f32.mrf.mxu0  ;;  %v1885_v7 = vpop.f32.mrf.mxu1  ;;  %v997_v9 = vsel %vm869_vm0, %v773_v50, %v933_v0 }
 0x111   : > { %v1644_v8 = vpack.c.bf16 %v965_v4, %v964_v52  ;;  %vm842_vm1 = vcmp.gt.f32.partialorder %v666_v1, 0.0  ;;  %v906_v10 = vmul.f32 0.1, %v666_v1  ;;  %v1724_v11 = vpack.c.bf16 %v997_v9, %v996_v58 }
 0x112   : > { %1761 = vst [vmem:[%s2073_s29 + $0x58] sm:$0xff] %v1649_v2   ;;  %1777 = vst [vmem:[%s2073_s29 + $0xd8] sm:$0xff] %v1729_v3   ;;  %vm874_vm2 = vcmp.gt.f32.partialorder %v794_v5, 0.0  ;;  %v938_v12 = vmul.f32 0.1, %v794_v5  ;;  %v658_v13 = vadd.f32 %v2058_v35, %v657_v45  ;;  %v786_v14 = vadd.f32 %v2058_v35, %v785_v46  ;;  %v673_v20 = vpop.f32.mrf.mxu0  ;;  %v801_v21 = vpop.f32.mrf.mxu1 }
 0x113   : > { %1760 = vst [vmem:[%s2073_s29 + $0x50] sm:$0xff] %v1644_v8   ;;  %v669_v15 = vadd.f32 %v1850_v54, %v2058_v35  ;;  %v797_v16 = vadd.f32 %v1882_v55, %v2058_v35  ;;  %1776 = vst [vmem:[%s2073_s29 + $0xd0] sm:$0xff] %v1724_v11   ;;  %v970_v17 = vsel %vm842_vm1, %v666_v1, %v906_v10 }
 0x114   : > { %vm840_vm3 = vcmp.gt.f32.partialorder %v658_v13, 0.0  ;;  %v904_v18 = vmul.f32 0.1, %v658_v13  ;;  %v661_v19 = vadd.f32 %v2058_v35, %v660_v60  ;;  %v1002_v22 = vsel %vm874_vm2, %v794_v5, %v938_v12  ;;  %v1854_v34 = vpop.f32.mrf.mxu0  ;;  %v1886_v36 = vpop.f32.mrf.mxu1 }
 0x115   : > { %vm872_vm4 = vcmp.gt.f32.partialorder %v786_v14, 0.0  ;;  %vm843_vm5 = vcmp.gt.f32.partialorder %v669_v15, 0.0  ;;  %v907_v23 = vmul.f32 0.1, %v669_v15  ;;  %v936_v24 = vmul.f32 0.1, %v786_v14 }
 0x116   : > { %vm875_vm6 = vcmp.gt.f32.partialorder %v797_v16, 0.0  ;;  %v939_v25 = vmul.f32 0.1, %v797_v16  ;;  %vm841_vm7 = vcmp.gt.f32.partialorder %v661_v19, 0.0  ;;  %v968_v26 = vsel %vm840_vm3, %v658_v13, %v904_v18  ;;  %v676_v50 = vpop.f32.mrf.mxu0  ;;  %v804_v51 = vpop.f32.mrf.mxu1 }
 0x117   : > { %v971_v27 = vsel %vm843_vm5, %v669_v15, %v907_v23  ;;  %v905_v28 = vmul.f32 0.1, %v661_v19  ;;  %v789_v29 = vadd.f32 %v2058_v35, %v788_v61  ;;  %v682_v32 = vadd.f32 %v1853_v6, %v2058_v35 }
 0x118   : > { %v1659_v30 = vpack.c.bf16 %v971_v27, %v970_v17  ;;  %v1003_v31 = vsel %vm875_vm6, %v797_v16, %v939_v25  ;;  %v810_v33 = vadd.f32 %v1885_v7, %v2058_v35  ;;  %v1000_v40 = vsel %vm872_vm4, %v786_v14, %v936_v24 }
 0x119   : > { %v1739_v37 = vpack.c.bf16 %v1003_v31, %v1002_v22  ;;  %v969_v38 = vsel %vm841_vm7, %v661_v19, %v905_v28  ;;  %vm873_vm8 = vcmp.gt.f32.partialorder %v789_v29, 0.0  ;;  %v937_v39 = vmul.f32 0.1, %v789_v29 }
 0x11a   : > { %1763 = vst [vmem:[%s2073_s29 + $0x68] sm:$0xff] %v1659_v30   ;;  %v1654_v41 = vpack.c.bf16 %v969_v38, %v968_v26  ;;  %vm846_vm9 = vcmp.gt.f32.partialorder %v682_v32, 0.0  ;;  %v910_v42 = vmul.f32 0.1, %v682_v32  ;;  %vm878_vm10 = vcmp.gt.f32.partialorder %v810_v33, 0.0 }
 0x11b   : > { %1779 = vst [vmem:[%s2073_s29 + $0xe8] sm:$0xff] %v1739_v37   ;;  %v1001_v43 = vsel %vm873_vm8, %v789_v29, %v937_v39  ;;  %v942_v44 = vmul.f32 0.1, %v810_v33  ;;  %v674_v45 = vadd.f32 %v2058_v35, %v673_v20  ;;  %v802_v47 = vadd.f32 %v2058_v35, %v801_v21 }
 0x11c   : > { %1762 = vst [vmem:[%s2073_s29 + $0x60] sm:$0xff] %v1654_v41   ;;  %v1734_v46 = vpack.c.bf16 %v1001_v43, %v1000_v40  ;;  %v685_v48 = vadd.f32 %v1854_v34, %v2058_v35  ;;  %v813_v49 = vadd.f32 %v1886_v36, %v2058_v35  ;;  %v974_v52 = vsel %vm846_vm9, %v682_v32, %v910_v42 }
 0x11d   : > { %v1006_v53 = vsel %vm878_vm10, %v810_v33, %v942_v44  ;;  %v908_v55 = vmul.f32 0.1, %v674_v45  ;;  %v677_v57 = vadd.f32 %v2058_v35, %v676_v50  ;;  %v805_v58 = vadd.f32 %v2058_v35, %v804_v51 }
 0x11e   : > { %1778 = vst [vmem:[%s2073_s29 + $0xe0] sm:$0xff] %v1734_v46   ;;  %vm847_vm11 = vcmp.gt.f32.partialorder %v685_v48, 0.0  ;;  %v911_v54 = vmul.f32 0.1, %v685_v48  ;;  %vm879_vm12 = vcmp.gt.f32.partialorder %v813_v49, 0.0  ;;  %vm844_vm13 = vcmp.gt.f32.partialorder %v674_v45, 0.0 }
 0x11f   : > { %v943_v56 = vmul.f32 0.1, %v813_v49  ;;  %vm876_vm14 = vcmp.gt.f32.partialorder %v802_v47, 0.0  ;;  %v940_v59 = vmul.f32 0.1, %v802_v47  ;;  %vm845_vm15 = vcmp.gt.f32.partialorder %v677_v57, 0.0 }
 0x120   : > { %v975_v60 = vsel %vm847_vm11, %v685_v48, %v911_v54  ;;  %v909_v63 = vmul.f32 0.1, %v677_v57  ;;  %vm877_vm0 = vcmp.gt.f32.partialorder %v805_v58, 0.0  ;;  %v941_v1 = vmul.f32 0.1, %v805_v58 }
 0x121   : > { %v1669_v61 = vpack.c.bf16 %v975_v60, %v974_v52  ;;  %v1007_v62 = vsel %vm879_vm12, %v813_v49, %v943_v56  ;;  %v972_v2 = vsel %vm844_vm13, %v674_v45, %v908_v55  ;;  %v1004_v4 = vsel %vm876_vm14, %v802_v47, %v940_v59 }
 0x122   : > { %v1749_v0 = vpack.c.bf16 %v1007_v62, %v1006_v53  ;;  %v973_v3 = vsel %vm845_vm15, %v677_v57, %v909_v63  ;;  %v1005_v5 = vsel %vm877_vm0, %v805_v58, %v941_v1 }
 0x123   : > { %1765 = vst [vmem:[%s2073_s29 + $0x78] sm:$0xff] %v1669_v61   ;;  %v1664_v35 = vpack.c.bf16 %v973_v3, %v972_v2  ;;  %v1744_v6 = vpack.c.bf16 %v1005_v5, %v1004_v4 }
 0x124   : > { %1781 = vst [vmem:[%s2073_s29 + $0xf8] sm:$0xff] %v1749_v0  }
 0x125   : > { %1764 = vst [vmem:[%s2073_s29 + $0x70] sm:$0xff] %v1664_v35   ;;  %1780 = vst [vmem:[%s2073_s29 + $0xf0] sm:$0xff] %v1744_v6  }
 0x126 PF: > { %s13_s12 = sadd.s32 1, %s1942_s12  }
 0x127   : > { %p10_p4 = scmp.ge.s32.totalorder %s13_s12, 6  }
 0x129   :  { %12 = sbr.rel (!%p10_p4) target bundleno = 1 (0x1), region = 62 }

// kernel: netd_dcgan_forward.8
= control target key start
LH: loop header
LB: loop body
LE: loop exit
PB: predicated region body
PF: predicated region fallthrough
CT: control target
= control target key end

     0   :  { %v1903_v0 = vmov 0   ;;  %vm1347_vm0 = vcmask 1040384   ;;  %s2693_s1 = inlined_call_operand.vmem [shape: bf16[256,128], index: 1, kind: input, shape index: {}]   ;;  %s2694_s0 = inlined_call_operand.vmem [shape: bf16[512,256], index: 0, kind: input, shape index: {}]   ;;  %s2695_s2 = inlined_call_operand.vmem [shape: f32[1,128], index: 2, kind: input, shape index: {}]   ;;  %s2696_s3 = inlined_call_operand.vmem [shape: bf16[512,128], index: 3, kind: output, shape index: {0}]   ;;  %s2697_s4 = inlined_call_operand.vmem [shape: f32[1,2,128], index: 4, kind: output, shape index: {1}]  }
   0x1   :  { %536 = vmatprep.subr.bf16.mxu0 %v1903_v0  ;;  %v1791_v1 = vld [vmem:[%s2693_s1 + $0x38] sm:$0xff]   ;;  %1758 = vmatprep.subr.bf16.mxu1 %v1903_v0  ;;  %v1792_v2 = vld [vmem:[%s2693_s1 + $0x30] sm:$0xff]   ;;  %v1793_v3 = vld [vmem:[%s2693_s1 + $0x28] sm:$0xff]  }
   0x2   :  { %537 = vmatpush1.bf16.msra.mxu0 %v1791_v1  ;;  %1774 = vmatpush1.bf16.msra.mxu1 %v1791_v1  ;;  %v1794_v4 = vld [vmem:[%s2693_s1 + $0x20] sm:$0xff]   ;;  %v1795_v5 = vld [vmem:[%s2693_s1 + $0x18] sm:$0xff]   ;;  %v1796_v7 = vld [vmem:[%s2693_s1 + $0x10] sm:$0xff]  }
   0x3   :  { %538 = vmatprep.subr.bf16.mxu0 %v1903_v0  ;;  %1759 = vmatprep.subr.bf16.mxu1 %v1903_v0  ;;  %v1809_v6 = vld [vmem:[%s2694_s0 + $0x4] ss:$8 sps:$4 sm:$0xff]   ;;  %v1799_v11 = vld [vmem:[%s2693_s1 + $0x78] sm:$0xff]   ;;  %v1800_v12 = vld [vmem:[%s2693_s1 + $0x70] sm:$0xff]  }
   0x4   :  { %568 = vmatprep.mubr.bf16.mxu0 %v1809_v6  ;;  %v1797_v8 = vld [vmem:[%s2693_s1 + $0x8] sm:$0xff]   ;;  %v1798_v9 = vld [vmem:[%s2693_s1] sm:$0xff]   ;;  %v1803_v15 = vld [vmem:[%s2693_s1 + $0x58] sm:$0xff]  }
   0x5   :  { %v1833_v10 = vld [vmem:[%s2694_s0 + $0x104] ss:$8 sps:$4 sm:$0xff]   ;;  %v1804_v16 = vld [vmem:[%s2693_s1 + $0x50] sm:$0xff]   ;;  %v1807_v19 = vld [vmem:[%s2694_s0] ss:$8 sps:$4 sm:$0xff]  }
   0x6   :  { %539 = vmatpush1.bf16.msra.mxu0 %v1792_v2  ;;  %1775 = vmatpush1.bf16.msra.mxu1 %v1792_v2  ;;  %v1801_v13 = vld [vmem:[%s2693_s1 + $0x68] sm:$0xff]   ;;  %v1802_v14 = vld [vmem:[%s2693_s1 + $0x60] sm:$0xff]   ;;  %v1810_v21 = vld [vmem:[%s2694_s0 + $0x14] ss:$8 sps:$4 sm:$0xff]  }
   0x7   :  { %540 = vmatprep.subr.bf16.mxu0 %v1903_v0  ;;  %1760 = vmatprep.subr.bf16.mxu1 %v1903_v0  ;;  %v1805_v17 = vld [vmem:[%s2693_s1 + $0x48] sm:$0xff]   ;;  %v1806_v18 = vld [vmem:[%s2693_s1 + $0x40] sm:$0xff]   ;;  %v1837_v22 = vld [vmem:[%s2694_s0 + $0x114] ss:$8 sps:$4 sm:$0xff]  }
   0x8   :  { %696 = vmatprep.mubr.bf16.mxu1 %v1833_v10  ;;  %v1831_v20 = vld [vmem:[%s2694_s0 + $0x100] ss:$8 sps:$4 sm:$0xff]   ;;  %v1812_v23 = vld [vmem:[%s2694_s0 + $0x10] ss:$8 sps:$4 sm:$0xff]   ;;  %v1813_v25 = vld [vmem:[%s2694_s0 + $0x24] ss:$8 sps:$4 sm:$0xff]  }
   0x9   :  { %v1839_v24 = vld [vmem:[%s2694_s0 + $0x110] ss:$8 sps:$4 sm:$0xff]   ;;  %v1843_v26 = vld [vmem:[%s2694_s0 + $0x124] ss:$8 sps:$4 sm:$0xff]   ;;  %v1815_v27 = vld [vmem:[%s2694_s0 + $0x20] ss:$8 sps:$4 sm:$0xff]  }
   0xa   :  { %541 = vmatpush1.bf16.msra.mxu0 %v1793_v3  ;;  %1776 = vmatpush1.bf16.msra.mxu1 %v1793_v3  ;;  %v1845_v28 = vld [vmem:[%s2694_s0 + $0x120] ss:$8 sps:$4 sm:$0xff]   ;;  %v1816_v29 = vld [vmem:[%s2694_s0 + $0x34] ss:$8 sps:$4 sm:$0xff]   ;;  %v1818_v31 = vld [vmem:[%s2694_s0 + $0x30] ss:$8 sps:$4 sm:$0xff]  }
   0xb   :  { %542 = vmatprep.subr.bf16.mxu0 %v1903_v0  ;;  %1761 = vmatprep.subr.bf16.mxu1 %v1903_v0  ;;  %v1849_v30 = vld [vmem:[%s2694_s0 + $0x134] ss:$8 sps:$4 sm:$0xff]   ;;  %v1851_v32 = vld [vmem:[%s2694_s0 + $0x130] ss:$8 sps:$4 sm:$0xff]   ;;  %v1819_v33 = vld [vmem:[%s2694_s0 + $0x44] ss:$8 sps:$4 sm:$0xff]  }
   0xc   :  { %v1855_v34 = vld [vmem:[%s2694_s0 + $0x144] ss:$8 sps:$4 sm:$0xff]   ;;  %v1821_v35 = vld [vmem:[%s2694_s0 + $0x40] ss:$8 sps:$4 sm:$0xff]   ;;  %v1822_v37 = vld [vmem:[%s2694_s0 + $0x54] ss:$8 sps:$4 sm:$0xff]  }
   0xd   :  { %v1857_v36 = vld [vmem:[%s2694_s0 + $0x140] ss:$8 sps:$4 sm:$0xff]   ;;  %v1861_v38 = vld [vmem:[%s2694_s0 + $0x154] ss:$8 sps:$4 sm:$0xff]   ;;  %v1824_v39 = vld [vmem:[%s2694_s0 + $0x50] ss:$8 sps:$4 sm:$0xff]  }
   0xe   :  { %543 = vmatpush1.bf16.msra.mxu0 %v1794_v4  ;;  %1777 = vmatpush1.bf16.msra.mxu1 %v1794_v4  ;;  %v1863_v40 = vld [vmem:[%s2694_s0 + $0x150] ss:$8 sps:$4 sm:$0xff]   ;;  %v1825_v41 = vld [vmem:[%s2694_s0 + $0x64] ss:$8 sps:$4 sm:$0xff]   ;;  %v1827_v43 = vld [vmem:[%s2694_s0 + $0x60] ss:$8 sps:$4 sm:$0xff]  }
   0xf   :  { %544 = vmatprep.subr.bf16.mxu0 %v1903_v0  ;;  %1762 = vmatprep.subr.bf16.mxu1 %v1903_v0  ;;  %v1867_v42 = vld [vmem:[%s2694_s0 + $0x164] ss:$8 sps:$4 sm:$0xff]   ;;  %v1869_v44 = vld [vmem:[%s2694_s0 + $0x160] ss:$8 sps:$4 sm:$0xff]   ;;  %v1828_v45 = vld [vmem:[%s2694_s0 + $0x74] ss:$8 sps:$4 sm:$0xff]  }
  0x10   :  { %v1873_v46 = vld [vmem:[%s2694_s0 + $0x174] ss:$8 sps:$4 sm:$0xff]   ;;  %v1830_v47 = vld [vmem:[%s2694_s0 + $0x70] ss:$8 sps:$4 sm:$0xff]   ;;  %v1834_v49 = vld [vmem:[%s2694_s0 + $0x84] ss:$8 sps:$4 sm:$0xff]  }
  0x11   :  { %v1875_v48 = vld [vmem:[%s2694_s0 + $0x170] ss:$8 sps:$4 sm:$0xff]   ;;  %v1879_v50 = vld [vmem:[%s2694_s0 + $0x184] ss:$8 sps:$4 sm:$0xff]   ;;  %v1836_v51 = vld [vmem:[%s2694_s0 + $0x80] ss:$8 sps:$4 sm:$0xff]  }
  0x12   :  { %545 = vmatpush1.bf16.msra.mxu0 %v1795_v5  ;;  %1778 = vmatpush1.bf16.msra.mxu1 %v1795_v5  ;;  %v1881_v52 = vld [vmem:[%s2694_s0 + $0x180] ss:$8 sps:$4 sm:$0xff]   ;;  %v1840_v53 = vld [vmem:[%s2694_s0 + $0x94] ss:$8 sps:$4 sm:$0xff]   ;;  %v1842_v55 = vld [vmem:[%s2694_s0 + $0x90] ss:$8 sps:$4 sm:$0xff]  }
  0x13   :  { %546 = vmatprep.subr.bf16.mxu0 %v1903_v0  ;;  %1763 = vmatprep.subr.bf16.mxu1 %v1903_v0  ;;  %v1882_v54 = vld [vmem:[%s2694_s0 + $0x194] ss:$8 sps:$4 sm:$0xff]   ;;  %v1884_v56 = vld [vmem:[%s2694_s0 + $0x190] ss:$8 sps:$4 sm:$0xff]   ;;  %v1846_v57 = vld [vmem:[%s2694_s0 + $0xa4] ss:$8 sps:$4 sm:$0xff]  }
  0x14   :  { %v1885_v58 = vld [vmem:[%s2694_s0 + $0x1a4] ss:$8 sps:$4 sm:$0xff]   ;;  %v1848_v59 = vld [vmem:[%s2694_s0 + $0xa0] ss:$8 sps:$4 sm:$0xff]   ;;  %v1852_v61 = vld [vmem:[%s2694_s0 + $0xb4] ss:$8 sps:$4 sm:$0xff]  }
  0x15   :  { %v1887_v60 = vld [vmem:[%s2694_s0 + $0x1a0] ss:$8 sps:$4 sm:$0xff]   ;;  %v1888_v62 = vld [vmem:[%s2694_s0 + $0x1b4] ss:$8 sps:$4 sm:$0xff]   ;;  %v1854_v63 = vld [vmem:[%s2694_s0 + $0xb0] ss:$8 sps:$4 sm:$0xff]  }
  0x16   :  { %547 = vmatpush1.bf16.msra.mxu0 %v1796_v7  ;;  %1779 = vmatpush1.bf16.msra.mxu1 %v1796_v7  ;;  %v1858_v1 = vld [vmem:[%s2694_s0 + $0xc4] ss:$8 sps:$4 sm:$0xff]   ;;  %v1860_v3 = vld [vmem:[%s2694_s0 + $0xc0] ss:$8 sps:$4 sm:$0xff]   ;;  %v1864_v5 = vld [vmem:[%s2694_s0 + $0xd4] ss:$8 sps:$4 sm:$0xff]  }
  0x17   :  { %548 = vmatprep.subr.bf16.mxu0 %v1903_v0  ;;  %1764 = vmatprep.subr.bf16.mxu1 %v1903_v0  ;;  %v1891_v2 = vld [vmem:[%s2694_s0 + $0x1c4] ss:$8 sps:$4 sm:$0xff]   ;;  %v1893_v4 = vld [vmem:[%s2694_s0 + $0x1c0] ss:$8 sps:$4 sm:$0xff]   ;;  %v1894_v6 = vld [vmem:[%s2694_s0 + $0x1d4] ss:$8 sps:$4 sm:$0xff]  }
  0x18   :  { %v1866_v7 = vld [vmem:[%s2694_s0 + $0xd0] ss:$8 sps:$4 sm:$0xff]   ;;  %v1897_v10 = vld [vmem:[%s2694_s0 + $0x1e4] ss:$8 sps:$4 sm:$0xff]  }
  0x1a   :  { %549 = vmatpush1.bf16.msra.mxu0 %v1797_v8  ;;  %1780 = vmatpush1.bf16.msra.mxu1 %v1797_v8  ;;  %v1896_v8 = vld [vmem:[%s2694_s0 + $0x1d0] ss:$8 sps:$4 sm:$0xff]  }
  0x1b   :  { %550 = vmatprep.subr.bf16.mxu0 %v1903_v0  ;;  %1765 = vmatprep.subr.bf16.mxu1 %v1903_v0 }
  0x1e   :  { %551 = vmatpush1.bf16.msra.mxu0 %v1798_v9  ;;  %1781 = vmatpush1.bf16.msra.mxu1 %v1798_v9  ;;  %v1870_v9 = vld [vmem:[%s2694_s0 + $0xe4] ss:$8 sps:$4 sm:$0xff]  }
  0x1f   :  { %552 = vmatprep.subr.bf16.mxu0 %v1903_v0  ;;  %1766 = vmatprep.subr.bf16.mxu1 %v1903_v0 }
  0x22   :  { %553 = vmatpush2.bf16.msra.mxu0 %v1799_v11  ;;  %1782 = vmatpush2.bf16.msra.mxu1 %v1799_v11  ;;  %v1872_v11 = vld [vmem:[%s2694_s0 + $0xe0] ss:$8 sps:$4 sm:$0xff]  }
  0x23   :  { %554 = vmatprep.subr.bf16.mxu0 %v1903_v0  ;;  %1767 = vmatprep.subr.bf16.mxu1 %v1903_v0 }
  0x26   :  { %555 = vmatpush2.bf16.msra.mxu0 %v1800_v12  ;;  %1783 = vmatpush2.bf16.msra.mxu1 %v1800_v12  ;;  %v1899_v12 = vld [vmem:[%s2694_s0 + $0x1e0] ss:$8 sps:$4 sm:$0xff]  }
  0x27   :  { %556 = vmatprep.subr.bf16.mxu0 %v1903_v0  ;;  %1768 = vmatprep.subr.bf16.mxu1 %v1903_v0 }
  0x2a   :  { %557 = vmatpush2.bf16.msra.mxu0 %v1801_v13  ;;  %1784 = vmatpush2.bf16.msra.mxu1 %v1801_v13  ;;  %v1876_v13 = vld [vmem:[%s2694_s0 + $0xf4] ss:$8 sps:$4 sm:$0xff]  }
  0x2b   :  { %558 = vmatprep.subr.bf16.mxu0 %v1903_v0  ;;  %1769 = vmatprep.subr.bf16.mxu1 %v1903_v0 }
  0x2e   :  { %559 = vmatpush2.bf16.msra.mxu0 %v1802_v14  ;;  %1785 = vmatpush2.bf16.msra.mxu1 %v1802_v14  ;;  %v1900_v14 = vld [vmem:[%s2694_s0 + $0x1f4] ss:$8 sps:$4 sm:$0xff]  }
  0x2f   :  { %560 = vmatprep.subr.bf16.mxu0 %v1903_v0  ;;  %1770 = vmatprep.subr.bf16.mxu1 %v1903_v0 }
  0x32   :  { %561 = vmatpush2.bf16.msra.mxu0 %v1803_v15  ;;  %1786 = vmatpush2.bf16.msra.mxu1 %v1803_v15  ;;  %v1878_v15 = vld [vmem:[%s2694_s0 + $0xf0] ss:$8 sps:$4 sm:$0xff]  }
  0x33   :  { %562 = vmatprep.subr.bf16.mxu0 %v1903_v0  ;;  %1771 = vmatprep.subr.bf16.mxu1 %v1903_v0 }
  0x36   :  { %563 = vmatpush2.bf16.msra.mxu0 %v1804_v16  ;;  %1787 = vmatpush2.bf16.msra.mxu1 %v1804_v16  ;;  %v1902_v16 = vld [vmem:[%s2694_s0 + $0x1f0] ss:$8 sps:$4 sm:$0xff]  }
  0x37   :  { %564 = vmatprep.subr.bf16.mxu0 %v1903_v0  ;;  %1772 = vmatprep.subr.bf16.mxu1 %v1903_v0 }
  0x3a   :  { %565 = vmatpush2.bf16.msra.mxu0 %v1805_v17  ;;  %1788 = vmatpush2.bf16.msra.mxu1 %v1805_v17 }
  0x3b   :  { %566 = vmatprep.subr.bf16.mxu0 %v1903_v0  ;;  %1773 = vmatprep.subr.bf16.mxu1 %v1903_v0  ;;  %v1890_v0 = vld [vmem:[%s2694_s0 + $0x1b0] ss:$8 sps:$4 sm:$0xff]  }
  0x3e   :  { %567 = vmatpush2.bf16.msra.mxu0 %v1806_v18  ;;  %1789 = vmatpush2.bf16.msra.mxu1 %v1806_v18 }
  0x41   :  { %569 = vmatmul.mubr.bf16.vlgmr.msra.gmra.mxu0 %v1807_v19  ;;  %697 = vmatmul.mubr.bf16.vlgmr.msra.gmra.mxu1 %v1831_v20  ;;  %v2204_v19 = vld [vmem:[%s2695_s2] ss:$0 sm:$0xff] }
  0x42   :  { %576 = vmatprep.mubr.bf16.mxu0 %v1810_v21  ;;  %704 = vmatprep.mubr.bf16.mxu1 %v1837_v22 }
  0x49   :  { %577 = vmatmul.mubr.bf16.gmra.mxu0 %v1812_v23  ;;  %705 = vmatmul.mubr.bf16.gmra.mxu1 %v1839_v24 }
  0x4a   :  { %584 = vmatprep.mubr.bf16.mxu0 %v1813_v25  ;;  %712 = vmatprep.mubr.bf16.mxu1 %v1843_v26 }
  0x51   :  { %585 = vmatmul.mubr.bf16.gmra.mxu0 %v1815_v27  ;;  %713 = vmatmul.mubr.bf16.gmra.mxu1 %v1845_v28 }
  0x52   :  { %592 = vmatprep.mubr.bf16.mxu0 %v1816_v29  ;;  %720 = vmatprep.mubr.bf16.mxu1 %v1849_v30 }
  0x59   :  { %593 = vmatmul.mubr.bf16.gmra.mxu0 %v1818_v31  ;;  %721 = vmatmul.mubr.bf16.gmra.mxu1 %v1851_v32 }
  0x5a   :  { %600 = vmatprep.mubr.bf16.mxu0 %v1819_v33  ;;  %728 = vmatprep.mubr.bf16.mxu1 %v1855_v34 }
  0x61   :  { %601 = vmatmul.mubr.bf16.gmra.mxu0 %v1821_v35  ;;  %729 = vmatmul.mubr.bf16.gmra.mxu1 %v1857_v36 }
  0x62   :  { %608 = vmatprep.mubr.bf16.mxu0 %v1822_v37  ;;  %736 = vmatprep.mubr.bf16.mxu1 %v1861_v38 }
  0x69   :  { %609 = vmatmul.mubr.bf16.gmra.mxu0 %v1824_v39  ;;  %737 = vmatmul.mubr.bf16.gmra.mxu1 %v1863_v40 }
  0x6a   :  { %616 = vmatprep.mubr.bf16.mxu0 %v1825_v41  ;;  %744 = vmatprep.mubr.bf16.mxu1 %v1867_v42 }
  0x71   :  { %617 = vmatmul.mubr.bf16.gmra.mxu0 %v1827_v43  ;;  %745 = vmatmul.mubr.bf16.gmra.mxu1 %v1869_v44 }
  0x72   :  { %624 = vmatprep.mubr.bf16.mxu0 %v1828_v45  ;;  %752 = vmatprep.mubr.bf16.mxu1 %v1873_v46 }
  0x79   :  { %625 = vmatmul.mubr.bf16.gmra.mxu0 %v1830_v47  ;;  %753 = vmatmul.mubr.bf16.gmra.mxu1 %v1875_v48 }
  0x7a   :  { %632 = vmatprep.mubr.bf16.mxu0 %v1834_v49  ;;  %760 = vmatprep.mubr.bf16.mxu1 %v1879_v50 }
  0x81   :  { %633 = vmatmul.mubr.bf16.gmra.mxu0 %v1836_v51  ;;  %761 = vmatmul.mubr.bf16.gmra.mxu1 %v1881_v52 }
  0x82   :  { %640 = vmatprep.mubr.bf16.mxu0 %v1840_v53  ;;  %768 = vmatprep.mubr.bf16.mxu1 %v1882_v54 }
  0x89   :  { %641 = vmatmul.mubr.bf16.gmra.mxu0 %v1842_v55  ;;  %769 = vmatmul.mubr.bf16.gmra.mxu1 %v1884_v56 }
  0x8a   :  { %648 = vmatprep.mubr.bf16.mxu0 %v1846_v57  ;;  %776 = vmatprep.mubr.bf16.mxu1 %v1885_v58 }
  0x91   :  { %649 = vmatmul.mubr.bf16.gmra.mxu0 %v1848_v59  ;;  %777 = vmatmul.mubr.bf16.gmra.mxu1 %v1887_v60 }
  0x92   :  { %656 = vmatprep.mubr.bf16.mxu0 %v1852_v61  ;;  %784 = vmatprep.mubr.bf16.mxu1 %v1888_v62 }
  0x99   :  { %657 = vmatmul.mubr.bf16.gmra.mxu0 %v1854_v63  ;;  %785 = vmatmul.mubr.bf16.gmra.mxu1 %v1890_v0 }
  0x9a   :  { %664 = vmatprep.mubr.bf16.mxu0 %v1858_v1  ;;  %792 = vmatprep.mubr.bf16.mxu1 %v1891_v2 }
  0xa1   :  { %665 = vmatmul.mubr.bf16.gmra.mxu0 %v1860_v3  ;;  %793 = vmatmul.mubr.bf16.gmra.mxu1 %v1893_v4 }
  0xa2   :  { %672 = vmatprep.mubr.bf16.mxu0 %v1864_v5  ;;  %800 = vmatprep.mubr.bf16.mxu1 %v1894_v6 }
  0xa9   :  { %673 = vmatmul.mubr.bf16.gmra.mxu0 %v1866_v7  ;;  %801 = vmatmul.mubr.bf16.gmra.mxu1 %v1896_v8 }
  0xaa   :  { %680 = vmatprep.mubr.bf16.mxu0 %v1870_v9  ;;  %808 = vmatprep.mubr.bf16.mxu1 %v1897_v10 }
  0xb1   :  { %681 = vmatmul.mubr.bf16.gmra.mxu0 %v1872_v11  ;;  %809 = vmatmul.mubr.bf16.gmra.mxu1 %v1899_v12 }
  0xb2   :  { %688 = vmatprep.mubr.bf16.mxu0 %v1876_v13  ;;  %816 = vmatprep.mubr.bf16.mxu1 %v1900_v14 }
  0xb9   :  { %689 = vmatmul.mubr.bf16.gmra.mxu0 %v1878_v15  ;;  %817 = vmatmul.mubr.bf16.gmra.mxu1 %v1902_v16 }
 0x101   :  { %v570_v17 = vpop.f32.mrf.mxu0  ;;  %v698_v18 = vpop.f32.mrf.mxu1 }
 0x102   :  { %v2207_v22 = vadd.f32 %v2204_v19, %v698_v18  ;;  %v2210_v25 = vadd.f32 %v2204_v19, %v570_v17 }
 0x103   :  { %v572_v20 = vpop.f32.mrf.mxu0  ;;  %v700_v21 = vpop.f32.mrf.mxu1 }
 0x105   :  { %v573_v23 = vpop.f32.mrf.mxu0  ;;  %v701_v24 = vpop.f32.mrf.mxu1 }
 0x106   :  { %v2213_v26 = vadd.f32 %v2204_v19, %v573_v23  ;;  %v2216_v27 = vadd.f32 %v2204_v19, %v701_v24 }
 0x107   :  { %v575_v28 = vpop.f32.mrf.mxu0  ;;  %v703_v29 = vpop.f32.mrf.mxu1 }
 0x108   :  { %v1570_v30 = vpack.c.bf16 %v2213_v26, %v2210_v25  ;;  %v1650_v31 = vpack.c.bf16 %v2216_v27, %v2207_v22 }
 0x109   :  { %v578_v32 = vpop.f32.mrf.mxu0  ;;  %v706_v33 = vpop.f32.mrf.mxu1 }
 0x10a   :  { %1571 = vst [vmem:[%s2696_s3] sm:$0xff] %v1570_v30   ;;  %1742 = vst [vmem:[%s2696_s3 + $0x80] sm:$0xff] %v1650_v31   ;;  %v2229_v36 = vadd.f32 %v2204_v19, %v706_v33  ;;  %v2232_v39 = vadd.f32 %v2204_v19, %v578_v32 }
 0x10b   :  { %v580_v34 = vpop.f32.mrf.mxu0  ;;  %v708_v35 = vpop.f32.mrf.mxu1 }
 0x10d   :  { %v581_v37 = vpop.f32.mrf.mxu0  ;;  %v709_v38 = vpop.f32.mrf.mxu1 }
 0x10e   :  { %v2235_v40 = vadd.f32 %v2204_v19, %v581_v37  ;;  %v2238_v41 = vadd.f32 %v2204_v19, %v709_v38 }
 0x10f   :  { %v583_v42 = vpop.f32.mrf.mxu0  ;;  %v711_v43 = vpop.f32.mrf.mxu1 }
 0x110   :  { %v1575_v44 = vpack.c.bf16 %v2235_v40, %v2232_v39  ;;  %v1655_v45 = vpack.c.bf16 %v2238_v41, %v2229_v36 }
 0x111   :  { %v586_v46 = vpop.f32.mrf.mxu0  ;;  %v714_v47 = vpop.f32.mrf.mxu1 }
 0x112   :  { %1727 = vst [vmem:[%s2696_s3 + $0x8] sm:$0xff] %v1575_v44   ;;  %1743 = vst [vmem:[%s2696_s3 + $0x88] sm:$0xff] %v1655_v45   ;;  %v2251_v50 = vadd.f32 %v2204_v19, %v714_v47  ;;  %v2254_v53 = vadd.f32 %v2204_v19, %v586_v46 }
 0x113   :  { %v588_v48 = vpop.f32.mrf.mxu0  ;;  %v716_v49 = vpop.f32.mrf.mxu1 }
 0x115   :  { %v589_v51 = vpop.f32.mrf.mxu0  ;;  %v717_v52 = vpop.f32.mrf.mxu1 }
 0x116   :  { %v2257_v54 = vadd.f32 %v2204_v19, %v589_v51  ;;  %v2260_v55 = vadd.f32 %v2204_v19, %v717_v52 }
 0x117   :  { %v591_v56 = vpop.f32.mrf.mxu0  ;;  %v719_v57 = vpop.f32.mrf.mxu1 }
 0x118   :  { %v1580_v58 = vpack.c.bf16 %v2257_v54, %v2254_v53  ;;  %v1660_v59 = vpack.c.bf16 %v2260_v55, %v2251_v50 }
 0x119   :  { %v594_v60 = vpop.f32.mrf.mxu0  ;;  %v722_v61 = vpop.f32.mrf.mxu1 }
 0x11a   :  { %1728 = vst [vmem:[%s2696_s3 + $0x10] sm:$0xff] %v1580_v58   ;;  %1744 = vst [vmem:[%s2696_s3 + $0x90] sm:$0xff] %v1660_v59   ;;  %v2273_v0 = vadd.f32 %v2204_v19, %v722_v61  ;;  %v2276_v3 = vadd.f32 %v2204_v19, %v594_v60 }
 0x11b   :  { %v596_v62 = vpop.f32.mrf.mxu0  ;;  %v724_v63 = vpop.f32.mrf.mxu1 }
 0x11d   :  { %v597_v1 = vpop.f32.mrf.mxu0  ;;  %v725_v2 = vpop.f32.mrf.mxu1 }
 0x11e   :  { %v2279_v4 = vadd.f32 %v2204_v19, %v597_v1  ;;  %v2282_v5 = vadd.f32 %v2204_v19, %v725_v2 }
 0x11f   :  { %v599_v6 = vpop.f32.mrf.mxu0  ;;  %v727_v7 = vpop.f32.mrf.mxu1 }
 0x120   :  { %v1585_v8 = vpack.c.bf16 %v2279_v4, %v2276_v3  ;;  %v1665_v9 = vpack.c.bf16 %v2282_v5, %v2273_v0 }
 0x121   :  { %v602_v10 = vpop.f32.mrf.mxu0  ;;  %v730_v11 = vpop.f32.mrf.mxu1 }
 0x122   :  { %1729 = vst [vmem:[%s2696_s3 + $0x18] sm:$0xff] %v1585_v8   ;;  %1745 = vst [vmem:[%s2696_s3 + $0x98] sm:$0xff] %v1665_v9   ;;  %v2295_v14 = vadd.f32 %v2204_v19, %v730_v11  ;;  %v2298_v17 = vadd.f32 %v2204_v19, %v602_v10 }
 0x123   :  { %v604_v12 = vpop.f32.mrf.mxu0  ;;  %v732_v13 = vpop.f32.mrf.mxu1 }
 0x125   :  { %v605_v15 = vpop.f32.mrf.mxu0  ;;  %v733_v16 = vpop.f32.mrf.mxu1 }
 0x126   :  { %v2301_v18 = vadd.f32 %v2204_v19, %v605_v15  ;;  %v2304_v20 = vadd.f32 %v2204_v19, %v733_v16 }
 0x127   :  { %v607_v21 = vpop.f32.mrf.mxu0  ;;  %v735_v23 = vpop.f32.mrf.mxu1 }
 0x128   :  { %v1590_v24 = vpack.c.bf16 %v2301_v18, %v2298_v17  ;;  %v1670_v28 = vpack.c.bf16 %v2304_v20, %v2295_v14 }
 0x129   :  { %v610_v29 = vpop.f32.mrf.mxu0  ;;  %v738_v30 = vpop.f32.mrf.mxu1 }
 0x12a   :  { %1730 = vst [vmem:[%s2696_s3 + $0x20] sm:$0xff] %v1590_v24   ;;  %1746 = vst [vmem:[%s2696_s3 + $0xa0] sm:$0xff] %v1670_v28   ;;  %v2317_v33 = vadd.f32 %v2204_v19, %v738_v30  ;;  %v2320_v37 = vadd.f32 %v2204_v19, %v610_v29  ;;  %v1215_v28 = vmul.f32 %v2213_v26, %v2213_v26 }
 0x12b   :  { %v612_v31 = vpop.f32.mrf.mxu0  ;;  %v740_v32 = vpop.f32.mrf.mxu1 }
 0x12c   :  { %v1214_v31 = vmul.f32 %v2210_v25, %v2210_v25  ;;  %v1216_v32 = vmul.f32 %v2232_v39, %v2232_v39 }
 0x12d   :  { %v613_v34 = vpop.f32.mrf.mxu0  ;;  %v741_v35 = vpop.f32.mrf.mxu1 }
 0x12e   :  { %v2323_v38 = vadd.f32 %v2204_v19, %v613_v34  ;;  %v2326_v42 = vadd.f32 %v2204_v19, %v741_v35 }
 0x12f   :  { %v615_v43 = vpop.f32.mrf.mxu0  ;;  %v743_v44 = vpop.f32.mrf.mxu1 }
 0x130   :  { %v1595_v45 = vpack.c.bf16 %v2323_v38, %v2320_v37  ;;  %v1675_v46 = vpack.c.bf16 %v2326_v42, %v2317_v33  ;;  %v1145_v43 = vadd.f32 %v2213_v26, %v2210_v25  ;;  %v1218_v26 = vmul.f32 %v2254_v53, %v2254_v53 }
 0x131   :  { %v618_v47 = vpop.f32.mrf.mxu0  ;;  %v746_v48 = vpop.f32.mrf.mxu1 }
 0x132   :  { %1731 = vst [vmem:[%s2696_s3 + $0x28] sm:$0xff] %v1595_v45   ;;  %1747 = vst [vmem:[%s2696_s3 + $0xa8] sm:$0xff] %v1675_v46   ;;  %v2339_v52 = vadd.f32 %v2204_v19, %v746_v48  ;;  %v2342_v58 = vadd.f32 %v2204_v19, %v618_v47  ;;  %v1278_v45 = vadd.f32 %v1215_v28, %v1214_v31 }
 0x133   :  { %v620_v49 = vpop.f32.mrf.mxu0  ;;  %v748_v51 = vpop.f32.mrf.mxu1  ;;  %v1217_v46 = vmul.f32 %v2235_v40, %v2235_v40  ;;  %v1221_v28 = vmul.f32 %v2279_v4, %v2279_v4 }
 0x134   :  { %v1146_v49 = vadd.f32 %v1145_v43, %v2232_v39  ;;  %v1279_v25 = vadd.f32 %v1278_v45, %v1216_v32  ;;  %v1222_v43 = vmul.f32 %v2298_v17, %v2298_v17 }
 0x135   :  { %v621_v56 = vpop.f32.mrf.mxu0  ;;  %v749_v57 = vpop.f32.mrf.mxu1 }
 0x136   :  { %v2345_v59 = vadd.f32 %v2204_v19, %v621_v56  ;;  %v2348_v60 = vadd.f32 %v2204_v19, %v749_v57 }
 0x137   :  { %v623_v61 = vpop.f32.mrf.mxu0  ;;  %v751_v62 = vpop.f32.mrf.mxu1 }
 0x138   :  { %v1600_v63 = vpack.c.bf16 %v2345_v59, %v2342_v58  ;;  %v1680_v1 = vpack.c.bf16 %v2348_v60, %v2339_v52 }
 0x139   :  { %v626_v2 = vpop.f32.mrf.mxu0  ;;  %v754_v6 = vpop.f32.mrf.mxu1 }
 0x13a   :  { %1732 = vst [vmem:[%s2696_s3 + $0x30] sm:$0xff] %v1600_v63   ;;  %1748 = vst [vmem:[%s2696_s3 + $0xb0] sm:$0xff] %v1680_v1   ;;  %v2361_v9 = vadd.f32 %v2204_v19, %v754_v6  ;;  %v2364_v12 = vadd.f32 %v2204_v19, %v626_v2  ;;  %v1147_v63 = vadd.f32 %v1146_v49, %v2235_v40 }
 0x13b   :  { %v628_v7 = vpop.f32.mrf.mxu0  ;;  %v756_v8 = vpop.f32.mrf.mxu1  ;;  %v1280_v2 = vadd.f32 %v1279_v25, %v1217_v46  ;;  %v1219_v6 = vmul.f32 %v2257_v54, %v2257_v54  ;;  %v1223_v25 = vmul.f32 %v2301_v18, %v2301_v18 }
 0x13d   :  { %v629_v10 = vpop.f32.mrf.mxu0  ;;  %v757_v11 = vpop.f32.mrf.mxu1  ;;  %v1281_v40 = vadd.f32 %v1280_v2, %v1218_v26 }
 0x13e   :  { %v2367_v13 = vadd.f32 %v2204_v19, %v629_v10  ;;  %v2370_v15 = vadd.f32 %v2204_v19, %v757_v11  ;;  %v1148_v10 = vadd.f32 %v1147_v63, %v2254_v53  ;;  %v1220_v11 = vmul.f32 %v2276_v3, %v2276_v3 }
 0x13f   :  { %v631_v16 = vpop.f32.mrf.mxu0  ;;  %v759_v21 = vpop.f32.mrf.mxu1  ;;  %v1282_v53 = vadd.f32 %v1281_v40, %v1219_v6  ;;  %v1224_v63 = vmul.f32 %v2320_v37, %v2320_v37 }
 0x140   :  { %v1605_v23 = vpack.c.bf16 %v2367_v13, %v2364_v12  ;;  %v1685_v24 = vpack.c.bf16 %v2370_v15, %v2361_v9 }
 0x141   :  { %v634_v29 = vpop.f32.mrf.mxu0  ;;  %v762_v30 = vpop.f32.mrf.mxu1 }
 0x142   :  { %1733 = vst [vmem:[%s2696_s3 + $0x38] sm:$0xff] %v1605_v23   ;;  %1749 = vst [vmem:[%s2696_s3 + $0xb8] sm:$0xff] %v1685_v24   ;;  %v2391_v44 = vadd.f32 %v2204_v19, %v762_v30  ;;  %v2397_v51 = vadd.f32 %v2204_v19, %v634_v29  ;;  %v1149_v23 = vadd.f32 %v1148_v10, %v2257_v54 }
 0x143   :  { %v636_v34 = vpop.f32.mrf.mxu0  ;;  %v764_v35 = vpop.f32.mrf.mxu1  ;;  %v1283_v54 = vadd.f32 %v1282_v53, %v1220_v11 }
 0x144   :  { %v1150_v31 = vadd.f32 %v1149_v23, %v2276_v3  ;;  %v1226_v23 = vmul.f32 %v2342_v58, %v2342_v58 }
 0x145   :  { %v637_v47 = vpop.f32.mrf.mxu0  ;;  %v765_v48 = vpop.f32.mrf.mxu1  ;;  %v1284_v49 = vadd.f32 %v1283_v54, %v1221_v28  ;;  %v1227_v54 = vmul.f32 %v2345_v59, %v2345_v59 }
 0x146   :  { %v2400_v56 = vadd.f32 %v2204_v19, %v637_v47  ;;  %v2403_v57 = vadd.f32 %v2204_v19, %v765_v48  ;;  %v1151_v47 = vadd.f32 %v1150_v31, %v2279_v4 }
 0x147   :  { %v639_v61 = vpop.f32.mrf.mxu0  ;;  %v767_v62 = vpop.f32.mrf.mxu1  ;;  %v1285_v4 = vadd.f32 %v1284_v49, %v1222_v43 }
 0x148   :  { %v1610_v39 = vpack.c.bf16 %v2400_v56, %v2397_v51  ;;  %v1690_v1 = vpack.c.bf16 %v2403_v57, %v2391_v44  ;;  %v1152_v62 = vadd.f32 %v1151_v47, %v2298_v17  ;;  %v1228_v47 = vmul.f32 %v2364_v12, %v2364_v12 }
 0x149   :  { %v642_v7 = vpop.f32.mrf.mxu0  ;;  %v770_v8 = vpop.f32.mrf.mxu1  ;;  %v1286_v17 = vadd.f32 %v1285_v4, %v1223_v25 }
 0x14a   :  { %1734 = vst [vmem:[%s2696_s3 + $0x40] sm:$0xff] %v1610_v39   ;;  %1750 = vst [vmem:[%s2696_s3 + $0xc0] sm:$0xff] %v1690_v1   ;;  %v2425_v24 = vadd.f32 %v2204_v19, %v770_v8  ;;  %v2431_v32 = vadd.f32 %v2204_v19, %v642_v7  ;;  %v1153_v2 = vadd.f32 %v1152_v62, %v2301_v18 }
 0x14b   :  { %v644_v16 = vpop.f32.mrf.mxu0  ;;  %v772_v21 = vpop.f32.mrf.mxu1  ;;  %v1225_v7 = vmul.f32 %v2323_v38, %v2323_v38  ;;  %v1287_v18 = vadd.f32 %v1286_v17, %v1224_v63 }
 0x14c   :  { %v1154_v40 = vadd.f32 %v1153_v2, %v2320_v37 }
 0x14d   :  { %v645_v29 = vpop.f32.mrf.mxu0  ;;  %v773_v30 = vpop.f32.mrf.mxu1  ;;  %v1288_v31 = vadd.f32 %v1287_v18, %v1225_v7  ;;  %v1231_v18 = vmul.f32 %v2400_v56, %v2400_v56 }
 0x14e   :  { %v2434_v34 = vadd.f32 %v2204_v19, %v645_v29  ;;  %v2437_v35 = vadd.f32 %v2204_v19, %v773_v30  ;;  %v1155_v29 = vadd.f32 %v1154_v40, %v2323_v38 }
 0x14f   :  { %v647_v45 = vpop.f32.mrf.mxu0  ;;  %v775_v46 = vpop.f32.mrf.mxu1  ;;  %v1289_v38 = vadd.f32 %v1288_v31, %v1226_v23 }
 0x150   :  { %v1615_v3 = vpack.c.bf16 %v2434_v34, %v2431_v32  ;;  %v1695_v48 = vpack.c.bf16 %v2437_v35, %v2425_v24  ;;  %v1156_v46 = vadd.f32 %v1155_v29, %v2342_v58  ;;  %v1232_v29 = vmul.f32 %v2431_v32, %v2431_v32 }
 0x151   :  { %v650_v26 = vpop.f32.mrf.mxu0  ;;  %v778_v61 = vpop.f32.mrf.mxu1  ;;  %v1290_v58 = vadd.f32 %v1289_v38, %v1227_v54 }
 0x152   :  { %1735 = vst [vmem:[%s2696_s3 + $0x48] sm:$0xff] %v1615_v3   ;;  %1751 = vst [vmem:[%s2696_s3 + $0xc8] sm:$0xff] %v1695_v48   ;;  %v2459_v6 = vadd.f32 %v2204_v19, %v778_v61  ;;  %v2465_v11 = vadd.f32 %v2204_v19, %v650_v26  ;;  %v1157_v49 = vadd.f32 %v1156_v46, %v2345_v59 }
 0x153   :  { %v652_v39 = vpop.f32.mrf.mxu0  ;;  %v780_v1 = vpop.f32.mrf.mxu1  ;;  %v1229_v26 = vmul.f32 %v2367_v13, %v2367_v13  ;;  %v1291_v2 = vadd.f32 %v1290_v58, %v1228_v47  ;;  %v1230_v59 = vmul.f32 %v2397_v51, %v2397_v51 }
 0x154   :  { %v1158_v4 = vadd.f32 %v1157_v49, %v2364_v12 }
 0x155   :  { %v653_v8 = vpop.f32.mrf.mxu0  ;;  %v781_v10 = vpop.f32.mrf.mxu1  ;;  %v1292_v12 = vadd.f32 %v1291_v2, %v1229_v26 }
 0x156   :  { %v2468_v16 = vadd.f32 %v2204_v19, %v653_v8  ;;  %v2471_v21 = vadd.f32 %v2204_v19, %v781_v10  ;;  %v1159_v8 = vadd.f32 %v1158_v4, %v2367_v13 }
 0x157   :  { %v655_v53 = vpop.f32.mrf.mxu0  ;;  %v783_v28 = vpop.f32.mrf.mxu1  ;;  %v1293_v13 = vadd.f32 %v1292_v12, %v1230_v59 }
 0x158   :  { %v1620_v37 = vpack.c.bf16 %v2468_v16, %v2465_v11  ;;  %v1700_v30 = vpack.c.bf16 %v2471_v21, %v2459_v6  ;;  %v1160_v28 = vadd.f32 %v1159_v8, %v2397_v51  ;;  %v1235_v2 = vmul.f32 %v2468_v16, %v2468_v16 }
 0x159   :  { %v658_v43 = vpop.f32.mrf.mxu0  ;;  %v786_v45 = vpop.f32.mrf.mxu1  ;;  %v1294_v51 = vadd.f32 %v1293_v13, %v1231_v18 }
 0x15a   :  { %1736 = vst [vmem:[%s2696_s3 + $0x50] sm:$0xff] %v1620_v37   ;;  %1752 = vst [vmem:[%s2696_s3 + $0xd0] sm:$0xff] %v1700_v30   ;;  %v2493_v25 = vadd.f32 %v2204_v19, %v786_v45  ;;  %v659_v63 = vadd.f32 %v2204_v19, %v658_v43  ;;  %v1161_v31 = vadd.f32 %v1160_v28, %v2400_v56 }
 0x15b   :  { %v660_v3 = vpop.f32.mrf.mxu0  ;;  %v788_v48 = vpop.f32.mrf.mxu1  ;;  %v1233_v43 = vmul.f32 %v2434_v34, %v2434_v34  ;;  %v1295_v49 = vadd.f32 %v1294_v51, %v1232_v29  ;;  %v1234_v56 = vmul.f32 %v2465_v11, %v2465_v11 }
 0x15c   :  { %v1162_v38 = vadd.f32 %v1161_v31, %v2431_v32  ;;  %v1236_v8 = vmul.f32 %v659_v63, %v659_v63 }
 0x15d   :  { %v661_v61 = vpop.f32.mrf.mxu0  ;;  %v789_v62 = vpop.f32.mrf.mxu1  ;;  %v1296_v32 = vadd.f32 %v1295_v49, %v1233_v43 }
 0x15e   :  { %v662_v39 = vadd.f32 %v2204_v19, %v661_v61  ;;  %v2501_v1 = vadd.f32 %v2204_v19, %v789_v62  ;;  %v1163_v61 = vadd.f32 %v1162_v38, %v2434_v34 }
 0x15f   :  { %v663_v17 = vpop.f32.mrf.mxu0  ;;  %v791_v7 = vpop.f32.mrf.mxu1  ;;  %v1297_v34 = vadd.f32 %v1296_v32, %v1234_v56 }
 0x160   :  { %v1625_v10 = vpack.c.bf16 %v662_v39, %v659_v63  ;;  %v1705_v40 = vpack.c.bf16 %v2501_v1, %v2493_v25  ;;  %v1164_v7 = vadd.f32 %v1163_v61, %v2465_v11 }
 0x161   :  { %v666_v23 = vpop.f32.mrf.mxu0  ;;  %v794_v53 = vpop.f32.mrf.mxu1 }
 0x162   :  { %1737 = vst [vmem:[%s2696_s3 + $0x58] sm:$0xff] %v1625_v10   ;;  %1753 = vst [vmem:[%s2696_s3 + $0xd8] sm:$0xff] %v1705_v40   ;;  %v2521_v54 = vadd.f32 %v2204_v19, %v794_v53  ;;  %v667_v47 = vadd.f32 %v2204_v19, %v666_v23  ;;  %v1165_v12 = vadd.f32 %v1164_v7, %v2468_v16 }
 0x163   :  { %v668_v37 = vpop.f32.mrf.mxu0  ;;  %v796_v30 = vpop.f32.mrf.mxu1  ;;  %v1298_v23 = vadd.f32 %v1297_v34, %v1235_v2  ;;  %v1237_v53 = vmul.f32 %v662_v39, %v662_v39 }
 0x164   :  { %v1166_v13 = vadd.f32 %v1165_v12, %v659_v63  ;;  %v1238_v51 = vmul.f32 %v667_v47, %v667_v47 }
 0x165   :  { %v669_v45 = vpop.f32.mrf.mxu0  ;;  %v797_v46 = vpop.f32.mrf.mxu1  ;;  %v1299_v31 = vadd.f32 %v1298_v23, %v1236_v8 }
 0x166   :  { %v670_v3 = vadd.f32 %v2204_v19, %v669_v45  ;;  %v2529_v48 = vadd.f32 %v2204_v19, %v797_v46  ;;  %v1167_v16 = vadd.f32 %v1166_v13, %v662_v39 }
 0x167   :  { %v671_v58 = vpop.f32.mrf.mxu0  ;;  %v799_v26 = vpop.f32.mrf.mxu1  ;;  %v1300_v49 = vadd.f32 %v1299_v31, %v1237_v53 }
 0x168   :  { %v1630_v62 = vpack.c.bf16 %v670_v3, %v667_v47  ;;  %v1710_v4 = vpack.c.bf16 %v2529_v48, %v2521_v54  ;;  %v1239_v56 = vmul.f32 %v670_v3, %v670_v3  ;;  %v1168_v26 = vadd.f32 %v1167_v16, %v667_v47 }
 0x169   :  { %v674_v59 = vpop.f32.mrf.mxu0  ;;  %v802_v17 = vpop.f32.mrf.mxu1  ;;  %v1301_v61 = vadd.f32 %v1300_v49, %v1238_v51 }
 0x16a   :  { %1738 = vst [vmem:[%s2696_s3 + $0x60] sm:$0xff] %v1630_v62   ;;  %1754 = vst [vmem:[%s2696_s3 + $0xe0] sm:$0xff] %v1710_v4   ;;  %v2547_v18 = vadd.f32 %v2204_v19, %v802_v17  ;;  %v675_v29 = vadd.f32 %v2204_v19, %v674_v59  ;;  %v1169_v2 = vadd.f32 %v1168_v26, %v670_v3 }
 0x16b   :  { %v676_v10 = vpop.f32.mrf.mxu0  ;;  %v804_v40 = vpop.f32.mrf.mxu1  ;;  %v1302_v17 = vadd.f32 %v1301_v61, %v1239_v56 }
 0x16c   :  { %v1240_v62 = vmul.f32 %v675_v29, %v675_v29  ;;  %v1170_v8 = vadd.f32 %v1169_v2, %v675_v29 }
 0x16d   :  { %v677_v11 = vpop.f32.mrf.mxu0  ;;  %v805_v28 = vpop.f32.mrf.mxu1 }
 0x16e   :  { %v678_v37 = vadd.f32 %v2204_v19, %v677_v11  ;;  %v2552_v30 = vadd.f32 %v2204_v19, %v805_v28  ;;  %v1303_v12 = vadd.f32 %v1302_v17, %v1240_v62 }
 0x16f   :  { %v679_v43 = vpop.f32.mrf.mxu0  ;;  %v807_v45 = vpop.f32.mrf.mxu1 }
 0x170   :  { %v1635_v46 = vpack.c.bf16 %v678_v37, %v675_v29  ;;  %v1715_v38 = vpack.c.bf16 %v2552_v30, %v2547_v18  ;;  %v1241_v47 = vmul.f32 %v678_v37, %v678_v37  ;;  %v1171_v28 = vadd.f32 %v1170_v8, %v678_v37 }
 0x171   :  { %v682_v58 = vpop.f32.mrf.mxu0  ;;  %v810_v63 = vpop.f32.mrf.mxu1 }
 0x172   :  { %1739 = vst [vmem:[%s2696_s3 + $0x68] sm:$0xff] %v1635_v46   ;;  %1755 = vst [vmem:[%s2696_s3 + $0xe8] sm:$0xff] %v1715_v38   ;;  %v683_v39 = vadd.f32 %v2204_v19, %v682_v58  ;;  %v2564_v59 = vadd.f32 %v2204_v19, %v810_v63  ;;  %v1304_v31 = vadd.f32 %v1303_v12, %v1241_v47 }
 0x173   :  { %v684_v4 = vpop.f32.mrf.mxu0  ;;  %v812_v32 = vpop.f32.mrf.mxu1 }
 0x174   :  { %v1242_v23 = vmul.f32 %v683_v39, %v683_v39  ;;  %v1172_v16 = vadd.f32 %v1171_v28, %v683_v39  ;;  %v1248_v28 = vmul.f32 %v2229_v36, %v2229_v36 }
 0x175   :  { %v685_v7 = vpop.f32.mrf.mxu0  ;;  %v813_v34 = vpop.f32.mrf.mxu1 }
 0x176   :  { %v686_v10 = vadd.f32 %v2204_v19, %v685_v7  ;;  %v2568_v40 = vadd.f32 %v2204_v19, %v813_v34  ;;  %v1305_v37 = vadd.f32 %v1304_v31, %v1242_v23  ;;  %v1247_v23 = vmul.f32 %v2216_v27, %v2216_v27 }
 0x177   :  { %v687_v53 = vpop.f32.mrf.mxu0  ;;  %v815_v11 = vpop.f32.mrf.mxu1 }
 0x178   :  { %v1640_v13 = vpack.c.bf16 %v686_v10, %v683_v39  ;;  %v1720_v3 = vpack.c.bf16 %v2568_v40, %v2564_v59  ;;  %v1243_v51 = vmul.f32 %v686_v10, %v686_v10  ;;  %v1173_v49 = vadd.f32 %v1172_v16, %v686_v10 }
 0x179   :  { %v690_v43 = vpop.f32.mrf.mxu0  ;;  %v818_v45 = vpop.f32.mrf.mxu1  ;;  %v1246_v10 = vmul.f32 %v2207_v22, %v2207_v22 }
 0x17a   :  { %1740 = vst [vmem:[%s2696_s3 + $0x70] sm:$0xff] %v1640_v13   ;;  %v691_v29 = vadd.f32 %v2204_v19, %v690_v43  ;;  %1756 = vst [vmem:[%s2696_s3 + $0xf0] sm:$0xff] %v1720_v3   ;;  %v2580_v58 = vadd.f32 %v2204_v19, %v818_v45  ;;  %v1306_v63 = vadd.f32 %v1305_v37, %v1243_v51 }
 0x17b   :  { %v692_v46 = vpop.f32.mrf.mxu0  ;;  %v820_v38 = vpop.f32.mrf.mxu1  ;;  %v1250_v43 = vmul.f32 %v2251_v50, %v2251_v50 }
 0x17c   :  { %v1244_v56 = vmul.f32 %v691_v29, %v691_v29  ;;  %v1174_v62 = vadd.f32 %v1173_v49, %v691_v29 }
 0x17d   :  { %v693_v26 = vpop.f32.mrf.mxu0  ;;  %v821_v61 = vpop.f32.mrf.mxu1 }
 0x17e   :  { %v694_v39 = vadd.f32 %v2204_v19, %v693_v26  ;;  %v2584_v4 = vadd.f32 %v2204_v19, %v821_v61  ;;  %v1307_v32 = vadd.f32 %v1306_v63, %v1244_v56 }
 0x17f   :  { %v695_v2 = vpop.f32.mrf.mxu0  ;;  %v823_v17 = vpop.f32.mrf.mxu1 }
 0x180   :  { %v1645_v47 = vpack.c.bf16 %v694_v39, %v691_v29  ;;  %v1175_v7 = vadd.f32 %v1174_v62, %v694_v39  ;;  %v1245_v34 = vmul.f32 %v694_v39, %v694_v39  ;;  %v1725_v8 = vpack.c.bf16 %v2584_v4, %v2580_v58 }
 0x182   :  { %1741 = vst [vmem:[%s2696_s3 + $0x78] sm:$0xff] %v1645_v47   ;;  %v1176_v12 = vadd.f32 %v1175_v7, %v2207_v22  ;;  %v1308_v19 = vadd.f32 %v1307_v32, %v1245_v34  ;;  %1757 = vst [vmem:[%s2696_s3 + $0xf8] sm:$0xff] %v1725_v8   ;;  %v1249_v22 = vmul.f32 %v2238_v41, %v2238_v41 }
 0x184   :  { %v1177_v53 = vadd.f32 %v1176_v12, %v2216_v27  ;;  %v1309_v11 = vadd.f32 %v1308_v19, %v1246_v10  ;;  %v1251_v27 = vmul.f32 %v2260_v55, %v2260_v55 }
 0x186   :  { %v1178_v13 = vadd.f32 %v1177_v53, %v2229_v36  ;;  %v1310_v3 = vadd.f32 %v1309_v11, %v1247_v23  ;;  %v1252_v36 = vmul.f32 %v2273_v0, %v2273_v0 }
 0x188   :  { %v1179_v31 = vadd.f32 %v1178_v13, %v2238_v41  ;;  %v1311_v51 = vadd.f32 %v1310_v3, %v1248_v28  ;;  %v1253_v41 = vmul.f32 %v2282_v5, %v2282_v5  ;;  %v1263_v28 = vmul.f32 %v2403_v57, %v2403_v57 }
 0x18a   :  { %v1180_v45 = vadd.f32 %v1179_v31, %v2251_v50  ;;  %v1312_v16 = vadd.f32 %v1311_v51, %v1249_v22  ;;  %v1254_v50 = vmul.f32 %v2295_v14, %v2295_v14  ;;  %v1264_v22 = vmul.f32 %v2425_v24, %v2425_v24 }
 0x18b   :  { %v1265_v51 = vmul.f32 %v2437_v35, %v2437_v35 }
 0x18c   :  { %v1181_v29 = vadd.f32 %v1180_v45, %v2260_v55  ;;  %v1313_v37 = vadd.f32 %v1312_v16, %v1250_v43  ;;  %v1255_v55 = vmul.f32 %v2304_v20, %v2304_v20  ;;  %v1266_v45 = vmul.f32 %v2459_v6, %v2459_v6 }
 0x18e   :  { %v1182_v46 = vadd.f32 %v1181_v29, %v2273_v0  ;;  %v1314_v38 = vadd.f32 %v1313_v37, %v1251_v27  ;;  %v1256_v0 = vmul.f32 %v2317_v33, %v2317_v33  ;;  %v1267_v27 = vmul.f32 %v2471_v21, %v2471_v21 }
 0x18f   :  { %v1268_v37 = vmul.f32 %v2493_v25, %v2493_v25 }
 0x190   :  { %v1183_v49 = vadd.f32 %v1182_v46, %v2282_v5  ;;  %v1315_v56 = vadd.f32 %v1314_v38, %v1252_v36  ;;  %v1257_v5 = vmul.f32 %v2326_v42, %v2326_v42  ;;  %v1269_v46 = vmul.f32 %v2501_v1, %v2501_v1 }
 0x192   :  { %v1316_v63 = vadd.f32 %v1315_v56, %v1253_v41  ;;  %v1184_v26 = vadd.f32 %v1183_v49, %v2295_v14  ;;  %v1258_v14 = vmul.f32 %v2339_v52, %v2339_v52  ;;  %v1270_v41 = vmul.f32 %v2521_v54, %v2521_v54 }
 0x193   :  { %v1271_v56 = vmul.f32 %v2529_v48, %v2529_v48 }
 0x194   :  { %v1185_v61 = vadd.f32 %v1184_v26, %v2304_v20  ;;  %v1317_v62 = vadd.f32 %v1316_v63, %v1254_v50  ;;  %v1259_v20 = vmul.f32 %v2348_v60, %v2348_v60  ;;  %v1272_v63 = vmul.f32 %v2547_v18, %v2547_v18 }
 0x196   :  { %v1186_v39 = vadd.f32 %v1185_v61, %v2317_v33  ;;  %v1318_v32 = vadd.f32 %v1317_v62, %v1255_v55  ;;  %v1260_v33 = vmul.f32 %v2361_v9, %v2361_v9  ;;  %v1273_v55 = vmul.f32 %v2552_v30, %v2552_v30 }
 0x197   :  { %v1274_v62 = vmul.f32 %v2564_v59, %v2564_v59 }
 0x198   :  { %v1187_v2 = vadd.f32 %v1186_v39, %v2326_v42  ;;  %v1319_v17 = vadd.f32 %v1318_v32, %v1256_v0  ;;  %v1261_v42 = vmul.f32 %v2370_v15, %v2370_v15  ;;  %v1275_v39 = vmul.f32 %v2568_v40, %v2568_v40 }
 0x19a   :  { %v1188_v47 = vadd.f32 %v1187_v2, %v2339_v52  ;;  %v1320_v7 = vadd.f32 %v1319_v17, %v1257_v5  ;;  %v1262_v52 = vmul.f32 %v2391_v44, %v2391_v44  ;;  %v1276_v5 = vmul.f32 %v2580_v58, %v2580_v58 }
 0x19b   :  { %v1277_v17 = vmul.f32 %v2584_v4, %v2584_v4 }
 0x19c   :  { %v1189_v34 = vadd.f32 %v1188_v47, %v2348_v60  ;;  %v1321_v8 = vadd.f32 %v1320_v7, %v1258_v14 }
 0x19e   :  { %v1190_v10 = vadd.f32 %v1189_v34, %v2361_v9  ;;  %v1322_v12 = vadd.f32 %v1321_v8, %v1259_v20 }
 0x1a0   :  { %v1191_v19 = vadd.f32 %v1190_v10, %v2370_v15  ;;  %v1323_v23 = vadd.f32 %v1322_v12, %v1260_v33 }
 0x1a2   :  { %v1192_v53 = vadd.f32 %v1191_v19, %v2391_v44  ;;  %v1324_v11 = vadd.f32 %v1323_v23, %v1261_v42 }
 0x1a4   :  { %v1193_v60 = vadd.f32 %v1192_v53, %v2403_v57  ;;  %v1325_v13 = vadd.f32 %v1324_v11, %v1262_v52 }
 0x1a6   :  { %v1326_v9 = vadd.f32 %v1325_v13, %v1263_v28  ;;  %v1194_v3 = vadd.f32 %v1193_v60, %v2425_v24 }
 0x1a8   :  { %v1327_v15 = vadd.f32 %v1326_v9, %v1264_v22  ;;  %v1195_v31 = vadd.f32 %v1194_v3, %v2437_v35 }
 0x1aa   :  { %v1328_v44 = vadd.f32 %v1327_v15, %v1265_v51  ;;  %v1196_v43 = vadd.f32 %v1195_v31, %v2459_v6 }
 0x1ac   :  { %v1329_v57 = vadd.f32 %v1328_v44, %v1266_v45  ;;  %v1197_v16 = vadd.f32 %v1196_v43, %v2471_v21 }
 0x1ae   :  { %v1330_v29 = vadd.f32 %v1329_v57, %v1267_v27  ;;  %v1198_v24 = vadd.f32 %v1197_v16, %v2493_v25 }
 0x1b0   :  { %v1331_v36 = vadd.f32 %v1330_v29, %v1268_v37  ;;  %v1199_v35 = vadd.f32 %v1198_v24, %v2501_v1 }
 0x1b2   :  { %v1332_v38 = vadd.f32 %v1331_v36, %v1269_v46  ;;  %v1200_v6 = vadd.f32 %v1199_v35, %v2521_v54 }
 0x1b4   :  { %v1333_v49 = vadd.f32 %v1332_v38, %v1270_v41  ;;  %v1201_v21 = vadd.f32 %v1200_v6, %v2529_v48 }
 0x1b6   :  { %v1334_v50 = vadd.f32 %v1333_v49, %v1271_v56  ;;  %v1202_v25 = vadd.f32 %v1201_v21, %v2547_v18 }
 0x1b8   :  { %v1335_v26 = vadd.f32 %v1334_v50, %v1272_v63  ;;  %v1203_v1 = vadd.f32 %v1202_v25, %v2552_v30 }
 0x1ba   :  { %v1336_v61 = vadd.f32 %v1335_v26, %v1273_v55  ;;  %v1204_v54 = vadd.f32 %v1203_v1, %v2564_v59 }
 0x1bc   :  { %v1337_v0 = vadd.f32 %v1336_v61, %v1274_v62  ;;  %v1205_v48 = vadd.f32 %v1204_v54, %v2568_v40 }
 0x1be   :  { %v1338_v32 = vadd.f32 %v1337_v0, %v1275_v39  ;;  %v1206_v18 = vadd.f32 %v1205_v48, %v2580_v58 }
 0x1c0   :  { %v1339_v2 = vadd.f32 %v1338_v32, %v1276_v5  ;;  %v1207_v30 = vadd.f32 %v1206_v18, %v2584_v4 }
 0x1c2   :  { %v1208_v14 = vrot.slane %v1207_v30, 4  ;;  %v1340_v59 = vadd.f32 %v1339_v2, %v1277_v17 }
 0x1c4   :  { %v1209_v47 = vadd.f32 %v1208_v14, %v1207_v30  ;;  %v1341_v7 = vrot.slane %v1340_v59, 4 }
 0x1c6   :  { %v1210_v20 = vrot.slane %v1209_v47, 2  ;;  %v1342_v34 = vadd.f32 %v1341_v7, %v1340_v59 }
 0x1c8   :  { %v1211_v8 = vadd.f32 %v1210_v20, %v1209_v47  ;;  %v1343_v40 = vrot.slane %v1342_v34, 2 }
 0x1ca   :  { %v1212_v33 = vrot.slane %v1211_v8, 1  ;;  %v1344_v10 = vadd.f32 %v1343_v40, %v1342_v34 }
 0x1cc   :  { %v1345_v12 = vrot.slane %v1344_v10, 1  ;;  %v1213_v42 = vadd.f32 %v1212_v33, %v1211_v8 }
 0x1ce   :  { %v1346_v58 = vadd.f32 %v1345_v12, %v1344_v10 }
 0x1d0   :  { %v1348_v19 = vsel %vm1347_vm0, %v1213_v42, %v1346_v58 }
 0x1d1   :  { %1349 = vst [vmem:[%s2697_s4] sm:$0x3] %v1348_v19 }

// kernel: netd_dcgan_forward.9
= control target key start
LH: loop header
LB: loop body
LE: loop exit
PB: predicated region body
PF: predicated region fallthrough
CT: control target
= control target key end

     0   :  { %v156_v0 = vlaneseq  ;;  %s1944_s0 = inlined_call_operand.vmem [shape: bf16[512,128], index: 0, kind: input, shape index: {}]   ;;  %s1945_s1 = inlined_call_operand.vmem [shape: f32[2,128], index: 1, kind: input, shape index: {}]   ;;  %s1946_s2 = inlined_call_operand.vmem [shape: f32[1,128], index: 2, kind: input, shape index: {}]   ;;  %s1947_s3 = inlined_call_operand.vmem [shape: f32[1,128], index: 3, kind: input, shape index: {}]   ;;  %s1948_s4 = inlined_call_operand.vmem [shape: bf16[512,128], index: 4, kind: output, shape index: {}]  }
   0x1   :  { %v1009_v1 = vld [vmem:[%s1944_s0] sm:$0xff]   ;;  %v1296_v9 = vld [vmem:[%s1944_s0 + $0x8] sm:$0xff]   ;;  %v1297_v10 = vld [vmem:[%s1944_s0 + $0x10] sm:$0xff]  }
   0x2   :  { %v145_v2 = vld [vmem:[%s1945_s1] sm:$0x1]  ;;  %v147_v3 = vld [vmem:[%s1945_s1 + $0x1] sm:$0x1]  ;;  %v1010_v6 = vunpack.c.l.bf16 %v1009_v1  ;;  %v1011_v7 = vunpack.c.h.bf16 %v1009_v1  ;;  %v1394_v8 = vshrl.u32 %v156_v0, 7  ;;  %v1298_v11 = vld [vmem:[%s1944_s0 + $0x18] sm:$0xff]   ;;  %v1014_v13 = vunpack.c.l.bf16 %v1296_v9 }
   0x3   :  { %v146_v4 = vmul.f32 0.001953125, %v145_v2  ;;  %v148_v5 = vmul.f32 0.001953125, %v147_v3  ;;  %v1015_v14 = vunpack.c.h.bf16 %v1296_v9  ;;  %v1018_v15 = vunpack.c.l.bf16 %v1297_v10  ;;  %v1299_v16 = vld [vmem:[%s1944_s0 + $0x20] sm:$0xff]   ;;  %v1300_v17 = vld [vmem:[%s1944_s0 + $0x28] sm:$0xff]   ;;  %v1301_v18 = vld [vmem:[%s1944_s0 + $0x30] sm:$0xff]  }
   0x4   :  { %v158_v19 = vsub.s32 0, %v1394_v8  ;;  %v1019_v20 = vunpack.c.h.bf16 %v1297_v10  ;;  %v1022_v21 = vunpack.c.l.bf16 %v1298_v11  ;;  %v1023_v22 = vunpack.c.h.bf16 %v1298_v11  ;;  %v1302_v23 = vld [vmem:[%s1944_s0 + $0x38] sm:$0xff]   ;;  %v1303_v24 = vld [vmem:[%s1944_s0 + $0x40] sm:$0xff]   ;;  %v1304_v49 = vld [vmem:[%s1944_s0 + $0x48] sm:$0xff]  }
   0x5   :  { %v149_v12 = vmul.f32 %v146_v4, %v146_v4  ;;  %v1026_v26 = vunpack.c.l.bf16 %v1299_v16  ;;  %v1027_v27 = vunpack.c.h.bf16 %v1299_v16  ;;  %v1030_v28 = vunpack.c.l.bf16 %v1300_v17  ;;  %v1305_v50 = vld [vmem:[%s1944_s0 + $0x50] sm:$0xff]   ;;  %v1306_v54 = vld [vmem:[%s1944_s0 + $0x58] sm:$0xff]   ;;  %v1307_v55 = vld [vmem:[%s1944_s0 + $0x60] sm:$0xff]  }
   0x6   :  { %v1423_v29 = vrot.slane %v146_v4, %v158_v19  ;;  %v1031_v30 = vunpack.c.h.bf16 %v1300_v17  ;;  %v1034_v31 = vunpack.c.l.bf16 %v1301_v18  ;;  %v1035_v32 = vunpack.c.h.bf16 %v1301_v18  ;;  %v1308_v4 = vld [vmem:[%s1944_s0 + $0x68] sm:$0xff]   ;;  %v1310_v11 = vld [vmem:[%s1944_s0 + $0x78] sm:$0xff]  }
   0x7   :  { %v150_v25 = vsub.f32 %v148_v5, %v149_v12  ;;  %v1038_v34 = vunpack.c.l.bf16 %v1302_v23  ;;  %v1039_v35 = vunpack.c.h.bf16 %v1302_v23  ;;  %v1042_v36 = vunpack.c.l.bf16 %v1303_v24  ;;  %v1309_v5 = vld [vmem:[%s1944_s0 + $0x70] sm:$0xff]   ;;  %v1311_v12 = vld [vmem:[%s1944_s0 + $0x80] sm:$0xff]  }
   0x8   :  { %1953 = vst [vmem:[#allocation2_spill] sm:$0xff] %v1423_v29  ;;  %v1426_v37 = vsub.f32 %v1010_v6, %v1423_v29  ;;  %v1429_v38 = vsub.f32 %v1011_v7, %v1423_v29  ;;  %v1432_v39 = vsub.f32 %v1014_v13, %v1423_v29  ;;  %v1435_v40 = vsub.f32 %v1015_v14, %v1423_v29 }
   0x9   :  { %v151_v33 = vmax.f32 %v150_v25, 0.0  ;;  %v1438_v42 = vsub.f32 %v1018_v15, %v1423_v29  ;;  %v1441_v43 = vsub.f32 %v1019_v20, %v1423_v29  ;;  %v1444_v44 = vsub.f32 %v1022_v21, %v1423_v29 }
   0xa   :  { %v1447_v45 = vsub.f32 %v1023_v22, %v1423_v29  ;;  %v1450_v46 = vsub.f32 %v1026_v26, %v1423_v29  ;;  %v1453_v47 = vsub.f32 %v1027_v27, %v1423_v29  ;;  %v1456_v48 = vsub.f32 %v1030_v28, %v1423_v29  ;;  %v1312_v26 = vld [vmem:[%s1944_s0 + $0x88] sm:$0xff]   ;;  %v1313_v27 = vld [vmem:[%s1944_s0 + $0x90] sm:$0xff]  }
   0xb   :  { %v152_v41 = vadd.f32 1e-05, %v151_v33  ;;  %v1465_v51 = vsub.f32 %v1031_v30, %v1423_v29  ;;  %v1468_v52 = vsub.f32 %v1034_v31, %v1423_v29  ;;  %v1471_v53 = vsub.f32 %v1035_v32, %v1423_v29  ;;  %v1314_v33 = vld [vmem:[%s1944_s0 + $0x98] sm:$0xff]  }
   0xc   :  { %v1480_v56 = vsub.f32 %v1038_v34, %v1423_v29  ;;  %v1483_v57 = vsub.f32 %v1039_v35, %v1423_v29  ;;  %v1043_v58 = vunpack.c.h.bf16 %v1303_v24  ;;  %v1486_v59 = vsub.f32 %v1042_v36, %v1423_v29  ;;  %v1315_v34 = vld [vmem:[%s1944_s0 + $0xa0] sm:$0xff]  }
   0xd   :  { %1358 = vrsqrt.f32 %v152_v41  ;;  %v1046_v60 = vunpack.c.l.bf16 %v1304_v49  ;;  %v1047_v61 = vunpack.c.h.bf16 %v1304_v49  ;;  %v1050_v62 = vunpack.c.l.bf16 %v1305_v50 }
   0xe   :  { %v1051_v63 = vunpack.c.h.bf16 %v1305_v50  ;;  %v1489_v0 = vsub.f32 %v1043_v58, %v1423_v29  ;;  %v1054_v1 = vunpack.c.l.bf16 %v1306_v54  ;;  %v1055_v2 = vunpack.c.h.bf16 %v1306_v54 }
   0xf   :  { %v1058_v3 = vunpack.c.l.bf16 %v1307_v55  ;;  %v1498_v6 = vsub.f32 %v1046_v60, %v1423_v29  ;;  %v1501_v7 = vsub.f32 %v1047_v61, %v1423_v29  ;;  %v1504_v9 = vsub.f32 %v1050_v62, %v1423_v29  ;;  %v154_v60 = vld [vmem:[%s1946_s2] sm:$0x1] }
  0x10   :  { %v1507_v10 = vsub.f32 %v1051_v63, %v1423_v29  ;;  %v1516_v13 = vsub.f32 %v1054_v1, %v1423_v29  ;;  %v1519_v14 = vsub.f32 %v1055_v2, %v1423_v29  ;;  %v1059_v15 = vunpack.c.h.bf16 %v1307_v55  ;;  %v1316_v2 = vld [vmem:[%s1944_s0 + $0xa8] sm:$0xff]  }
  0x11   :  { %v1522_v16 = vsub.f32 %v1058_v3, %v1423_v29  ;;  %v1062_v17 = vunpack.c.l.bf16 %v1308_v4  ;;  %v1063_v18 = vunpack.c.h.bf16 %v1308_v4  ;;  %v1066_v20 = vunpack.c.l.bf16 %v1309_v5  ;;  %v1317_v3 = vld [vmem:[%s1944_s0 + $0xb0] sm:$0xff]  }
  0x12   :  { %v1067_v21 = vunpack.c.h.bf16 %v1309_v5  ;;  %v1525_v22 = vsub.f32 %v1059_v15, %v1423_v29  ;;  %v1070_v23 = vunpack.c.l.bf16 %v1310_v11  ;;  %v1071_v24 = vunpack.c.h.bf16 %v1310_v11  ;;  %v1318_v15 = vld [vmem:[%s1944_s0 + $0xb8] sm:$0xff]  }
  0x13   :  { %v1074_v25 = vunpack.c.l.bf16 %v1311_v12  ;;  %v1534_v28 = vsub.f32 %v1062_v17, %v1423_v29  ;;  %v1537_v30 = vsub.f32 %v1063_v18, %v1423_v29  ;;  %v1540_v31 = vsub.f32 %v1066_v20, %v1423_v29 }
  0x14   :  { %v1543_v32 = vsub.f32 %v1067_v21, %v1423_v29  ;;  %v1552_v35 = vsub.f32 %v1070_v23, %v1423_v29  ;;  %v1555_v36 = vsub.f32 %v1071_v24, %v1423_v29  ;;  %v1075_v41 = vunpack.c.h.bf16 %v1311_v12 }
  0x15   :  { %v1558_v49 = vsub.f32 %v1074_v25, %v1423_v29  ;;  %v1078_v50 = vunpack.c.l.bf16 %v1312_v26  ;;  %v1079_v54 = vunpack.c.h.bf16 %v1312_v26  ;;  %v1082_v55 = vunpack.c.l.bf16 %v1313_v27 }
  0x16   :  { %v1083_v58 = vunpack.c.h.bf16 %v1313_v27  ;;  %v1564_v61 = vsub.f32 %v1075_v41, %v1423_v29  ;;  %v1086_v62 = vunpack.c.l.bf16 %v1314_v33  ;;  %v1087_v63 = vunpack.c.h.bf16 %v1314_v33  ;;  %v1599_v33 = vld [vmem:[%s1944_s0 + $0xc0] sm:$0xff]  }
  0x17   :  { %v1090_v1 = vunpack.c.l.bf16 %v1315_v34  ;;  %v1573_v4 = vsub.f32 %v1078_v50, %v1423_v29  ;;  %v1576_v5 = vsub.f32 %v1079_v54, %v1423_v29  ;;  %v1579_v11 = vsub.f32 %v1082_v55, %v1423_v29  ;;  %1954 = vst [vmem:[#allocation3_spill] sm:$0xff] %v1599_v33 }
  0x18   :  { %v1582_v12 = vsub.f32 %v1083_v58, %v1423_v29  ;;  %v1588_v18 = vsub.f32 %v1086_v62, %v1423_v29  ;;  %v1591_v20 = vsub.f32 %v1087_v63, %v1423_v29  ;;  %v1091_v21 = vunpack.c.h.bf16 %v1315_v34  ;;  %v1620_v63 = vld [vmem:[%s1947_s3] ss:$0 sm:$0xff] }
  0x19   :  { %v1594_v23 = vsub.f32 %v1090_v1, %v1423_v29  ;;  %v1094_v25 = vunpack.c.l.bf16 %v1316_v2  ;;  %v1095_v26 = vunpack.c.h.bf16 %v1316_v2  ;;  %v1098_v27 = vunpack.c.l.bf16 %v1317_v3 }
  0x1a   :  { %v1359_v17 = vpop.eup %1358  ;;  %v1602_v41 = vsub.f32 %v1091_v21, %v1423_v29  ;;  %v1099_v50 = vunpack.c.h.bf16 %v1317_v3  ;;  %v1102_v54 = vunpack.c.l.bf16 %v1318_v15  ;;  %v1103_v55 = vunpack.c.h.bf16 %v1318_v15 }
  0x1b   :  { %v155_v24 = vmul.f32 %v1359_v17, %v154_v60  ;;  %v1609_v58 = vsub.f32 %v1094_v25, %v1423_v29  ;;  %v1612_v60 = vsub.f32 %v1095_v26, %v1423_v29  ;;  %v1615_v62 = vsub.f32 %v1098_v27, %v1423_v29 }
  0x1c   :  { %v1623_v1 = vsub.f32 %v1099_v50, %v1423_v29  ;;  %v1626_v8 = vsub.f32 %v1102_v54, %v1423_v29 }
  0x1d   :  { %v1606_v34 = vrot.slane %v155_v24, %v158_v19  ;;  %v1629_v19 = vsub.f32 %v1103_v55, %v1423_v29 }
  0x1f   :  { %1955 = vst [vmem:[#allocation4_spill] sm:$0xff] %v1629_v19  ;;  %v228_v3 = vmul.f32 %v1606_v34, %v1426_v37  ;;  %v229_v15 = vmul.f32 %v1606_v34, %v1429_v38  ;;  %v230_v17 = vmul.f32 %v1606_v34, %v1432_v39  ;;  %v231_v21 = vmul.f32 %v1606_v34, %v1435_v40 }
  0x20   :  { %v232_v24 = vmul.f32 %v1606_v34, %v1438_v42  ;;  %v233_v25 = vmul.f32 %v1606_v34, %v1441_v43  ;;  %v234_v26 = vmul.f32 %v1606_v34, %v1444_v44  ;;  %v235_v37 = vmul.f32 %v1606_v34, %v1447_v45 }
  0x21   :  { %v299_v38 = vadd.f32 %v1620_v63, %v228_v3  ;;  %v300_v27 = vadd.f32 %v1620_v63, %v229_v15  ;;  %v301_v39 = vadd.f32 %v1620_v63, %v230_v17  ;;  %v302_v40 = vadd.f32 %v1620_v63, %v231_v21 }
  0x22   :  { %v303_v50 = vadd.f32 %v1620_v63, %v232_v24  ;;  %v304_v42 = vadd.f32 %v1620_v63, %v233_v25  ;;  %v305_v43 = vadd.f32 %v1620_v63, %v234_v26  ;;  %v306_v54 = vadd.f32 %v1620_v63, %v235_v37 }
  0x23   :  { %vm363_vm0 = vcmp.gt.f32.partialorder %v299_v38, 0.0  ;;  %vm364_vm1 = vcmp.gt.f32.partialorder %v300_v27, 0.0  ;;  %v427_v44 = vmul.f32 0.1, %v299_v38  ;;  %v428_v45 = vmul.f32 0.1, %v300_v27 }
  0x24   :  { %vm365_vm2 = vcmp.gt.f32.partialorder %v301_v39, 0.0  ;;  %vm366_vm3 = vcmp.gt.f32.partialorder %v302_v40, 0.0  ;;  %v429_v55 = vmul.f32 0.1, %v301_v39  ;;  %v430_v3 = vmul.f32 0.1, %v302_v40 }
  0x25   :  { %v491_v15 = vsel %vm363_vm0, %v299_v38, %v427_v44  ;;  %v492_v17 = vsel %vm364_vm1, %v300_v27, %v428_v45  ;;  %vm367_vm4 = vcmp.gt.f32.partialorder %v303_v50, 0.0  ;;  %vm368_vm5 = vcmp.gt.f32.partialorder %v304_v42, 0.0 }
  0x26   :  { %v1139_v21 = vpack.c.bf16 %v492_v17, %v491_v15  ;;  %v493_v24 = vsel %vm365_vm2, %v301_v39, %v429_v55  ;;  %v494_v2 = vsel %vm366_vm3, %v302_v40, %v430_v3  ;;  %v431_v25 = vmul.f32 0.1, %v303_v50 }
  0x27   :  { %v1144_v29 = vpack.c.bf16 %v494_v2, %v493_v24  ;;  %v432_v26 = vmul.f32 0.1, %v304_v42  ;;  %vm369_vm6 = vcmp.gt.f32.partialorder %v305_v43, 0.0  ;;  %vm370_vm7 = vcmp.gt.f32.partialorder %v306_v54, 0.0 }
  0x28   :  { %1140 = vst [vmem:[%s1948_s4] sm:$0xff] %v1139_v21   ;;  %v495_v37 = vsel %vm367_vm4, %v303_v50, %v431_v25  ;;  %v433_v33 = vmul.f32 0.1, %v305_v43  ;;  %v434_v19 = vmul.f32 0.1, %v306_v54  ;;  %v236_v38 = vmul.f32 %v1606_v34, %v1450_v46 }
  0x29   :  { %1327 = vst [vmem:[%s1948_s4 + $0x8] sm:$0xff] %v1144_v29   ;;  %v496_v27 = vsel %vm368_vm5, %v304_v42, %v432_v26  ;;  %v237_v2 = vmul.f32 %v1606_v34, %v1453_v47  ;;  %v238_v39 = vmul.f32 %v1606_v34, %v1456_v48  ;;  %v239_v40 = vmul.f32 %v1606_v34, %v1465_v51 }
  0x2a   :  { %v1149_v50 = vpack.c.bf16 %v496_v27, %v495_v37  ;;  %v497_v44 = vsel %vm369_vm6, %v305_v43, %v433_v33  ;;  %v498_v45 = vsel %vm370_vm7, %v306_v54, %v434_v19  ;;  %v307_v55 = vadd.f32 %v1620_v63, %v236_v38 }
  0x2b   :  { %v1154_v46 = vpack.c.bf16 %v498_v45, %v497_v44  ;;  %v308_v3 = vadd.f32 %v1620_v63, %v237_v2  ;;  %v309_v29 = vadd.f32 %v1620_v63, %v238_v39  ;;  %v310_v42 = vadd.f32 %v1620_v63, %v239_v40 }
  0x2c   :  { %1328 = vst [vmem:[%s1948_s4 + $0x10] sm:$0xff] %v1149_v50   ;;  %vm371_vm8 = vcmp.gt.f32.partialorder %v307_v55, 0.0  ;;  %v435_v47 = vmul.f32 0.1, %v307_v55  ;;  %v240_v48 = vmul.f32 %v1606_v34, %v1468_v52  ;;  %v241_v51 = vmul.f32 %v1606_v34, %v1471_v53 }
  0x2d   :  { %1329 = vst [vmem:[%s1948_s4 + $0x18] sm:$0xff] %v1154_v46   ;;  %vm372_vm9 = vcmp.gt.f32.partialorder %v308_v3, 0.0  ;;  %v436_v33 = vmul.f32 0.1, %v308_v3  ;;  %vm373_vm10 = vcmp.gt.f32.partialorder %v309_v29, 0.0  ;;  %vm374_vm11 = vcmp.gt.f32.partialorder %v310_v42, 0.0 }
  0x2e   :  { %v499_v19 = vsel %vm371_vm8, %v307_v55, %v435_v47  ;;  %v437_v43 = vmul.f32 0.1, %v309_v29  ;;  %v438_v54 = vmul.f32 0.1, %v310_v42  ;;  %v311_v15 = vadd.f32 %v1620_v63, %v240_v48 }
  0x2f   :  { %v500_v17 = vsel %vm372_vm9, %v308_v3, %v436_v33  ;;  %v312_v21 = vadd.f32 %v1620_v63, %v241_v51  ;;  %v242_v52 = vmul.f32 %v1606_v34, %v1480_v56  ;;  %v243_v53 = vmul.f32 %v1606_v34, %v1483_v57 }
  0x30   :  { %v1159_v24 = vpack.c.bf16 %v500_v17, %v499_v19  ;;  %v501_v25 = vsel %vm373_vm10, %v309_v29, %v437_v43  ;;  %v502_v26 = vsel %vm374_vm11, %v310_v42, %v438_v54  ;;  %vm375_vm12 = vcmp.gt.f32.partialorder %v311_v15, 0.0 }
  0x31   :  { %v1164_v37 = vpack.c.bf16 %v502_v26, %v501_v25  ;;  %vm376_vm13 = vcmp.gt.f32.partialorder %v312_v21, 0.0  ;;  %v439_v38 = vmul.f32 0.1, %v311_v15  ;;  %v440_v27 = vmul.f32 0.1, %v312_v21 }
  0x32   :  { %1330 = vst [vmem:[%s1948_s4 + $0x20] sm:$0xff] %v1159_v24   ;;  %v313_v2 = vadd.f32 %v1620_v63, %v242_v52  ;;  %v314_v39 = vadd.f32 %v1620_v63, %v243_v53  ;;  %v244_v56 = vmul.f32 %v1606_v34, %v1486_v59  ;;  %v245_v57 = vmul.f32 %v1606_v34, %v1489_v0 }
  0x33   :  { %1331 = vst [vmem:[%s1948_s4 + $0x28] sm:$0xff] %v1164_v37   ;;  %v503_v40 = vsel %vm375_vm12, %v311_v15, %v439_v38  ;;  %v504_v50 = vsel %vm376_vm13, %v312_v21, %v440_v27  ;;  %v246_v44 = vmul.f32 %v1606_v34, %v1498_v6  ;;  %v247_v45 = vmul.f32 %v1606_v34, %v1501_v7 }
  0x34   :  { %v1169_v55 = vpack.c.bf16 %v504_v50, %v503_v40  ;;  %vm377_vm14 = vcmp.gt.f32.partialorder %v313_v2, 0.0  ;;  %vm378_vm15 = vcmp.gt.f32.partialorder %v314_v39, 0.0  ;;  %v441_v46 = vmul.f32 0.1, %v313_v2 }
  0x35   :  { %v442_v59 = vmul.f32 0.1, %v314_v39  ;;  %v315_v3 = vadd.f32 %v1620_v63, %v244_v56  ;;  %v316_v0 = vadd.f32 %v1620_v63, %v245_v57  ;;  %v317_v29 = vadd.f32 %v1620_v63, %v246_v44 }
  0x36   :  { %1332 = vst [vmem:[%s1948_s4 + $0x30] sm:$0xff] %v1169_v55   ;;  %v505_v42 = vsel %vm377_vm14, %v313_v2, %v441_v46  ;;  %v318_v6 = vadd.f32 %v1620_v63, %v247_v45  ;;  %v248_v7 = vmul.f32 %v1606_v34, %v1504_v9  ;;  %v249_v47 = vmul.f32 %v1606_v34, %v1507_v10 }
  0x37   :  { %v506_v48 = vsel %vm378_vm15, %v314_v39, %v442_v59  ;;  %vm379_vm0 = vcmp.gt.f32.partialorder %v315_v3, 0.0  ;;  %vm380_vm1 = vcmp.gt.f32.partialorder %v316_v0, 0.0  ;;  %v443_v51 = vmul.f32 0.1, %v315_v3 }
  0x38   :  { %v1174_v33 = vpack.c.bf16 %v506_v48, %v505_v42  ;;  %v444_v19 = vmul.f32 0.1, %v316_v0  ;;  %vm381_vm2 = vcmp.gt.f32.partialorder %v317_v29, 0.0  ;;  %vm382_vm3 = vcmp.gt.f32.partialorder %v318_v6, 0.0 }
  0x39   :  { %v507_v43 = vsel %vm379_vm0, %v315_v3, %v443_v51  ;;  %v445_v54 = vmul.f32 0.1, %v317_v29  ;;  %v446_v15 = vmul.f32 0.1, %v318_v6  ;;  %v319_v17 = vadd.f32 %v1620_v63, %v248_v7 }
  0x3a   :  { %1333 = vst [vmem:[%s1948_s4 + $0x38] sm:$0xff] %v1174_v33   ;;  %v508_v9 = vsel %vm380_vm1, %v316_v0, %v444_v19  ;;  %v320_v10 = vadd.f32 %v1620_v63, %v249_v47  ;;  %v250_v21 = vmul.f32 %v1606_v34, %v1516_v13  ;;  %v251_v52 = vmul.f32 %v1606_v34, %v1519_v14 }
  0x3b   :  { %v1179_v53 = vpack.c.bf16 %v508_v9, %v507_v43  ;;  %v509_v24 = vsel %vm381_vm2, %v317_v29, %v445_v54  ;;  %v510_v25 = vsel %vm382_vm3, %v318_v6, %v446_v15  ;;  %vm383_vm4 = vcmp.gt.f32.partialorder %v319_v17, 0.0 }
  0x3c   :  { %v1184_v26 = vpack.c.bf16 %v510_v25, %v509_v24  ;;  %vm384_vm5 = vcmp.gt.f32.partialorder %v320_v10, 0.0  ;;  %v447_v37 = vmul.f32 0.1, %v319_v17  ;;  %v448_v38 = vmul.f32 0.1, %v320_v10 }
  0x3d   :  { %1334 = vst [vmem:[%s1948_s4 + $0x40] sm:$0xff] %v1179_v53   ;;  %v321_v27 = vadd.f32 %v1620_v63, %v250_v21  ;;  %v322_v2 = vadd.f32 %v1620_v63, %v251_v52  ;;  %v252_v13 = vmul.f32 %v1606_v34, %v1522_v16  ;;  %v253_v14 = vmul.f32 %v1606_v34, %v1525_v22 }
  0x3e   :  { %1335 = vst [vmem:[%s1948_s4 + $0x48] sm:$0xff] %v1184_v26   ;;  %v511_v39 = vsel %vm383_vm4, %v319_v17, %v447_v37  ;;  %v512_v56 = vsel %vm384_vm5, %v320_v10, %v448_v38  ;;  %v254_v57 = vmul.f32 %v1606_v34, %v1534_v28  ;;  %v255_v40 = vmul.f32 %v1606_v34, %v1537_v30 }
  0x3f   :  { %v1189_v50 = vpack.c.bf16 %v512_v56, %v511_v39  ;;  %vm385_vm6 = vcmp.gt.f32.partialorder %v321_v27, 0.0  ;;  %vm386_vm7 = vcmp.gt.f32.partialorder %v322_v2, 0.0  ;;  %v449_v44 = vmul.f32 0.1, %v321_v27 }
  0x40   :  { %v450_v16 = vmul.f32 0.1, %v322_v2  ;;  %v323_v45 = vadd.f32 %v1620_v63, %v252_v13  ;;  %v324_v22 = vadd.f32 %v1620_v63, %v253_v14  ;;  %v325_v55 = vadd.f32 %v1620_v63, %v254_v57 }
  0x41   :  { %1336 = vst [vmem:[%s1948_s4 + $0x50] sm:$0xff] %v1189_v50   ;;  %v513_v46 = vsel %vm385_vm6, %v321_v27, %v449_v44  ;;  %v326_v28 = vadd.f32 %v1620_v63, %v255_v40  ;;  %v256_v30 = vmul.f32 %v1606_v34, %v1540_v31  ;;  %v257_v59 = vmul.f32 %v1606_v34, %v1543_v32 }
  0x42   :  { %v514_v3 = vsel %vm386_vm7, %v322_v2, %v450_v16  ;;  %vm387_vm8 = vcmp.gt.f32.partialorder %v323_v45, 0.0  ;;  %vm388_vm9 = vcmp.gt.f32.partialorder %v324_v22, 0.0  ;;  %v451_v0 = vmul.f32 0.1, %v323_v45 }
  0x43   :  { %v1194_v29 = vpack.c.bf16 %v514_v3, %v513_v46  ;;  %v452_v42 = vmul.f32 0.1, %v324_v22  ;;  %vm389_vm10 = vcmp.gt.f32.partialorder %v325_v55, 0.0  ;;  %vm390_vm11 = vcmp.gt.f32.partialorder %v326_v28, 0.0 }
  0x44   :  { %v515_v6 = vsel %vm387_vm8, %v323_v45, %v451_v0  ;;  %v453_v7 = vmul.f32 0.1, %v325_v55  ;;  %v454_v47 = vmul.f32 0.1, %v326_v28  ;;  %v327_v48 = vadd.f32 %v1620_v63, %v256_v30 }
  0x45   :  { %1337 = vst [vmem:[%s1948_s4 + $0x58] sm:$0xff] %v1194_v29   ;;  %v516_v31 = vsel %vm388_vm9, %v324_v22, %v452_v42  ;;  %v328_v32 = vadd.f32 %v1620_v63, %v257_v59  ;;  %v258_v51 = vmul.f32 %v1606_v34, %v1552_v35  ;;  %v259_v33 = vmul.f32 %v1606_v34, %v1555_v36 }
  0x46   :  { %v1199_v19 = vpack.c.bf16 %v516_v31, %v515_v6  ;;  %v517_v43 = vsel %vm389_vm10, %v325_v55, %v453_v7  ;;  %v518_v54 = vsel %vm390_vm11, %v326_v28, %v454_v47  ;;  %vm391_vm12 = vcmp.gt.f32.partialorder %v327_v48, 0.0 }
  0x47   :  { %v1204_v15 = vpack.c.bf16 %v518_v54, %v517_v43  ;;  %vm392_vm13 = vcmp.gt.f32.partialorder %v328_v32, 0.0  ;;  %v455_v17 = vmul.f32 0.1, %v327_v48  ;;  %v456_v9 = vmul.f32 0.1, %v328_v32 }
  0x48   :  { %1338 = vst [vmem:[%s1948_s4 + $0x60] sm:$0xff] %v1199_v19   ;;  %v329_v10 = vadd.f32 %v1620_v63, %v258_v51  ;;  %v330_v21 = vadd.f32 %v1620_v63, %v259_v33  ;;  %v260_v35 = vmul.f32 %v1606_v34, %v1558_v49  ;;  %v261_v36 = vmul.f32 %v1606_v34, %v1564_v61 }
  0x49   :  { %1339 = vst [vmem:[%s1948_s4 + $0x68] sm:$0xff] %v1204_v15   ;;  %v519_v52 = vsel %vm391_vm12, %v327_v48, %v455_v17  ;;  %v520_v53 = vsel %vm392_vm13, %v328_v32, %v456_v9  ;;  %v262_v24 = vmul.f32 %v1606_v34, %v1573_v4  ;;  %v263_v25 = vmul.f32 %v1606_v34, %v1576_v5 }
  0x4a   :  { %v1209_v26 = vpack.c.bf16 %v520_v53, %v519_v52  ;;  %vm393_vm14 = vcmp.gt.f32.partialorder %v329_v10, 0.0  ;;  %vm394_vm15 = vcmp.gt.f32.partialorder %v330_v21, 0.0  ;;  %v457_v37 = vmul.f32 0.1, %v329_v10  ;;  %v1956_v52 = vld [vmem:[#allocation4_spill] sm:$0xff] }
  0x4b   :  { %v458_v49 = vmul.f32 0.1, %v330_v21  ;;  %v331_v38 = vadd.f32 %v1620_v63, %v260_v35  ;;  %v332_v61 = vadd.f32 %v1620_v63, %v261_v36  ;;  %v333_v27 = vadd.f32 %v1620_v63, %v262_v24 }
  0x4c   :  { %1340 = vst [vmem:[%s1948_s4 + $0x70] sm:$0xff] %v1209_v26   ;;  %v521_v2 = vsel %vm393_vm14, %v329_v10, %v457_v37  ;;  %v334_v4 = vadd.f32 %v1620_v63, %v263_v25  ;;  %v264_v5 = vmul.f32 %v1606_v34, %v1579_v11  ;;  %v265_v13 = vmul.f32 %v1606_v34, %v1582_v12  ;;  %v1320_v37 = vld [vmem:[%s1944_s0 + $0xc8] sm:$0xff]  }
  0x4d   :  { %v522_v14 = vsel %vm394_vm15, %v330_v21, %v458_v49  ;;  %vm395_vm0 = vcmp.gt.f32.partialorder %v331_v38, 0.0  ;;  %vm396_vm1 = vcmp.gt.f32.partialorder %v332_v61, 0.0  ;;  %v459_v39 = vmul.f32 0.1, %v331_v38 }
  0x4e   :  { %v1214_v56 = vpack.c.bf16 %v522_v14, %v521_v2  ;;  %v460_v57 = vmul.f32 0.1, %v332_v61  ;;  %vm397_vm2 = vcmp.gt.f32.partialorder %v333_v27, 0.0  ;;  %vm398_vm3 = vcmp.gt.f32.partialorder %v334_v4, 0.0  ;;  %v1957_v2 = vld [vmem:[#allocation3_spill] sm:$0xff] }
  0x4f   :  { %v523_v40 = vsel %vm395_vm0, %v331_v38, %v459_v39  ;;  %v461_v50 = vmul.f32 0.1, %v333_v27  ;;  %v462_v44 = vmul.f32 0.1, %v334_v4  ;;  %v335_v16 = vadd.f32 %v1620_v63, %v264_v5  ;;  %v1958_v5 = vld [vmem:[#allocation2_spill] sm:$0xff] }
  0x50   :  { %1341 = vst [vmem:[%s1948_s4 + $0x78] sm:$0xff] %v1214_v56   ;;  %v524_v11 = vsel %vm396_vm1, %v332_v61, %v460_v57  ;;  %v336_v12 = vadd.f32 %v1620_v63, %v265_v13  ;;  %v266_v45 = vmul.f32 %v1606_v34, %v1588_v18  ;;  %v267_v22 = vmul.f32 %v1606_v34, %v1591_v20 }
  0x51   :  { %v1219_v55 = vpack.c.bf16 %v524_v11, %v523_v40  ;;  %v525_v46 = vsel %vm397_vm2, %v333_v27, %v461_v50  ;;  %v526_v28 = vsel %vm398_vm3, %v334_v4, %v462_v44  ;;  %vm399_vm4 = vcmp.gt.f32.partialorder %v335_v16, 0.0  ;;  %v1321_v50 = vld [vmem:[%s1944_s0 + $0xd0] sm:$0xff]  }
  0x52   :  { %v1224_v30 = vpack.c.bf16 %v526_v28, %v525_v46  ;;  %vm400_vm5 = vcmp.gt.f32.partialorder %v336_v12, 0.0  ;;  %v463_v59 = vmul.f32 0.1, %v335_v16  ;;  %v464_v3 = vmul.f32 0.1, %v336_v12 }
  0x53   :  { %1342 = vst [vmem:[%s1948_s4 + $0x80] sm:$0xff] %v1219_v55   ;;  %v337_v0 = vadd.f32 %v1620_v63, %v266_v45  ;;  %v338_v29 = vadd.f32 %v1620_v63, %v267_v22  ;;  %v268_v18 = vmul.f32 %v1606_v34, %v1594_v23  ;;  %v269_v20 = vmul.f32 %v1606_v34, %v1602_v41 }
  0x54   :  { %1343 = vst [vmem:[%s1948_s4 + $0x88] sm:$0xff] %v1224_v30   ;;  %v527_v42 = vsel %vm399_vm4, %v335_v16, %v463_v59  ;;  %v528_v6 = vsel %vm400_vm5, %v336_v12, %v464_v3  ;;  %v270_v7 = vmul.f32 %v1606_v34, %v1609_v58  ;;  %v271_v47 = vmul.f32 %v1606_v34, %v1612_v60 }
  0x55   :  { %v1229_v48 = vpack.c.bf16 %v528_v6, %v527_v42  ;;  %vm401_vm6 = vcmp.gt.f32.partialorder %v337_v0, 0.0  ;;  %vm402_vm7 = vcmp.gt.f32.partialorder %v338_v29, 0.0  ;;  %v465_v31 = vmul.f32 0.1, %v337_v0 }
  0x56   :  { %v466_v23 = vmul.f32 0.1, %v338_v29  ;;  %v339_v32 = vadd.f32 %v1620_v63, %v268_v18  ;;  %v340_v41 = vadd.f32 %v1620_v63, %v269_v20  ;;  %v341_v51 = vadd.f32 %v1620_v63, %v270_v7  ;;  %v1322_v18 = vld [vmem:[%s1944_s0 + $0xd8] sm:$0xff]  }
  0x57   :  { %1344 = vst [vmem:[%s1948_s4 + $0x90] sm:$0xff] %v1229_v48   ;;  %v529_v33 = vsel %vm401_vm6, %v337_v0, %v465_v31  ;;  %v342_v58 = vadd.f32 %v1620_v63, %v271_v47  ;;  %v272_v60 = vmul.f32 %v1606_v34, %v1615_v62  ;;  %v273_v19 = vmul.f32 %v1606_v34, %v1623_v1 }
  0x58   :  { %v530_v43 = vsel %vm402_vm7, %v338_v29, %v466_v23  ;;  %vm403_vm8 = vcmp.gt.f32.partialorder %v339_v32, 0.0  ;;  %vm404_vm9 = vcmp.gt.f32.partialorder %v340_v41, 0.0  ;;  %v467_v54 = vmul.f32 0.1, %v339_v32 }
  0x59   :  { %v1234_v15 = vpack.c.bf16 %v530_v43, %v529_v33  ;;  %v468_v17 = vmul.f32 0.1, %v340_v41  ;;  %vm405_vm10 = vcmp.gt.f32.partialorder %v341_v51, 0.0  ;;  %vm406_vm11 = vcmp.gt.f32.partialorder %v342_v58, 0.0 }
  0x5a   :  { %v531_v9 = vsel %vm403_vm8, %v339_v32, %v467_v54  ;;  %v469_v10 = vmul.f32 0.1, %v341_v51  ;;  %v470_v21 = vmul.f32 0.1, %v342_v58  ;;  %v343_v35 = vadd.f32 %v1620_v63, %v272_v60 }
  0x5b   :  { %1345 = vst [vmem:[%s1948_s4 + $0x98] sm:$0xff] %v1234_v15   ;;  %v532_v62 = vsel %vm404_vm9, %v340_v41, %v468_v17  ;;  %v344_v1 = vadd.f32 %v1620_v63, %v273_v19  ;;  %v274_v36 = vmul.f32 %v1606_v34, %v1626_v8  ;;  %v275_v53 = vmul.f32 %v1606_v34, %v1956_v52 }
  0x5c   :  { %v1239_v24 = vpack.c.bf16 %v532_v62, %v531_v9  ;;  %v533_v25 = vsel %vm405_vm10, %v341_v51, %v469_v10  ;;  %v534_v26 = vsel %vm406_vm11, %v342_v58, %v470_v21  ;;  %vm407_vm12 = vcmp.gt.f32.partialorder %v343_v35, 0.0  ;;  %v1323_v10 = vld [vmem:[%s1944_s0 + $0xe0] sm:$0xff]  }
  0x5d   :  { %v1244_v49 = vpack.c.bf16 %v534_v26, %v533_v25  ;;  %vm408_vm13 = vcmp.gt.f32.partialorder %v344_v1, 0.0  ;;  %v471_v38 = vmul.f32 0.1, %v343_v35  ;;  %v472_v61 = vmul.f32 0.1, %v344_v1 }
  0x5e   :  { %1346 = vst [vmem:[%s1948_s4 + $0xa0] sm:$0xff] %v1239_v24   ;;  %v345_v8 = vadd.f32 %v1620_v63, %v274_v36  ;;  %v346_v27 = vadd.f32 %v1620_v63, %v275_v53  ;;  %v1107_v4 = vunpack.c.h.bf16 %v1957_v2  ;;  %v1959_v13 = vunpack.c.l.bf16 %v1957_v2 }
  0x5f   :  { %1347 = vst [vmem:[%s1948_s4 + $0xa8] sm:$0xff] %v1244_v49   ;;  %v535_v39 = vsel %vm407_vm12, %v343_v35, %v471_v38  ;;  %v536_v56 = vsel %vm408_vm13, %v344_v1, %v472_v61  ;;  %v1110_v57 = vunpack.c.l.bf16 %v1320_v37  ;;  %v1111_v40 = vunpack.c.h.bf16 %v1320_v37  ;;  %v1324_v1 = vld [vmem:[%s1944_s0 + $0xe8] sm:$0xff]   ;;  %v1325_v49 = vld [vmem:[%s1944_s0 + $0xf0] sm:$0xff]  }
  0x60   :  { %v208_v14 = vsub.f32 %v1959_v13, %v1958_v5  ;;  %v1249_v44 = vpack.c.bf16 %v536_v56, %v535_v39  ;;  %vm409_vm14 = vcmp.gt.f32.partialorder %v345_v8, 0.0  ;;  %vm410_vm15 = vcmp.gt.f32.partialorder %v346_v27, 0.0 }
  0x61   :  { %v473_v16 = vmul.f32 0.1, %v345_v8  ;;  %v474_v11 = vmul.f32 0.1, %v346_v27  ;;  %v209_v12 = vsub.f32 %v1107_v4, %v1958_v5  ;;  %v210_v22 = vsub.f32 %v1110_v57, %v1958_v5 }
  0x62   :  { %v276_v45 = vmul.f32 %v1606_v34, %v208_v14  ;;  %1348 = vst [vmem:[%s1948_s4 + $0xb0] sm:$0xff] %v1249_v44   ;;  %v211_v46 = vsub.f32 %v1111_v40, %v1958_v5  ;;  %v1114_v28 = vunpack.c.l.bf16 %v1321_v50  ;;  %v1115_v30 = vunpack.c.h.bf16 %v1321_v50 }
  0x63   :  { %v537_v55 = vsel %vm409_vm14, %v345_v8, %v473_v16  ;;  %v538_v59 = vsel %vm410_vm15, %v346_v27, %v474_v11  ;;  %v277_v3 = vmul.f32 %v1606_v34, %v209_v12  ;;  %v278_v29 = vmul.f32 %v1606_v34, %v210_v22 }
  0x64   :  { %v347_v0 = vadd.f32 %v1620_v63, %v276_v45  ;;  %v1254_v20 = vpack.c.bf16 %v538_v59, %v537_v55  ;;  %v279_v42 = vmul.f32 %v1606_v34, %v211_v46  ;;  %v212_v6 = vsub.f32 %v1114_v28, %v1958_v5 }
  0x65   :  { %v213_v7 = vsub.f32 %v1115_v30, %v1958_v5  ;;  %v348_v47 = vadd.f32 %v1620_v63, %v277_v3  ;;  %v349_v31 = vadd.f32 %v1620_v63, %v278_v29  ;;  %v1118_v51 = vunpack.c.l.bf16 %v1322_v18 }
  0x66   :  { %vm411_vm0 = vcmp.gt.f32.partialorder %v347_v0, 0.0  ;;  %v475_v48 = vmul.f32 0.1, %v347_v0  ;;  %1349 = vst [vmem:[%s1948_s4 + $0xb8] sm:$0xff] %v1254_v20   ;;  %v350_v23 = vadd.f32 %v1620_v63, %v279_v42  ;;  %v280_v32 = vmul.f32 %v1606_v34, %v212_v6  ;;  %v1326_v42 = vld [vmem:[%s1944_s0 + $0xf8] sm:$0xff]  }
  0x67   :  { %v281_v41 = vmul.f32 %v1606_v34, %v213_v7  ;;  %vm412_vm1 = vcmp.gt.f32.partialorder %v348_v47, 0.0  ;;  %v476_v33 = vmul.f32 0.1, %v348_v47  ;;  %vm413_vm2 = vcmp.gt.f32.partialorder %v349_v31, 0.0 }
  0x68   :  { %v539_v58 = vsel %vm411_vm0, %v347_v0, %v475_v48  ;;  %vm414_vm3 = vcmp.gt.f32.partialorder %v350_v23, 0.0  ;;  %v477_v60 = vmul.f32 0.1, %v349_v31  ;;  %v478_v19 = vmul.f32 0.1, %v350_v23 }
  0x69   :  { %v351_v43 = vadd.f32 %v1620_v63, %v280_v32  ;;  %v540_v54 = vsel %vm412_vm1, %v348_v47, %v476_v33  ;;  %v352_v15 = vadd.f32 %v1620_v63, %v281_v41  ;;  %v1119_v17 = vunpack.c.h.bf16 %v1322_v18 }
  0x6a   :  { %v214_v9 = vsub.f32 %v1118_v51, %v1958_v5  ;;  %v1259_v21 = vpack.c.bf16 %v540_v54, %v539_v58  ;;  %v541_v35 = vsel %vm413_vm2, %v349_v31, %v477_v60  ;;  %v542_v62 = vsel %vm414_vm3, %v350_v23, %v478_v19 }
  0x6b   :  { %vm415_vm4 = vcmp.gt.f32.partialorder %v351_v43, 0.0  ;;  %v1264_v36 = vpack.c.bf16 %v542_v62, %v541_v35  ;;  %vm416_vm5 = vcmp.gt.f32.partialorder %v352_v15, 0.0  ;;  %v479_v52 = vmul.f32 0.1, %v351_v43 }
  0x6c   :  { %v480_v53 = vmul.f32 0.1, %v352_v15  ;;  %1350 = vst [vmem:[%s1948_s4 + $0xc0] sm:$0xff] %v1259_v21   ;;  %v215_v24 = vsub.f32 %v1119_v17, %v1958_v5  ;;  %v282_v25 = vmul.f32 %v1606_v34, %v214_v9  ;;  %v1122_v26 = vunpack.c.l.bf16 %v1323_v10 }
  0x6d   :  { %v1123_v37 = vunpack.c.h.bf16 %v1323_v10  ;;  %1351 = vst [vmem:[%s1948_s4 + $0xc8] sm:$0xff] %v1264_v36   ;;  %v543_v38 = vsel %vm415_vm4, %v351_v43, %v479_v52  ;;  %v1126_v8 = vunpack.c.l.bf16 %v1324_v1  ;;  %v1127_v27 = vunpack.c.h.bf16 %v1324_v1 }
  0x6e   :  { %v544_v61 = vsel %vm416_vm5, %v352_v15, %v480_v53  ;;  %v283_v4 = vmul.f32 %v1606_v34, %v215_v24  ;;  %v353_v13 = vadd.f32 %v1620_v63, %v282_v25  ;;  %v216_v14 = vsub.f32 %v1122_v26, %v1958_v5 }
  0x6f   :  { %v1269_v2 = vpack.c.bf16 %v544_v61, %v543_v38  ;;  %v217_v39 = vsub.f32 %v1123_v37, %v1958_v5  ;;  %v218_v56 = vsub.f32 %v1126_v8, %v1958_v5  ;;  %v219_v57 = vsub.f32 %v1127_v27, %v1958_v5 }
  0x70   :  { %v1130_v40 = vunpack.c.l.bf16 %v1325_v49  ;;  %v354_v50 = vadd.f32 %v1620_v63, %v283_v4  ;;  %vm417_vm6 = vcmp.gt.f32.partialorder %v353_v13, 0.0  ;;  %v481_v44 = vmul.f32 0.1, %v353_v13 }
  0x71   :  { %1352 = vst [vmem:[%s1948_s4 + $0xd0] sm:$0xff] %v1269_v2   ;;  %v284_v16 = vmul.f32 %v1606_v34, %v216_v14  ;;  %v285_v11 = vmul.f32 %v1606_v34, %v217_v39  ;;  %v286_v12 = vmul.f32 %v1606_v34, %v218_v56  ;;  %v287_v45 = vmul.f32 %v1606_v34, %v219_v57 }
  0x72   :  { %v1131_v22 = vunpack.c.h.bf16 %v1325_v49  ;;  %vm418_vm7 = vcmp.gt.f32.partialorder %v354_v50, 0.0  ;;  %v482_v55 = vmul.f32 0.1, %v354_v50  ;;  %v545_v46 = vsel %vm417_vm6, %v353_v13, %v481_v44 }
  0x73   :  { %v355_v28 = vadd.f32 %v1620_v63, %v284_v16  ;;  %v356_v30 = vadd.f32 %v1620_v63, %v285_v11  ;;  %v357_v59 = vadd.f32 %v1620_v63, %v286_v12  ;;  %v358_v3 = vadd.f32 %v1620_v63, %v287_v45 }
  0x74   :  { %v220_v0 = vsub.f32 %v1130_v40, %v1958_v5  ;;  %v546_v29 = vsel %vm418_vm7, %v354_v50, %v482_v55  ;;  %v221_v20 = vsub.f32 %v1131_v22, %v1958_v5  ;;  %v1134_v51 = vunpack.c.l.bf16 %v1326_v42 }
  0x75   :  { %vm419_vm8 = vcmp.gt.f32.partialorder %v355_v28, 0.0  ;;  %v483_v18 = vmul.f32 0.1, %v355_v28  ;;  %v1274_v6 = vpack.c.bf16 %v546_v29, %v545_v46  ;;  %vm420_vm9 = vcmp.gt.f32.partialorder %v356_v30, 0.0 }
  0x76   :  { %v484_v7 = vmul.f32 0.1, %v356_v30  ;;  %vm421_vm10 = vcmp.gt.f32.partialorder %v357_v59, 0.0  ;;  %vm422_vm11 = vcmp.gt.f32.partialorder %v358_v3, 0.0  ;;  %v485_v48 = vmul.f32 0.1, %v357_v59 }
  0x77   :  { %v547_v47 = vsel %vm419_vm8, %v355_v28, %v483_v18  ;;  %v486_v31 = vmul.f32 0.1, %v358_v3  ;;  %1353 = vst [vmem:[%s1948_s4 + $0xd8] sm:$0xff] %v1274_v6   ;;  %v288_v32 = vmul.f32 %v1606_v34, %v220_v0  ;;  %v289_v41 = vmul.f32 %v1606_v34, %v221_v20 }
  0x78   :  { %v548_v23 = vsel %vm420_vm9, %v356_v30, %v484_v7  ;;  %v549_v58 = vsel %vm421_vm10, %v357_v59, %v485_v48  ;;  %v1135_v19 = vunpack.c.h.bf16 %v1326_v42  ;;  %v222_v17 = vsub.f32 %v1134_v51, %v1958_v5 }
  0x79   :  { %v1279_v33 = vpack.c.bf16 %v548_v23, %v547_v47  ;;  %v550_v60 = vsel %vm422_vm11, %v358_v3, %v486_v31  ;;  %v359_v54 = vadd.f32 %v1620_v63, %v288_v32  ;;  %v360_v15 = vadd.f32 %v1620_v63, %v289_v41 }
  0x7a   :  { %v1284_v43 = vpack.c.bf16 %v550_v60, %v549_v58  ;;  %v223_v9 = vsub.f32 %v1135_v19, %v1958_v5  ;;  %v290_v35 = vmul.f32 %v1606_v34, %v222_v17 }
  0x7b   :  { %1354 = vst [vmem:[%s1948_s4 + $0xe0] sm:$0xff] %v1279_v33   ;;  %vm423_vm12 = vcmp.gt.f32.partialorder %v359_v54, 0.0  ;;  %vm424_vm13 = vcmp.gt.f32.partialorder %v360_v15, 0.0  ;;  %v487_v10 = vmul.f32 0.1, %v359_v54 }
  0x7c   :  { %1355 = vst [vmem:[%s1948_s4 + $0xe8] sm:$0xff] %v1284_v43   ;;  %v488_v21 = vmul.f32 0.1, %v360_v15  ;;  %v291_v62 = vmul.f32 %v1606_v34, %v223_v9  ;;  %v361_v53 = vadd.f32 %v1620_v63, %v290_v35 }
  0x7d   :  { %v551_v1 = vsel %vm423_vm12, %v359_v54, %v487_v10 }
  0x7e   :  { %v552_v36 = vsel %vm424_vm13, %v360_v15, %v488_v21  ;;  %v362_v24 = vadd.f32 %v1620_v63, %v291_v62  ;;  %vm425_vm14 = vcmp.gt.f32.partialorder %v361_v53, 0.0  ;;  %v489_v5 = vmul.f32 0.1, %v361_v53 }
  0x7f   :  { %v1289_v52 = vpack.c.bf16 %v552_v36, %v551_v1 }
  0x80   :  { %vm426_vm15 = vcmp.gt.f32.partialorder %v362_v24, 0.0  ;;  %v490_v25 = vmul.f32 0.1, %v362_v24  ;;  %v553_v26 = vsel %vm425_vm14, %v361_v53, %v489_v5 }
  0x81   :  { %1356 = vst [vmem:[%s1948_s4 + $0xf0] sm:$0xff] %v1289_v52  }
  0x82   :  { %v554_v37 = vsel %vm426_vm15, %v362_v24, %v490_v25 }
  0x83   :  { %v1294_v49 = vpack.c.bf16 %v554_v37, %v553_v26 }
  0x85   :  { %1357 = vst [vmem:[%s1948_s4 + $0xf8] sm:$0xff] %v1294_v49  }

// kernel: netd_dcgan_forward.10
= control target key start
LH: loop header
LB: loop body
LE: loop exit
PB: predicated region body
PF: predicated region fallthrough
CT: control target
= control target key end

     0   :  { %vm804_vm0 = vcmask 1040384   ;;  %s1456_s1 = inlined_call_operand.vmem [shape: bf16[512,128], index: 1, kind: input, shape index: {}]   ;;  %s1457_s0 = inlined_call_operand.vmem [shape: bf16[128,512], index: 0, kind: input, shape index: {}]   ;;  %s1458_s2 = inlined_call_operand.vmem [shape: f32[1,128], index: 2, kind: input, shape index: {}]   ;;  %s1459_s3 = inlined_call_operand.vmem [shape: bf16[128,128], index: 3, kind: output, shape index: {0}]   ;;  %s1460_s4 = inlined_call_operand.vmem [shape: f32[1,2,128], index: 4, kind: output, shape index: {1}]  }
   0x1   :  { %v1087_v0 = vld [vmem:[%s1456_s1 + $0x78] sm:$0xff]   ;;  %v1091_v4 = vld [vmem:[%s1456_s1 + $0x70] sm:$0xff]   ;;  %v1095_v8 = vld [vmem:[%s1456_s1 + $0x68] sm:$0xff]  }
   0x2   :  { %v1088_v1 = vld [vmem:[%s1456_s1 + $0xf8] sm:$0xff]   ;;  %959 = vmatprep.subr.bf16.mxu0 %v1087_v0  ;;  %v1092_v5 = vld [vmem:[%s1456_s1 + $0xf0] sm:$0xff]   ;;  %v1096_v9 = vld [vmem:[%s1456_s1 + $0xe8] sm:$0xff]  }
   0x3   :  { %v1089_v2 = vld [vmem:[%s1456_s1 + $0x38] sm:$0xff]   ;;  %1023 = vmatprep.subr.bf16.mxu1 %v1088_v1  ;;  %v1093_v6 = vld [vmem:[%s1456_s1 + $0x30] sm:$0xff]   ;;  %v1097_v10 = vld [vmem:[%s1456_s1 + $0x28] sm:$0xff]  }
   0x4   :  { %v1090_v3 = vld [vmem:[%s1456_s1 + $0xb8] sm:$0xff]   ;;  %960 = vmatpush3.bf16.msra.mxu0 %v1089_v2  ;;  %v1094_v7 = vld [vmem:[%s1456_s1 + $0xb0] sm:$0xff]   ;;  %v1098_v11 = vld [vmem:[%s1456_s1 + $0xa8] sm:$0xff]  }
   0x5   :  { %1024 = vmatpush3.bf16.msra.mxu1 %v1090_v3  ;;  %961 = vmatprep.subr.bf16.mxu0 %v1091_v4  ;;  %v1099_v12 = vld [vmem:[%s1456_s1 + $0x60] sm:$0xff]   ;;  %v1103_v16 = vld [vmem:[%s1456_s1 + $0x58] sm:$0xff]   ;;  %v1107_v20 = vld [vmem:[%s1456_s1 + $0x50] sm:$0xff]  }
   0x6   :  { %1025 = vmatprep.subr.bf16.mxu1 %v1092_v5  ;;  %v1100_v13 = vld [vmem:[%s1456_s1 + $0xe0] sm:$0xff]   ;;  %v1104_v17 = vld [vmem:[%s1456_s1 + $0xd8] sm:$0xff]   ;;  %v1108_v21 = vld [vmem:[%s1456_s1 + $0xd0] sm:$0xff]  }
   0x7   :  { %v1101_v14 = vld [vmem:[%s1456_s1 + $0x20] sm:$0xff]   ;;  %v1105_v18 = vld [vmem:[%s1456_s1 + $0x18] sm:$0xff]   ;;  %v1109_v22 = vld [vmem:[%s1456_s1 + $0x10] sm:$0xff]  }
   0x8   :  { %962 = vmatpush3.bf16.msra.mxu0 %v1093_v6  ;;  %v1102_v15 = vld [vmem:[%s1456_s1 + $0xa0] sm:$0xff]   ;;  %v1106_v19 = vld [vmem:[%s1456_s1 + $0x98] sm:$0xff]   ;;  %v1110_v23 = vld [vmem:[%s1456_s1 + $0x90] sm:$0xff]  }
   0x9   :  { %1026 = vmatpush3.bf16.msra.mxu1 %v1094_v7  ;;  %963 = vmatprep.subr.bf16.mxu0 %v1095_v8  ;;  %v1111_v24 = vld [vmem:[%s1456_s1 + $0x48] sm:$0xff]   ;;  %v1115_v28 = vld [vmem:[%s1456_s1 + $0x40] sm:$0xff]  }
   0xa   :  { %1027 = vmatprep.subr.bf16.mxu1 %v1096_v9  ;;  %v1112_v25 = vld [vmem:[%s1456_s1 + $0xc8] sm:$0xff]   ;;  %v1116_v29 = vld [vmem:[%s1456_s1 + $0xc0] sm:$0xff]  }
   0xb   :  { %v1113_v26 = vld [vmem:[%s1456_s1 + $0x8] sm:$0xff]   ;;  %v1117_v30 = vld [vmem:[%s1456_s1] sm:$0xff]  }
   0xc   :  { %964 = vmatpush3.bf16.msra.mxu0 %v1097_v10  ;;  %v1114_v27 = vld [vmem:[%s1456_s1 + $0x88] sm:$0xff]   ;;  %v1118_v31 = vld [vmem:[%s1456_s1 + $0x80] sm:$0xff]  }
   0xd   :  { %1028 = vmatpush3.bf16.msra.mxu1 %v1098_v11  ;;  %965 = vmatprep.subr.bf16.mxu0 %v1099_v12  ;;  %v1119_v32 = vld [vmem:[%s1457_s0] ss:$16 sps:$4 sm:$0xff]   ;;  %v1121_v33 = vld [vmem:[%s1457_s0 + $0x4] ss:$16 sps:$4 sm:$0xff]   ;;  %v1122_v34 = vld [vmem:[%s1457_s0 + $0x8] ss:$16 sps:$4 sm:$0xff]  }
   0xe   :  { %1029 = vmatprep.subr.bf16.mxu1 %v1100_v13  ;;  %v1124_v35 = vld [vmem:[%s1457_s0 + $0xc] ss:$16 sps:$4 sm:$0xff]   ;;  %504 = vmatprep.mubr.bf16.mxu0 %v1121_v33  ;;  %v1125_v36 = vld [vmem:[%s1457_s0 + $0x24] ss:$16 sps:$4 sm:$0xff]   ;;  %v1129_v38 = vld [vmem:[%s1457_s0 + $0x20] ss:$16 sps:$4 sm:$0xff]  }
   0xf   :  { %601 = vmatprep.mubr.bf16.mxu1 %v1124_v35  ;;  %v1127_v37 = vld [vmem:[%s1457_s0 + $0x2c] ss:$16 sps:$4 sm:$0xff]   ;;  %v1130_v39 = vld [vmem:[%s1457_s0 + $0x28] ss:$16 sps:$4 sm:$0xff]   ;;  %v1131_v40 = vld [vmem:[%s1457_s0 + $0x44] ss:$16 sps:$4 sm:$0xff]  }
  0x10   :  { %966 = vmatpush3.bf16.msra.mxu0 %v1101_v14  ;;  %v1133_v41 = vld [vmem:[%s1457_s0 + $0x4c] ss:$16 sps:$4 sm:$0xff]   ;;  %v1135_v42 = vld [vmem:[%s1457_s0 + $0x40] ss:$16 sps:$4 sm:$0xff]   ;;  %v1136_v43 = vld [vmem:[%s1457_s0 + $0x48] ss:$16 sps:$4 sm:$0xff]  }
  0x11   :  { %1030 = vmatpush3.bf16.msra.mxu1 %v1102_v15  ;;  %967 = vmatprep.subr.bf16.mxu0 %v1103_v16  ;;  %v1137_v44 = vld [vmem:[%s1457_s0 + $0x64] ss:$16 sps:$4 sm:$0xff]   ;;  %v1139_v45 = vld [vmem:[%s1457_s0 + $0x6c] ss:$16 sps:$4 sm:$0xff]   ;;  %v1141_v46 = vld [vmem:[%s1457_s0 + $0x60] ss:$16 sps:$4 sm:$0xff]  }
  0x12   :  { %1031 = vmatprep.subr.bf16.mxu1 %v1104_v17  ;;  %v1142_v47 = vld [vmem:[%s1457_s0 + $0x68] ss:$16 sps:$4 sm:$0xff]   ;;  %v1143_v48 = vld [vmem:[%s1457_s0 + $0x84] ss:$16 sps:$4 sm:$0xff]   ;;  %v1145_v49 = vld [vmem:[%s1457_s0 + $0x8c] ss:$16 sps:$4 sm:$0xff]  }
  0x13   :  { %v1147_v50 = vld [vmem:[%s1457_s0 + $0x80] ss:$16 sps:$4 sm:$0xff]   ;;  %v1148_v51 = vld [vmem:[%s1457_s0 + $0x88] ss:$16 sps:$4 sm:$0xff]   ;;  %v1149_v52 = vld [vmem:[%s1457_s0 + $0xa4] ss:$16 sps:$4 sm:$0xff]  }
  0x14   :  { %968 = vmatpush3.bf16.msra.mxu0 %v1105_v18  ;;  %v1151_v53 = vld [vmem:[%s1457_s0 + $0xac] ss:$16 sps:$4 sm:$0xff]   ;;  %v1153_v54 = vld [vmem:[%s1457_s0 + $0xa0] ss:$16 sps:$4 sm:$0xff]   ;;  %v1154_v55 = vld [vmem:[%s1457_s0 + $0xa8] ss:$16 sps:$4 sm:$0xff]  }
  0x15   :  { %1032 = vmatpush3.bf16.msra.mxu1 %v1106_v19  ;;  %969 = vmatprep.subr.bf16.mxu0 %v1107_v20  ;;  %v1155_v56 = vld [vmem:[%s1457_s0 + $0xc4] ss:$16 sps:$4 sm:$0xff]   ;;  %v1157_v57 = vld [vmem:[%s1457_s0 + $0xcc] ss:$16 sps:$4 sm:$0xff]   ;;  %v1159_v58 = vld [vmem:[%s1457_s0 + $0xc0] ss:$16 sps:$4 sm:$0xff]  }
  0x16   :  { %1033 = vmatprep.subr.bf16.mxu1 %v1108_v21  ;;  %v1160_v59 = vld [vmem:[%s1457_s0 + $0xc8] ss:$16 sps:$4 sm:$0xff]   ;;  %v1161_v60 = vld [vmem:[%s1457_s0 + $0xe4] ss:$16 sps:$4 sm:$0xff]   ;;  %v1163_v61 = vld [vmem:[%s1457_s0 + $0xec] ss:$16 sps:$4 sm:$0xff]  }
  0x17   :  { %v1165_v62 = vld [vmem:[%s1457_s0 + $0xe0] ss:$16 sps:$4 sm:$0xff]   ;;  %v1166_v63 = vld [vmem:[%s1457_s0 + $0xe8] ss:$16 sps:$4 sm:$0xff]  }
  0x18   :  { %970 = vmatpush3.bf16.msra.mxu0 %v1109_v22  ;;  %v1387_v5 = vld [vmem:[%s1458_s2] ss:$0 sm:$0xff] }
  0x19   :  { %1034 = vmatpush3.bf16.msra.mxu1 %v1110_v23  ;;  %971 = vmatprep.subr.bf16.mxu0 %v1111_v24 }
  0x1a   :  { %1035 = vmatprep.subr.bf16.mxu1 %v1112_v25 }
  0x1c   :  { %972 = vmatpush3.bf16.msra.mxu0 %v1113_v26 }
  0x1d   :  { %1036 = vmatpush3.bf16.msra.mxu1 %v1114_v27  ;;  %973 = vmatprep.subr.bf16.mxu0 %v1115_v28 }
  0x1e   :  { %1037 = vmatprep.subr.bf16.mxu1 %v1116_v29 }
  0x20   :  { %974 = vmatpush3.bf16.msra.mxu0 %v1117_v30 }
  0x21   :  { %1038 = vmatpush3.bf16.msra.mxu1 %v1118_v31 }
  0x23   :  { %505 = vmatmul.mubr.bf16.vlgmr.msra.gmra.mxu0 %v1119_v32 }
  0x24   :  { %602 = vmatmul.mubr.bf16.vlgmr.msra.gmra.mxu1 %v1122_v34  ;;  %512 = vmatprep.mubr.bf16.mxu0 %v1125_v36 }
  0x25   :  { %609 = vmatprep.mubr.bf16.mxu1 %v1127_v37 }
  0x2b   :  { %513 = vmatmul.mubr.bf16.gmra.mxu0 %v1129_v38 }
  0x2c   :  { %610 = vmatmul.mubr.bf16.gmra.mxu1 %v1130_v39  ;;  %520 = vmatprep.mubr.bf16.mxu0 %v1131_v40 }
  0x2d   :  { %617 = vmatprep.mubr.bf16.mxu1 %v1133_v41 }
  0x33   :  { %521 = vmatmul.mubr.bf16.gmra.mxu0 %v1135_v42 }
  0x34   :  { %618 = vmatmul.mubr.bf16.gmra.mxu1 %v1136_v43  ;;  %528 = vmatprep.mubr.bf16.mxu0 %v1137_v44 }
  0x35   :  { %625 = vmatprep.mubr.bf16.mxu1 %v1139_v45 }
  0x3b   :  { %529 = vmatmul.mubr.bf16.gmra.mxu0 %v1141_v46 }
  0x3c   :  { %626 = vmatmul.mubr.bf16.gmra.mxu1 %v1142_v47  ;;  %536 = vmatprep.mubr.bf16.mxu0 %v1143_v48 }
  0x3d   :  { %633 = vmatprep.mubr.bf16.mxu1 %v1145_v49 }
  0x43   :  { %537 = vmatmul.mubr.bf16.gmra.mxu0 %v1147_v50 }
  0x44   :  { %634 = vmatmul.mubr.bf16.gmra.mxu1 %v1148_v51  ;;  %544 = vmatprep.mubr.bf16.mxu0 %v1149_v52 }
  0x45   :  { %641 = vmatprep.mubr.bf16.mxu1 %v1151_v53 }
  0x4b   :  { %545 = vmatmul.mubr.bf16.gmra.mxu0 %v1153_v54 }
  0x4c   :  { %642 = vmatmul.mubr.bf16.gmra.mxu1 %v1154_v55  ;;  %552 = vmatprep.mubr.bf16.mxu0 %v1155_v56 }
  0x4d   :  { %649 = vmatprep.mubr.bf16.mxu1 %v1157_v57 }
  0x53   :  { %553 = vmatmul.mubr.bf16.gmra.mxu0 %v1159_v58 }
  0x54   :  { %650 = vmatmul.mubr.bf16.gmra.mxu1 %v1160_v59  ;;  %560 = vmatprep.mubr.bf16.mxu0 %v1161_v60 }
  0x55   :  { %657 = vmatprep.mubr.bf16.mxu1 %v1163_v61 }
  0x5b   :  { %561 = vmatmul.mubr.bf16.gmra.mxu0 %v1165_v62 }
  0x5c   :  { %658 = vmatmul.mubr.bf16.gmra.mxu1 %v1166_v63 }
  0xe3   :  { %v975_v0 = vpop.f32.mrf.mxu0 }
  0xe4   :  { %v1039_v1 = vpop.f32.mrf.mxu1 }
  0xe5   :  { %v976_v2 = vpop.f32.mrf.mxu0 }
  0xe6   :  { %v977_v3 = vadd.f32 %v976_v2, %v975_v0  ;;  %v1040_v4 = vpop.f32.mrf.mxu1 }
  0xe7   :  { %v978_v6 = vpop.f32.mrf.mxu0  ;;  %v1041_v13 = vadd.f32 %v1040_v4, %v1039_v1 }
  0xe8   :  { %v1042_v7 = vpop.f32.mrf.mxu1  ;;  %v507_v9 = vadd.f32 %v977_v3, %v1387_v5 }
  0xe9   :  { %v979_v8 = vpop.f32.mrf.mxu0 }
  0xea   :  { %v980_v10 = vadd.f32 %v979_v8, %v978_v6  ;;  %v1043_v11 = vpop.f32.mrf.mxu1  ;;  %v1391_v18 = vadd.f32 %v1041_v13, %v507_v9 }
  0xeb   :  { %v981_v12 = vpop.f32.mrf.mxu0  ;;  %v1044_v15 = vadd.f32 %v1043_v11, %v1042_v7 }
  0xec   :  { %v510_v14 = vadd.f32 %v980_v10, %v1387_v5  ;;  %v1045_v16 = vpop.f32.mrf.mxu1 }
  0xed   :  { %v982_v17 = vpop.f32.mrf.mxu0 }
  0xee   :  { %v1393_v19 = vadd.f32 %v1044_v15, %v510_v14  ;;  %v983_v20 = vadd.f32 %v982_v17, %v981_v12  ;;  %v1046_v21 = vpop.f32.mrf.mxu1 }
  0xef   :  { %v984_v22 = vpop.f32.mrf.mxu0  ;;  %v1047_v30 = vadd.f32 %v1046_v21, %v1045_v16 }
  0xf0   :  { %v915_v23 = vpack.c.bf16 %v1393_v19, %v1391_v18  ;;  %v1048_v24 = vpop.f32.mrf.mxu1  ;;  %v515_v26 = vadd.f32 %v983_v20, %v1387_v5  ;;  %v768_v13 = vmul.f32 %v1393_v19, %v1393_v19  ;;  %v767_v20 = vmul.f32 %v1391_v18, %v1391_v18 }
  0xf1   :  { %v985_v25 = vpop.f32.mrf.mxu0 }
  0xf2   :  { %916 = vst [vmem:[%s1459_s3] sm:$0xff] %v915_v23   ;;  %v986_v27 = vadd.f32 %v985_v25, %v984_v22  ;;  %v1049_v28 = vpop.f32.mrf.mxu1  ;;  %v612_v35 = vadd.f32 %v1047_v30, %v515_v26  ;;  %v746_v23 = vadd.f32 %v1393_v19, %v1391_v18 }
  0xf3   :  { %v987_v29 = vpop.f32.mrf.mxu0  ;;  %v1050_v32 = vadd.f32 %v1049_v28, %v1048_v24  ;;  %v783_v28 = vadd.f32 %v768_v13, %v767_v20 }
  0xf4   :  { %v518_v31 = vadd.f32 %v986_v27, %v1387_v5  ;;  %v1051_v33 = vpop.f32.mrf.mxu1  ;;  %v769_v21 = vmul.f32 %v612_v35, %v612_v35 }
  0xf5   :  { %v988_v34 = vpop.f32.mrf.mxu0 }
  0xf6   :  { %v1402_v36 = vadd.f32 %v1050_v32, %v518_v31  ;;  %v989_v37 = vadd.f32 %v988_v34, %v987_v29  ;;  %v1052_v38 = vpop.f32.mrf.mxu1  ;;  %v747_v31 = vadd.f32 %v746_v23, %v612_v35 }
  0xf7   :  { %v990_v39 = vpop.f32.mrf.mxu0  ;;  %v1053_v47 = vadd.f32 %v1052_v38, %v1051_v33  ;;  %v784_v38 = vadd.f32 %v783_v28, %v769_v21 }
  0xf8   :  { %v920_v40 = vpack.c.bf16 %v1402_v36, %v612_v35  ;;  %v1054_v41 = vpop.f32.mrf.mxu1  ;;  %v523_v43 = vadd.f32 %v989_v37, %v1387_v5  ;;  %v770_v29 = vmul.f32 %v1402_v36, %v1402_v36  ;;  %v748_v18 = vadd.f32 %v747_v31, %v1402_v36 }
  0xf9   :  { %v991_v42 = vpop.f32.mrf.mxu0 }
  0xfa   :  { %952 = vst [vmem:[%s1459_s3 + $0x8] sm:$0xff] %v920_v40   ;;  %v992_v44 = vadd.f32 %v991_v42, %v990_v39  ;;  %v1055_v45 = vpop.f32.mrf.mxu1  ;;  %v620_v52 = vadd.f32 %v1053_v47, %v523_v43  ;;  %v785_v42 = vadd.f32 %v784_v38, %v770_v29 }
  0xfb   :  { %v993_v46 = vpop.f32.mrf.mxu0  ;;  %v1056_v49 = vadd.f32 %v1055_v45, %v1054_v41 }
  0xfc   :  { %v526_v48 = vadd.f32 %v992_v44, %v1387_v5  ;;  %v1057_v50 = vpop.f32.mrf.mxu1  ;;  %v771_v39 = vmul.f32 %v620_v52, %v620_v52  ;;  %v749_v45 = vadd.f32 %v748_v18, %v620_v52 }
  0xfd   :  { %v994_v51 = vpop.f32.mrf.mxu0 }
  0xfe   :  { %v1410_v53 = vadd.f32 %v1056_v49, %v526_v48  ;;  %v995_v54 = vadd.f32 %v994_v51, %v993_v46  ;;  %v1058_v55 = vpop.f32.mrf.mxu1  ;;  %v786_v48 = vadd.f32 %v785_v42, %v771_v39 }
  0xff   :  { %v996_v56 = vpop.f32.mrf.mxu0  ;;  %v1059_v0 = vadd.f32 %v1058_v55, %v1057_v50 }
 0x100   :  { %v925_v57 = vpack.c.bf16 %v1410_v53, %v620_v52  ;;  %v1060_v58 = vpop.f32.mrf.mxu1  ;;  %v531_v60 = vadd.f32 %v995_v54, %v1387_v5  ;;  %v772_v43 = vmul.f32 %v1410_v53, %v1410_v53  ;;  %v750_v36 = vadd.f32 %v749_v45, %v1410_v53 }
 0x101   :  { %v997_v59 = vpop.f32.mrf.mxu0 }
 0x102   :  { %953 = vst [vmem:[%s1459_s3 + $0x10] sm:$0xff] %v925_v57   ;;  %v998_v61 = vadd.f32 %v997_v59, %v996_v56  ;;  %v1061_v62 = vpop.f32.mrf.mxu1  ;;  %v628_v6 = vadd.f32 %v1059_v0, %v531_v60  ;;  %v787_v57 = vadd.f32 %v786_v48, %v772_v43 }
 0x103   :  { %v999_v63 = vpop.f32.mrf.mxu0  ;;  %v1062_v2 = vadd.f32 %v1061_v62, %v1060_v58 }
 0x104   :  { %v534_v1 = vadd.f32 %v998_v61, %v1387_v5  ;;  %v1063_v3 = vpop.f32.mrf.mxu1  ;;  %v773_v49 = vmul.f32 %v628_v6, %v628_v6  ;;  %v751_v59 = vadd.f32 %v750_v36, %v628_v6 }
 0x105   :  { %v1000_v4 = vpop.f32.mrf.mxu0 }
 0x106   :  { %v631_v7 = vadd.f32 %v1062_v2, %v534_v1  ;;  %v1001_v8 = vadd.f32 %v1000_v4, %v999_v63  ;;  %v1064_v9 = vpop.f32.mrf.mxu1  ;;  %v788_v0 = vadd.f32 %v787_v57, %v773_v49 }
 0x107   :  { %v1002_v10 = vpop.f32.mrf.mxu0  ;;  %v1065_v24 = vadd.f32 %v1064_v9, %v1063_v3 }
 0x108   :  { %v930_v11 = vpack.c.bf16 %v631_v7, %v628_v6  ;;  %v1066_v12 = vpop.f32.mrf.mxu1  ;;  %v539_v15 = vadd.f32 %v1001_v8, %v1387_v5  ;;  %v774_v52 = vmul.f32 %v631_v7, %v631_v7  ;;  %v752_v3 = vadd.f32 %v751_v59, %v631_v7 }
 0x109   :  { %v1003_v14 = vpop.f32.mrf.mxu0 }
 0x10a   :  { %954 = vst [vmem:[%s1459_s3 + $0x18] sm:$0xff] %v930_v11   ;;  %v1004_v16 = vadd.f32 %v1003_v14, %v1002_v10  ;;  %v1067_v17 = vpop.f32.mrf.mxu1  ;;  %v636_v32 = vadd.f32 %v1065_v24, %v539_v15  ;;  %v789_v9 = vadd.f32 %v788_v0, %v774_v52 }
 0x10b   :  { %v1005_v22 = vpop.f32.mrf.mxu0  ;;  %v1068_v26 = vadd.f32 %v1067_v17, %v1066_v12 }
 0x10c   :  { %v542_v25 = vadd.f32 %v1004_v16, %v1387_v5  ;;  %v1069_v27 = vpop.f32.mrf.mxu1  ;;  %v775_v1 = vmul.f32 %v636_v32, %v636_v32  ;;  %v753_v13 = vadd.f32 %v752_v3, %v636_v32 }
 0x10d   :  { %v1006_v30 = vpop.f32.mrf.mxu0 }
 0x10e   :  { %v639_v33 = vadd.f32 %v1068_v26, %v542_v25  ;;  %v1007_v34 = vadd.f32 %v1006_v30, %v1005_v22  ;;  %v1070_v37 = vpop.f32.mrf.mxu1  ;;  %v790_v15 = vadd.f32 %v789_v9, %v775_v1 }
 0x10f   :  { %v1008_v40 = vpop.f32.mrf.mxu0  ;;  %v1071_v51 = vadd.f32 %v1070_v37, %v1069_v27 }
 0x110   :  { %v935_v19 = vpack.c.bf16 %v639_v33, %v636_v32  ;;  %v1072_v41 = vpop.f32.mrf.mxu1  ;;  %v547_v35 = vadd.f32 %v1007_v34, %v1387_v5  ;;  %v776_v10 = vmul.f32 %v639_v33, %v639_v33  ;;  %v754_v7 = vadd.f32 %v753_v13, %v639_v33 }
 0x111   :  { %v1009_v44 = vpop.f32.mrf.mxu0 }
 0x112   :  { %955 = vst [vmem:[%s1459_s3 + $0x20] sm:$0xff] %v935_v19   ;;  %v1010_v46 = vadd.f32 %v1009_v44, %v1008_v40  ;;  %v1073_v47 = vpop.f32.mrf.mxu1  ;;  %v644_v60 = vadd.f32 %v1071_v51, %v547_v35  ;;  %v791_v24 = vadd.f32 %v790_v15, %v776_v10 }
 0x113   :  { %v1011_v50 = vpop.f32.mrf.mxu0  ;;  %v1074_v55 = vadd.f32 %v1073_v47, %v1072_v41 }
 0x114   :  { %v550_v54 = vadd.f32 %v1010_v46, %v1387_v5  ;;  %v1075_v56 = vpop.f32.mrf.mxu1  ;;  %v777_v16 = vmul.f32 %v644_v60, %v644_v60  ;;  %v755_v27 = vadd.f32 %v754_v7, %v644_v60 }
 0x115   :  { %v1012_v58 = vpop.f32.mrf.mxu0 }
 0x116   :  { %v647_v61 = vadd.f32 %v1074_v55, %v550_v54  ;;  %v1013_v62 = vadd.f32 %v1012_v58, %v1011_v50  ;;  %v1076_v63 = vpop.f32.mrf.mxu1  ;;  %v792_v31 = vadd.f32 %v791_v24, %v777_v16 }
 0x117   :  { %v1014_v2 = vpop.f32.mrf.mxu0  ;;  %v1077_v11 = vadd.f32 %v1076_v63, %v1075_v56 }
 0x118   :  { %v940_v4 = vpack.c.bf16 %v647_v61, %v644_v60  ;;  %v555_v53 = vadd.f32 %v1013_v62, %v1387_v5  ;;  %v1078_v8 = vpop.f32.mrf.mxu1  ;;  %v778_v25 = vmul.f32 %v647_v61, %v647_v61  ;;  %v756_v37 = vadd.f32 %v755_v27, %v647_v61 }
 0x119   :  { %v1015_v12 = vpop.f32.mrf.mxu0 }
 0x11a   :  { %956 = vst [vmem:[%s1459_s3 + $0x28] sm:$0xff] %v940_v4   ;;  %v1016_v6 = vadd.f32 %v1015_v12, %v1014_v2  ;;  %v1079_v14 = vpop.f32.mrf.mxu1  ;;  %v652_v17 = vadd.f32 %v1077_v11, %v555_v53  ;;  %v793_v18 = vadd.f32 %v792_v31, %v778_v25 }
 0x11b   :  { %v1017_v20 = vpop.f32.mrf.mxu0  ;;  %v1080_v22 = vadd.f32 %v1079_v14, %v1078_v8 }
 0x11c   :  { %v558_v21 = vadd.f32 %v1016_v6, %v1387_v5  ;;  %v1081_v23 = vpop.f32.mrf.mxu1  ;;  %v779_v32 = vmul.f32 %v652_v17, %v652_v17  ;;  %v757_v41 = vadd.f32 %v756_v37, %v652_v17 }
 0x11d   :  { %v1018_v26 = vpop.f32.mrf.mxu0 }
 0x11e   :  { %v655_v28 = vadd.f32 %v1080_v22, %v558_v21  ;;  %v1019_v29 = vadd.f32 %v1018_v26, %v1017_v20  ;;  %v1082_v30 = vpop.f32.mrf.mxu1  ;;  %v794_v35 = vadd.f32 %v793_v18, %v779_v32 }
 0x11f   :  { %v1020_v34 = vpop.f32.mrf.mxu0  ;;  %v1083_v40 = vadd.f32 %v1082_v30, %v1081_v23 }
 0x120   :  { %v945_v38 = vpack.c.bf16 %v655_v28, %v652_v17  ;;  %v563_v39 = vadd.f32 %v1019_v29, %v1387_v5  ;;  %v1084_v33 = vpop.f32.mrf.mxu1  ;;  %v780_v42 = vmul.f32 %v655_v28, %v655_v28  ;;  %v758_v46 = vadd.f32 %v757_v41, %v655_v28 }
 0x121   :  { %v1021_v19 = vpop.f32.mrf.mxu0 }
 0x122   :  { %957 = vst [vmem:[%s1459_s3 + $0x30] sm:$0xff] %v945_v38   ;;  %v660_v43 = vadd.f32 %v1083_v40, %v563_v39  ;;  %v1022_v44 = vadd.f32 %v1021_v19, %v1020_v34  ;;  %v1085_v45 = vpop.f32.mrf.mxu1  ;;  %v795_v50 = vadd.f32 %v794_v35, %v780_v42 }
 0x123   :  { %v1086_v49 = vadd.f32 %v1085_v45, %v1084_v33 }
 0x124   :  { %v781_v47 = vmul.f32 %v660_v43, %v660_v43  ;;  %v566_v48 = vadd.f32 %v1022_v44, %v1387_v5  ;;  %v759_v36 = vadd.f32 %v758_v46, %v660_v43 }
 0x126   :  { %v663_v51 = vadd.f32 %v1086_v49, %v566_v48  ;;  %v796_v54 = vadd.f32 %v795_v50, %v781_v47 }
 0x128   :  { %v950_v55 = vpack.c.bf16 %v663_v51, %v660_v43  ;;  %v760_v56 = vadd.f32 %v759_v36, %v663_v51  ;;  %v782_v57 = vmul.f32 %v663_v51, %v663_v51 }
 0x12a   :  { %958 = vst [vmem:[%s1459_s3 + $0x38] sm:$0xff] %v950_v55   ;;  %v761_v52 = vrot.slane %v760_v56, 4  ;;  %v797_v58 = vadd.f32 %v796_v54, %v782_v57 }
 0x12c   :  { %v762_v59 = vadd.f32 %v761_v52, %v760_v56  ;;  %v798_v60 = vrot.slane %v797_v58, 4 }
 0x12e   :  { %v763_v61 = vrot.slane %v762_v59, 2  ;;  %v799_v62 = vadd.f32 %v798_v60, %v797_v58 }
 0x130   :  { %v764_v63 = vadd.f32 %v763_v61, %v762_v59  ;;  %v800_v5 = vrot.slane %v799_v62, 2 }
 0x132   :  { %v765_v0 = vrot.slane %v764_v63, 1  ;;  %v801_v1 = vadd.f32 %v800_v5, %v799_v62 }
 0x134   :  { %v802_v2 = vrot.slane %v801_v1, 1  ;;  %v766_v3 = vadd.f32 %v765_v0, %v764_v63 }
 0x136   :  { %v803_v4 = vadd.f32 %v802_v2, %v801_v1 }
 0x138   :  { %v805_v53 = vsel %vm804_vm0, %v766_v3, %v803_v4 }
 0x139   :  { %806 = vst [vmem:[%s1460_s4] sm:$0x3] %v805_v53 }

// kernel: netd_dcgan_forward.11
= control target key start
LH: loop header
LB: loop body
LE: loop exit
PB: predicated region body
PF: predicated region fallthrough
CT: control target
= control target key end

     0   :  { %v60_v7 = vlaneseq  ;;  %s503_s1 = inlined_call_operand.vmem [shape: f32[2,128], index: 1, kind: input, shape index: {}]   ;;  %s504_s0 = inlined_call_operand.vmem [shape: bf16[128,128], index: 0, kind: input, shape index: {}]   ;;  %s505_s2 = inlined_call_operand.vmem [shape: f32[1,128], index: 2, kind: input, shape index: {}]   ;;  %s506_s3 = inlined_call_operand.vmem [shape: f32[1,128], index: 3, kind: input, shape index: {}]   ;;  %s507_s4 = inlined_call_operand.vmem [shape: bf16[128,128], index: 4, kind: output, shape index: {}]  }
   0x1   :  { %v49_v0 = vld [vmem:[%s503_s1] sm:$0x1]  ;;  %v51_v1 = vld [vmem:[%s503_s1 + $0x1] sm:$0x1]  ;;  %v360_v12 = vld [vmem:[%s504_s0 + $0x8] sm:$0xff]  }
   0x2   :  { %v50_v2 = vmul.f32 0.0078125, %v49_v0  ;;  %v52_v3 = vmul.f32 0.0078125, %v51_v1  ;;  %v61_v9 = vshrl.u32 %v60_v7, 7  ;;  %v289_v11 = vld [vmem:[%s504_s0] sm:$0xff]   ;;  %v361_v13 = vld [vmem:[%s504_s0 + $0x10] sm:$0xff]   ;;  %v362_v14 = vld [vmem:[%s504_s0 + $0x18] sm:$0xff]   ;;  %v294_v21 = vunpack.c.l.bf16 %v360_v12 }
   0x3   :  { %v363_v15 = vld [vmem:[%s504_s0 + $0x20] sm:$0xff]   ;;  %v290_v16 = vunpack.c.l.bf16 %v289_v11  ;;  %v291_v17 = vunpack.c.h.bf16 %v289_v11  ;;  %v364_v19 = vld [vmem:[%s504_s0 + $0x28] sm:$0xff]   ;;  %v365_v20 = vld [vmem:[%s504_s0 + $0x30] sm:$0xff]   ;;  %v295_v22 = vunpack.c.h.bf16 %v360_v12  ;;  %v298_v23 = vunpack.c.l.bf16 %v361_v13 }
   0x4   :  { %v53_v4 = vmul.f32 %v50_v2, %v50_v2  ;;  %v62_v10 = vsub.s32 0, %v61_v9  ;;  %v299_v24 = vunpack.c.h.bf16 %v361_v13  ;;  %v366_v25 = vld [vmem:[%s504_s0 + $0x38] sm:$0xff]   ;;  %v58_v26 = vld [vmem:[%s505_s2] sm:$0x1]  ;;  %v302_v27 = vunpack.c.l.bf16 %v362_v14 }
   0x5   :  { %v303_v28 = vunpack.c.h.bf16 %v362_v14  ;;  %v306_v29 = vunpack.c.l.bf16 %v363_v15  ;;  %v307_v30 = vunpack.c.h.bf16 %v363_v15  ;;  %v310_v31 = vunpack.c.l.bf16 %v364_v19  ;;  %v439_v52 = vld [vmem:[%s506_s3] ss:$0 sm:$0xff] }
   0x6   :  { %v54_v5 = vsub.f32 %v52_v3, %v53_v4  ;;  %v63_v18 = vrot.slane %v50_v2, %v62_v10  ;;  %v311_v32 = vunpack.c.h.bf16 %v364_v19  ;;  %v314_v33 = vunpack.c.l.bf16 %v365_v20 }
   0x7   :  { %v315_v34 = vunpack.c.h.bf16 %v365_v20  ;;  %v318_v38 = vunpack.c.l.bf16 %v366_v25  ;;  %v319_v39 = vunpack.c.h.bf16 %v366_v25 }
   0x8   :  { %v55_v6 = vmax.f32 %v54_v5, 0.0  ;;  %v64_v36 = vsub.f32 %v290_v16, %v63_v18  ;;  %v65_v37 = vsub.f32 %v291_v17, %v63_v18  ;;  %v66_v41 = vsub.f32 %v294_v21, %v63_v18 }
   0x9   :  { %v67_v42 = vsub.f32 %v295_v22, %v63_v18  ;;  %v68_v43 = vsub.f32 %v298_v23, %v63_v18  ;;  %v69_v44 = vsub.f32 %v299_v24, %v63_v18  ;;  %v70_v45 = vsub.f32 %v302_v27, %v63_v18 }
   0xa   :  { %v56_v8 = vadd.f32 1e-05, %v55_v6  ;;  %v71_v46 = vsub.f32 %v303_v28, %v63_v18  ;;  %v72_v47 = vsub.f32 %v306_v29, %v63_v18  ;;  %v73_v49 = vsub.f32 %v307_v30, %v63_v18 }
   0xb   :  { %v74_v50 = vsub.f32 %v310_v31, %v63_v18  ;;  %v75_v51 = vsub.f32 %v311_v32, %v63_v18  ;;  %v76_v53 = vsub.f32 %v314_v33, %v63_v18  ;;  %v77_v54 = vsub.f32 %v315_v34, %v63_v18 }
   0xc   :  { %374 = vrsqrt.f32 %v56_v8  ;;  %v441_v55 = vsub.f32 %v318_v38, %v63_v18  ;;  %v443_v56 = vsub.f32 %v319_v39, %v63_v18 }
  0x19   :  { %v375_v35 = vpop.eup %374 }
  0x1a   :  { %v59_v40 = vmul.f32 %v375_v35, %v58_v26 }
  0x1c   :  { %v434_v48 = vrot.slane %v59_v40, %v62_v10 }
  0x1e   :  { %v84_v57 = vmul.f32 %v434_v48, %v64_v36  ;;  %v85_v58 = vmul.f32 %v434_v48, %v65_v37  ;;  %v86_v59 = vmul.f32 %v434_v48, %v66_v41  ;;  %v87_v60 = vmul.f32 %v434_v48, %v67_v42 }
  0x1f   :  { %v88_v61 = vmul.f32 %v434_v48, %v68_v43  ;;  %v89_v62 = vmul.f32 %v434_v48, %v69_v44  ;;  %v90_v63 = vmul.f32 %v434_v48, %v70_v45  ;;  %v91_v0 = vmul.f32 %v434_v48, %v71_v46 }
  0x20   :  { %v107_v1 = vadd.f32 %v439_v52, %v84_v57  ;;  %v108_v2 = vadd.f32 %v439_v52, %v85_v58  ;;  %v109_v3 = vadd.f32 %v439_v52, %v86_v59  ;;  %v110_v4 = vadd.f32 %v439_v52, %v87_v60 }
  0x21   :  { %v111_v5 = vadd.f32 %v439_v52, %v88_v61  ;;  %v112_v6 = vadd.f32 %v439_v52, %v89_v62  ;;  %v113_v7 = vadd.f32 %v439_v52, %v90_v63  ;;  %v114_v8 = vadd.f32 %v439_v52, %v91_v0 }
  0x22   :  { %vm123_vm0 = vcmp.gt.f32.partialorder %v107_v1, 0.0  ;;  %vm124_vm1 = vcmp.gt.f32.partialorder %v108_v2, 0.0  ;;  %v139_v9 = vmul.f32 0.1, %v107_v1  ;;  %v140_v10 = vmul.f32 0.1, %v108_v2 }
  0x23   :  { %vm125_vm2 = vcmp.gt.f32.partialorder %v109_v3, 0.0  ;;  %vm126_vm3 = vcmp.gt.f32.partialorder %v110_v4, 0.0  ;;  %v141_v11 = vmul.f32 0.1, %v109_v3  ;;  %v142_v12 = vmul.f32 0.1, %v110_v4 }
  0x24   :  { %v155_v13 = vsel %vm123_vm0, %v107_v1, %v139_v9  ;;  %v156_v14 = vsel %vm124_vm1, %v108_v2, %v140_v10  ;;  %vm127_vm4 = vcmp.gt.f32.partialorder %v111_v5, 0.0  ;;  %vm128_vm5 = vcmp.gt.f32.partialorder %v112_v6, 0.0 }
  0x25   :  { %v323_v15 = vpack.c.bf16 %v156_v14, %v155_v13  ;;  %v157_v16 = vsel %vm125_vm2, %v109_v3, %v141_v11  ;;  %v158_v17 = vsel %vm126_vm3, %v110_v4, %v142_v12  ;;  %v143_v18 = vmul.f32 0.1, %v111_v5 }
  0x26   :  { %v328_v19 = vpack.c.bf16 %v158_v17, %v157_v16  ;;  %v144_v20 = vmul.f32 0.1, %v112_v6  ;;  %vm129_vm6 = vcmp.gt.f32.partialorder %v113_v7, 0.0  ;;  %vm130_vm7 = vcmp.gt.f32.partialorder %v114_v8, 0.0 }
  0x27   :  { %324 = vst [vmem:[%s507_s4] sm:$0xff] %v323_v15   ;;  %v159_v21 = vsel %vm127_vm4, %v111_v5, %v143_v18  ;;  %v145_v22 = vmul.f32 0.1, %v113_v7  ;;  %v146_v23 = vmul.f32 0.1, %v114_v8  ;;  %v92_v24 = vmul.f32 %v434_v48, %v72_v47 }
  0x28   :  { %367 = vst [vmem:[%s507_s4 + $0x8] sm:$0xff] %v328_v19   ;;  %v160_v25 = vsel %vm128_vm5, %v112_v6, %v144_v20  ;;  %v93_v26 = vmul.f32 %v434_v48, %v73_v49  ;;  %v94_v27 = vmul.f32 %v434_v48, %v74_v50  ;;  %v95_v28 = vmul.f32 %v434_v48, %v75_v51 }
  0x29   :  { %v333_v29 = vpack.c.bf16 %v160_v25, %v159_v21  ;;  %v161_v30 = vsel %vm129_vm6, %v113_v7, %v145_v22  ;;  %v162_v31 = vsel %vm130_vm7, %v114_v8, %v146_v23  ;;  %v115_v32 = vadd.f32 %v439_v52, %v92_v24 }
  0x2a   :  { %v338_v33 = vpack.c.bf16 %v162_v31, %v161_v30  ;;  %v116_v34 = vadd.f32 %v439_v52, %v93_v26  ;;  %v117_v35 = vadd.f32 %v439_v52, %v94_v27  ;;  %v118_v36 = vadd.f32 %v439_v52, %v95_v28 }
  0x2b   :  { %368 = vst [vmem:[%s507_s4 + $0x10] sm:$0xff] %v333_v29   ;;  %vm131_vm8 = vcmp.gt.f32.partialorder %v115_v32, 0.0  ;;  %v147_v37 = vmul.f32 0.1, %v115_v32  ;;  %v96_v38 = vmul.f32 %v434_v48, %v76_v53  ;;  %v97_v39 = vmul.f32 %v434_v48, %v77_v54 }
  0x2c   :  { %369 = vst [vmem:[%s507_s4 + $0x18] sm:$0xff] %v338_v33   ;;  %vm132_vm9 = vcmp.gt.f32.partialorder %v116_v34, 0.0  ;;  %v148_v40 = vmul.f32 0.1, %v116_v34  ;;  %vm133_vm10 = vcmp.gt.f32.partialorder %v117_v35, 0.0  ;;  %vm134_vm11 = vcmp.gt.f32.partialorder %v118_v36, 0.0 }
  0x2d   :  { %v163_v41 = vsel %vm131_vm8, %v115_v32, %v147_v37  ;;  %v149_v42 = vmul.f32 0.1, %v117_v35  ;;  %v150_v43 = vmul.f32 0.1, %v118_v36  ;;  %v119_v44 = vadd.f32 %v439_v52, %v96_v38 }
  0x2e   :  { %v164_v45 = vsel %vm132_vm9, %v116_v34, %v148_v40  ;;  %v120_v46 = vadd.f32 %v439_v52, %v97_v39  ;;  %v98_v47 = vmul.f32 %v434_v48, %v441_v55  ;;  %v99_v49 = vmul.f32 %v434_v48, %v443_v56 }
  0x2f   :  { %v343_v50 = vpack.c.bf16 %v164_v45, %v163_v41  ;;  %v165_v51 = vsel %vm133_vm10, %v117_v35, %v149_v42  ;;  %v166_v53 = vsel %vm134_vm11, %v118_v36, %v150_v43  ;;  %vm135_vm12 = vcmp.gt.f32.partialorder %v119_v44, 0.0 }
  0x30   :  { %v348_v54 = vpack.c.bf16 %v166_v53, %v165_v51  ;;  %vm136_vm13 = vcmp.gt.f32.partialorder %v120_v46, 0.0  ;;  %v151_v57 = vmul.f32 0.1, %v119_v44  ;;  %v152_v58 = vmul.f32 0.1, %v120_v46 }
  0x31   :  { %370 = vst [vmem:[%s507_s4 + $0x20] sm:$0xff] %v343_v50   ;;  %v121_v59 = vadd.f32 %v439_v52, %v98_v47  ;;  %v122_v60 = vadd.f32 %v439_v52, %v99_v49 }
  0x32   :  { %371 = vst [vmem:[%s507_s4 + $0x28] sm:$0xff] %v348_v54   ;;  %v167_v48 = vsel %vm135_vm12, %v119_v44, %v151_v57  ;;  %v168_v55 = vsel %vm136_vm13, %v120_v46, %v152_v58 }
  0x33   :  { %v353_v56 = vpack.c.bf16 %v168_v55, %v167_v48  ;;  %vm137_vm14 = vcmp.gt.f32.partialorder %v121_v59, 0.0  ;;  %vm138_vm15 = vcmp.gt.f32.partialorder %v122_v60, 0.0  ;;  %v153_v61 = vmul.f32 0.1, %v121_v59 }
  0x34   :  { %v154_v62 = vmul.f32 0.1, %v122_v60 }
  0x35   :  { %372 = vst [vmem:[%s507_s4 + $0x30] sm:$0xff] %v353_v56   ;;  %v169_v63 = vsel %vm137_vm14, %v121_v59, %v153_v61 }
  0x36   :  { %v170_v0 = vsel %vm138_vm15, %v122_v60, %v154_v62 }
  0x37   :  { %v358_v1 = vpack.c.bf16 %v170_v0, %v169_v63 }
  0x39   :  { %373 = vst [vmem:[%s507_s4 + $0x38] sm:$0xff] %v358_v1  }

// kernel: netd_dcgan_forward.13
= control target key start
LH: loop header
LB: loop body
LE: loop exit
PB: predicated region body
PF: predicated region fallthrough
CT: control target
= control target key end

     0   :  { %v83_v50 = vlaneseq  ;;  %vm154_vm4 = vcmask 1041409   ;;  %vm157_vm5 = vcmask 1024   ;;  %s254_s0 = inlined_call_operand.vmem [shape: bf16[2,16,128], index: 0, kind: input, shape index: {}]   ;;  %s255_s1 = inlined_call_operand.vmem [shape: f32[1,1,128], index: 1, kind: input, shape index: {}]   ;;  %s256_s2 = inlined_call_operand.vmem [shape: f32[1,1,128], index: 2, kind: input, shape index: {}]   ;;  %s257_s3 = inlined_call_operand.vmem [shape: f32[1,16,128], index: 3, kind: input, shape index: {}]   ;;  %s258_s4 = inlined_call_operand.<no memory space> [shape: f32[1,1], index: 4, kind: input, shape index: {}]   ;;  %s259_s5 = inlined_call_operand.vmem [shape: f32[2,1], index: 5, kind: output, shape index: {}]  }
   0x1   :  { %v166_v0 = vld [vmem:[%s254_s0] sm:$0xff]   ;;  %v173_v1 = vld [vmem:[%s254_s0 + $0x8] sm:$0xff]  }
   0x2   :  { %v212_v2 = vunpack.c.l.bf16 %v166_v0  ;;  %v214_v3 = vunpack.c.h.bf16 %v166_v0  ;;  %v216_v4 = vunpack.c.l.bf16 %v173_v1  ;;  %v218_v5 = vunpack.c.h.bf16 %v173_v1  ;;  %v81_v52 = vld [vmem:[%s255_s1] sm:$0x1] }
   0x3   :  { %v84_v51 = vshrl.u32 %v83_v50, 7  ;;  %v163_v61 = vld [vmem:[%s256_s2] ss:$0 sm:$0xff] }
   0x4   :  { %v30_v6 = vadd.f32 %v214_v3, %v212_v2  ;;  %v37_v7 = vadd.f32 %v218_v5, %v216_v4  ;;  %v50_v8 = vmul.f32 %v212_v2, %v212_v2  ;;  %v51_v9 = vmul.f32 %v214_v3, %v214_v3 }
   0x5   :  { %v52_v10 = vmul.f32 %v216_v4, %v216_v4  ;;  %v53_v11 = vmul.f32 %v218_v5, %v218_v5  ;;  %v85_v53 = vsub.s32 0, %v84_v51 }
   0x6   :  { %v31_v12 = vrot.slane %v30_v6, 4  ;;  %v38_v13 = vrot.slane %v37_v7, 4  ;;  %v54_v14 = vadd.f32 %v51_v9, %v50_v8 }
   0x7   :  { %v61_v15 = vadd.f32 %v53_v11, %v52_v10 }
   0x8   :  { %v32_v16 = vadd.f32 %v31_v12, %v30_v6  ;;  %v39_v17 = vadd.f32 %v38_v13, %v37_v7  ;;  %v55_v18 = vrot.slane %v54_v14, 4  ;;  %v115_v13 = vld [vmem:[%s257_s3 + $0x8] sm:$0xff] }
   0x9   :  { %v62_v19 = vrot.slane %v61_v15, 4 }
   0xa   :  { %v33_v20 = vrot.slane %v32_v16, 2  ;;  %v40_v21 = vrot.slane %v39_v17, 2  ;;  %v56_v22 = vadd.f32 %v55_v18, %v54_v14 }
   0xb   :  { %v63_v23 = vadd.f32 %v62_v19, %v61_v15 }
   0xc   :  { %v34_v24 = vadd.f32 %v33_v20, %v32_v16  ;;  %v41_v25 = vadd.f32 %v40_v21, %v39_v17  ;;  %v57_v26 = vrot.slane %v56_v22, 2  ;;  %v10_v20 = vstv %s258_s4 }
   0xd   :  { %v64_v27 = vrot.slane %v63_v23, 2  ;;  %11 = vst [vmem:[#allocation2] sm:$0x1] %v10_v20 }
   0xe   :  { %v35_v28 = vrot.slane %v34_v24, 1  ;;  %v42_v29 = vrot.slane %v41_v25, 1  ;;  %v58_v30 = vadd.f32 %v57_v26, %v56_v22 }
   0xf   :  { %v65_v31 = vadd.f32 %v64_v27, %v63_v23 }
  0x10   :  { %v36_v32 = vadd.f32 %v35_v28, %v34_v24  ;;  %v43_v33 = vadd.f32 %v42_v29, %v41_v25  ;;  %v59_v34 = vrot.slane %v58_v30, 1 }
  0x11   :  { %v66_v35 = vrot.slane %v65_v31, 1 }
  0x12   :  { %v45_v36 = vmul.f32 0.0625, %v36_v32  ;;  %v46_v37 = vmul.f32 0.0625, %v43_v33  ;;  %v60_v38 = vadd.f32 %v59_v34, %v58_v30 }
  0x13   :  { %v67_v39 = vadd.f32 %v66_v35, %v65_v31 }
  0x14   :  { %v47_v40 = vadd.f32 %v46_v37, %v45_v36  ;;  %v68_v41 = vmul.f32 0.0625, %v60_v38  ;;  %v164_v37 = vld [vmem:[#allocation2] ss:$0 sm:$0xff] }
  0x15   :  { %v69_v42 = vmul.f32 0.0625, %v67_v39 }
  0x16   :  { %v49_v43 = vmul.f32 0.5, %v47_v40 }
  0x17   :  { %v70_v44 = vadd.f32 %v69_v42, %v68_v41 }
  0x18   :  { %v72_v45 = vmul.f32 %v49_v43, %v49_v43  ;;  %v77_v55 = vsub.f32 %v216_v4, %v49_v43  ;;  %v75_v57 = vsub.f32 %v212_v2, %v49_v43  ;;  %v78_v58 = vsub.f32 %v218_v5, %v49_v43  ;;  %v114_v2 = vld [vmem:[%s257_s3] sm:$0xff] }
  0x19   :  { %v71_v46 = vmul.f32 0.5, %v70_v44  ;;  %v76_v59 = vsub.f32 %v214_v3, %v49_v43 }
  0x1b   :  { %v73_v47 = vsub.f32 %v71_v46, %v72_v45 }
  0x1d   :  { %v74_v48 = vmax.f32 %v73_v47, 0.0 }
  0x1f   :  { %v79_v49 = vadd.f32 1e-05, %v74_v48 }
  0x21   :  { %174 = vrsqrt.f32 %v79_v49 }
  0x2e   :  { %v175_v54 = vpop.eup %174 }
  0x2f   :  { %v82_v56 = vmul.f32 %v175_v54, %v81_v52 }
  0x31   :  { %v86_v60 = vrot.slane %v82_v56, %v85_v53 }
  0x33   :  { %v89_v62 = vmul.f32 %v86_v60, %v77_v55  ;;  %v87_v63 = vmul.f32 %v86_v60, %v75_v57  ;;  %v90_v0 = vmul.f32 %v86_v60, %v78_v58  ;;  %v88_v1 = vmul.f32 %v86_v60, %v76_v59 }
  0x35   :  { %v100_v6 = vadd.f32 %v163_v61, %v89_v62  ;;  %v98_v7 = vadd.f32 %v163_v61, %v87_v63  ;;  %v101_v8 = vadd.f32 %v163_v61, %v90_v0  ;;  %v99_v4 = vadd.f32 %v163_v61, %v88_v1 }
  0x37   :  { %vm104_vm0 = vcmp.gt.f32.partialorder %v100_v6, 0.0  ;;  %v108_v5 = vmul.f32 0.1, %v100_v6  ;;  %vm102_vm1 = vcmp.gt.f32.partialorder %v98_v7, 0.0  ;;  %v106_v3 = vmul.f32 0.1, %v98_v7 }
  0x38   :  { %vm105_vm2 = vcmp.gt.f32.partialorder %v101_v8, 0.0  ;;  %v109_v9 = vmul.f32 0.1, %v101_v8  ;;  %vm103_vm3 = vcmp.gt.f32.partialorder %v99_v4, 0.0  ;;  %v107_v10 = vmul.f32 0.1, %v99_v4 }
  0x39   :  { %v112_v11 = vsel %vm104_vm0, %v100_v6, %v108_v5  ;;  %v110_v12 = vsel %vm102_vm1, %v98_v7, %v106_v3 }
  0x3a   :  { %v118_v14 = vmul.f32 %v114_v2, %v112_v11  ;;  %v116_v15 = vmul.f32 %v114_v2, %v110_v12  ;;  %v113_v16 = vsel %vm105_vm2, %v101_v8, %v109_v9  ;;  %v111_v17 = vsel %vm103_vm3, %v99_v4, %v107_v10 }
  0x3b   :  { %v119_v18 = vmul.f32 %v115_v13, %v113_v16  ;;  %v117_v19 = vmul.f32 %v115_v13, %v111_v17 }
  0x3c   :  { %124 = vadd.xlane.f32.xlu0 %v118_v14  ;;  %120 = vadd.xlane.f32.xlu1 %v116_v15 }
  0x40   :  { %126 = vadd.xlane.f32.xlu0 %v119_v18  ;;  %122 = vadd.xlane.f32.xlu1 %v117_v19 }
  0xc5   :  { %v125_v21 = vpop.xlane.xlu0 %124  ;;  %v121_v22 = vpop.xlane.xlu1 %120 }
  0xc9   :  { %v127_v23 = vpop.xlane.xlu0 %126  ;;  %v123_v24 = vpop.xlane.xlu1 %122 }
  0xca   :  { %v135_v25 = vadd.f32 %v127_v23, %v125_v21  ;;  %v128_v26 = vadd.f32 %v123_v24, %v121_v22 }
  0xcc   :  { %v136_v27 = vrot.slane %v135_v25, 4  ;;  %v129_v28 = vrot.slane %v128_v26, 4 }
  0xce   :  { %v137_v29 = vadd.f32 %v136_v27, %v135_v25  ;;  %v130_v30 = vadd.f32 %v129_v28, %v128_v26 }
  0xd0   :  { %v138_v31 = vrot.slane %v137_v29, 2  ;;  %v131_v32 = vrot.slane %v130_v30, 2 }
  0xd2   :  { %v139_v33 = vadd.f32 %v138_v31, %v137_v29  ;;  %v132_v34 = vadd.f32 %v131_v32, %v130_v30 }
  0xd4   :  { %v140_v35 = vrot.slane %v139_v33, 1  ;;  %v133_v36 = vrot.slane %v132_v34, 1 }
  0xd6   :  { %v141_v38 = vadd.f32 %v140_v35, %v139_v33  ;;  %v134_v39 = vadd.f32 %v133_v36, %v132_v34 }
  0xd8   :  { %v150_v40 = vadd.f32 %v164_v37, %v141_v38  ;;  %v149_v42 = vadd.f32 %v164_v37, %v134_v39 }
  0xda   :  { %v153_v41 = vrot.slane %v150_v40, 7 }
  0xdc   :  { %v155_v43 = vsel %vm154_vm4, %v153_v41, %v149_v42 }
  0xdd   :  { %158 = vst.msk [vmem:[%s259_s5] sm:$0x3] %vm157_vm5, %v155_v43 }

// kernel: netd_dcgan_forward.12
= control target key start
LH: loop header
LB: loop body
LE: loop exit
PB: predicated region body
PF: predicated region fallthrough
CT: control target
= control target key end

     0   :  { %s1395_s1 = inlined_call_operand.vmem [shape: bf16[1024,128], index: 1, kind: input, shape index: {}]   ;;  %s1396_s0 = inlined_call_operand.vmem [shape: bf16[32,1024], index: 0, kind: input, shape index: {}]   ;;  %s1397_s2 = inlined_call_operand.vmem [shape: f32[1,128], index: 2, kind: input, shape index: {}]   ;;  %s1398_s3 = inlined_call_operand.vmem [shape: bf16[32,128], index: 3, kind: output, shape index: {}]  }
   0x1   :  { %v1062_v0 = vld [vmem:[%s1395_s1 + $0x78] sm:$0xff]   ;;  %v1066_v4 = vld [vmem:[%s1395_s1 + $0x70] sm:$0xff]   ;;  %v1070_v8 = vld [vmem:[%s1395_s1 + $0x68] sm:$0xff]  }
   0x2   :  { %v1063_v1 = vld [vmem:[%s1395_s1 + $0xf8] sm:$0xff]   ;;  %950 = vmatprep.subr.bf16.mxu0 %v1062_v0  ;;  %v1067_v5 = vld [vmem:[%s1395_s1 + $0xf0] sm:$0xff]   ;;  %v1071_v9 = vld [vmem:[%s1395_s1 + $0xe8] sm:$0xff]  }
   0x3   :  { %v1064_v2 = vld [vmem:[%s1395_s1 + $0x38] sm:$0xff]   ;;  %978 = vmatprep.subr.bf16.mxu1 %v1063_v1  ;;  %v1068_v6 = vld [vmem:[%s1395_s1 + $0x30] sm:$0xff]   ;;  %v1072_v10 = vld [vmem:[%s1395_s1 + $0x28] sm:$0xff]  }
   0x4   :  { %v1065_v3 = vld [vmem:[%s1395_s1 + $0xb8] sm:$0xff]   ;;  %951 = vmatpush3.bf16.msra.mxu0 %v1064_v2  ;;  %v1069_v7 = vld [vmem:[%s1395_s1 + $0xb0] sm:$0xff]   ;;  %v1073_v11 = vld [vmem:[%s1395_s1 + $0xa8] sm:$0xff]  }
   0x5   :  { %979 = vmatpush3.bf16.msra.mxu1 %v1065_v3  ;;  %952 = vmatprep.subr.bf16.mxu0 %v1066_v4  ;;  %v1074_v12 = vld [vmem:[%s1395_s1 + $0x60] sm:$0xff]   ;;  %v1078_v16 = vld [vmem:[%s1395_s1 + $0x58] sm:$0xff]   ;;  %v1082_v20 = vld [vmem:[%s1395_s1 + $0x50] sm:$0xff]  }
   0x6   :  { %980 = vmatprep.subr.bf16.mxu1 %v1067_v5  ;;  %v1075_v13 = vld [vmem:[%s1395_s1 + $0xe0] sm:$0xff]   ;;  %v1079_v17 = vld [vmem:[%s1395_s1 + $0xd8] sm:$0xff]   ;;  %v1083_v21 = vld [vmem:[%s1395_s1 + $0xd0] sm:$0xff]  }
   0x7   :  { %v1076_v14 = vld [vmem:[%s1395_s1 + $0x20] sm:$0xff]   ;;  %v1080_v18 = vld [vmem:[%s1395_s1 + $0x18] sm:$0xff]   ;;  %v1084_v22 = vld [vmem:[%s1395_s1 + $0x10] sm:$0xff]  }
   0x8   :  { %953 = vmatpush3.bf16.msra.mxu0 %v1068_v6  ;;  %v1077_v15 = vld [vmem:[%s1395_s1 + $0xa0] sm:$0xff]   ;;  %v1081_v19 = vld [vmem:[%s1395_s1 + $0x98] sm:$0xff]   ;;  %v1085_v23 = vld [vmem:[%s1395_s1 + $0x90] sm:$0xff]  }
   0x9   :  { %981 = vmatpush3.bf16.msra.mxu1 %v1069_v7  ;;  %954 = vmatprep.subr.bf16.mxu0 %v1070_v8  ;;  %v1086_v24 = vld [vmem:[%s1395_s1 + $0x48] sm:$0xff]   ;;  %v1090_v28 = vld [vmem:[%s1395_s1 + $0x40] sm:$0xff]   ;;  %v1094_v40 = vld [vmem:[%s1395_s1 + $0x178] sm:$0xff]  }
   0xa   :  { %982 = vmatprep.subr.bf16.mxu1 %v1071_v9  ;;  %v1087_v25 = vld [vmem:[%s1395_s1 + $0xc8] sm:$0xff]   ;;  %v1091_v29 = vld [vmem:[%s1395_s1 + $0xc0] sm:$0xff]   ;;  %v1095_v41 = vld [vmem:[%s1395_s1 + $0x1f8] sm:$0xff]  }
   0xb   :  { %v1088_v26 = vld [vmem:[%s1395_s1 + $0x8] sm:$0xff]   ;;  %v1092_v30 = vld [vmem:[%s1395_s1] sm:$0xff]   ;;  %v1096_v42 = vld [vmem:[%s1395_s1 + $0x138] sm:$0xff]  }
   0xc   :  { %955 = vmatpush3.bf16.msra.mxu0 %v1072_v10  ;;  %v1089_v27 = vld [vmem:[%s1395_s1 + $0x88] sm:$0xff]   ;;  %v1093_v31 = vld [vmem:[%s1395_s1 + $0x80] sm:$0xff]   ;;  %v1097_v43 = vld [vmem:[%s1395_s1 + $0x1b8] sm:$0xff]  }
   0xd   :  { %983 = vmatpush3.bf16.msra.mxu1 %v1073_v11  ;;  %956 = vmatprep.subr.bf16.mxu0 %v1074_v12  ;;  %v15_v32 = vld [vmem:[%s1396_s0] sm:$0xff]  ;;  %v16_v34 = vld [vmem:[%s1396_s0 + $0x8] sm:$0xff]  ;;  %v1098_v44 = vld [vmem:[%s1395_s1 + $0x170] sm:$0xff]  }
   0xe   :  { %984 = vmatprep.subr.bf16.mxu1 %v1075_v13  ;;  %v19_v33 = vld [vmem:[%s1396_s0 + $0x20] sm:$0xff]  ;;  %v20_v37 = vld [vmem:[%s1396_s0 + $0x28] sm:$0xff]  ;;  %v1099_v45 = vld [vmem:[%s1395_s1 + $0x1f0] sm:$0xff]  }
   0xf   :  { %v851_v35 = vcombine.low %v15_v32, %v19_v33  ;;  %v852_v36 = vcombine.high %v15_v32, %v19_v33  ;;  %v853_v38 = vcombine.low %v16_v34, %v20_v37  ;;  %v854_v39 = vcombine.high %v16_v34, %v20_v37  ;;  %v1100_v46 = vld [vmem:[%s1395_s1 + $0x130] sm:$0xff]   ;;  %v1102_v48 = vld [vmem:[%s1395_s1 + $0x168] sm:$0xff]   ;;  %v1106_v52 = vld [vmem:[%s1395_s1 + $0x160] sm:$0xff]  }
  0x10   :  { %957 = vmatpush3.bf16.msra.mxu0 %v1076_v14  ;;  %v1101_v47 = vld [vmem:[%s1395_s1 + $0x1b0] sm:$0xff]   ;;  %v1103_v49 = vld [vmem:[%s1395_s1 + $0x1e8] sm:$0xff]   ;;  %v1107_v53 = vld [vmem:[%s1395_s1 + $0x1e0] sm:$0xff]  }
  0x11   :  { %985 = vmatpush3.bf16.msra.mxu1 %v1077_v15  ;;  %958 = vmatprep.subr.bf16.mxu0 %v1078_v16  ;;  %v1104_v50 = vld [vmem:[%s1395_s1 + $0x128] sm:$0xff]   ;;  %v1108_v54 = vld [vmem:[%s1395_s1 + $0x120] sm:$0xff]   ;;  %v1110_v56 = vld [vmem:[%s1395_s1 + $0x158] sm:$0xff]  }
  0x12   :  { %986 = vmatprep.subr.bf16.mxu1 %v1079_v17  ;;  %662 = vmatprep.mubr.bf16.mxu0 %v852_v36  ;;  %v1105_v51 = vld [vmem:[%s1395_s1 + $0x1a8] sm:$0xff]   ;;  %v1109_v55 = vld [vmem:[%s1395_s1 + $0x1a0] sm:$0xff]   ;;  %v1111_v57 = vld [vmem:[%s1395_s1 + $0x1d8] sm:$0xff]  }
  0x13   :  { %711 = vmatprep.mubr.bf16.mxu1 %v854_v39  ;;  %v23_v58 = vld [vmem:[%s1396_s0 + $0x40] sm:$0xff]  ;;  %v1112_v61 = vld [vmem:[%s1395_s1 + $0x118] sm:$0xff]   ;;  %v24_v0 = vld [vmem:[%s1396_s0 + $0x48] sm:$0xff] }
  0x14   :  { %959 = vmatpush3.bf16.msra.mxu0 %v1080_v18  ;;  %v27_v59 = vld [vmem:[%s1396_s0 + $0x60] sm:$0xff]  ;;  %v1113_v63 = vld [vmem:[%s1395_s1 + $0x198] sm:$0xff]   ;;  %v28_v1 = vld [vmem:[%s1396_s0 + $0x68] sm:$0xff] }
  0x15   :  { %987 = vmatpush3.bf16.msra.mxu1 %v1081_v19  ;;  %960 = vmatprep.subr.bf16.mxu0 %v1082_v20  ;;  %v860_v60 = vcombine.high %v23_v58, %v27_v59  ;;  %v859_v62 = vcombine.low %v23_v58, %v27_v59  ;;  %v862_v2 = vcombine.high %v24_v0, %v28_v1  ;;  %v1114_v4 = vld [vmem:[%s1395_s1 + $0x150] sm:$0xff]   ;;  %v1118_v8 = vld [vmem:[%s1395_s1 + $0x148] sm:$0xff]   ;;  %v1122_v12 = vld [vmem:[%s1395_s1 + $0x140] sm:$0xff]  }
  0x16   :  { %988 = vmatprep.subr.bf16.mxu1 %v1083_v21  ;;  %v861_v3 = vcombine.low %v24_v0, %v28_v1  ;;  %v1115_v5 = vld [vmem:[%s1395_s1 + $0x1d0] sm:$0xff]   ;;  %v1119_v9 = vld [vmem:[%s1395_s1 + $0x1c8] sm:$0xff]   ;;  %v1123_v13 = vld [vmem:[%s1395_s1 + $0x1c0] sm:$0xff]  }
  0x17   :  { %v1116_v6 = vld [vmem:[%s1395_s1 + $0x110] sm:$0xff]   ;;  %v1120_v10 = vld [vmem:[%s1395_s1 + $0x108] sm:$0xff]   ;;  %v1124_v14 = vld [vmem:[%s1395_s1 + $0x100] sm:$0xff]  }
  0x18   :  { %961 = vmatpush3.bf16.msra.mxu0 %v1084_v22  ;;  %v1117_v7 = vld [vmem:[%s1395_s1 + $0x190] sm:$0xff]   ;;  %v1121_v11 = vld [vmem:[%s1395_s1 + $0x188] sm:$0xff]   ;;  %v1125_v15 = vld [vmem:[%s1395_s1 + $0x180] sm:$0xff]  }
  0x19   :  { %989 = vmatpush3.bf16.msra.mxu1 %v1085_v23  ;;  %962 = vmatprep.subr.bf16.mxu0 %v1086_v24  ;;  %v17_v16 = vld [vmem:[%s1396_s0 + $0x10] sm:$0xff]  ;;  %v18_v18 = vld [vmem:[%s1396_s0 + $0x18] sm:$0xff] }
  0x1a   :  { %990 = vmatprep.subr.bf16.mxu1 %v1087_v25  ;;  %v21_v17 = vld [vmem:[%s1396_s0 + $0x30] sm:$0xff]  ;;  %v22_v19 = vld [vmem:[%s1396_s0 + $0x38] sm:$0xff] }
  0x1b   :  { %v855_v20 = vcombine.low %v17_v16, %v21_v17  ;;  %v856_v21 = vcombine.high %v17_v16, %v21_v17  ;;  %v857_v22 = vcombine.low %v18_v18, %v22_v19  ;;  %v858_v23 = vcombine.high %v18_v18, %v22_v19  ;;  %v25_v24 = vld [vmem:[%s1396_s0 + $0x50] sm:$0xff] }
  0x1c   :  { %963 = vmatpush3.bf16.msra.mxu0 %v1088_v26  ;;  %v29_v25 = vld [vmem:[%s1396_s0 + $0x70] sm:$0xff]  ;;  %v26_v26 = vld [vmem:[%s1396_s0 + $0x58] sm:$0xff] }
  0x1d   :  { %991 = vmatpush3.bf16.msra.mxu1 %v1089_v27  ;;  %964 = vmatprep.subr.bf16.mxu0 %v1090_v28  ;;  %v864_v27 = vcombine.high %v25_v24, %v29_v25  ;;  %v30_v28 = vld [vmem:[%s1396_s0 + $0x78] sm:$0xff] }
  0x1e   :  { %992 = vmatprep.subr.bf16.mxu1 %v1091_v29  ;;  %v866_v29 = vcombine.high %v26_v26, %v30_v28 }
  0x20   :  { %965 = vmatpush3.bf16.msra.mxu0 %v1092_v30  ;;  %v863_v30 = vcombine.low %v25_v24, %v29_v25 }
  0x21   :  { %993 = vmatpush3.bf16.msra.mxu1 %v1093_v31  ;;  %1006 = vmatprep.subr.bf16.mxu0 %v1094_v40  ;;  %v865_v31 = vcombine.low %v26_v26, %v30_v28 }
  0x22   :  { %1034 = vmatprep.subr.bf16.mxu1 %v1095_v41 }
  0x23   :  { %663 = vmatmul.mubr.bf16.vlgmr.msra.gmra.mxu0 %v851_v35 }
  0x24   :  { %712 = vmatmul.mubr.bf16.vlgmr.msra.gmra.mxu1 %v853_v38  ;;  %1007 = vmatpush3.bf16.msra.mxu0 %v1096_v42 }
  0x25   :  { %1035 = vmatpush3.bf16.msra.mxu1 %v1097_v43  ;;  %1008 = vmatprep.subr.bf16.mxu0 %v1098_v44 }
  0x26   :  { %1036 = vmatprep.subr.bf16.mxu1 %v1099_v45  ;;  %670 = vmatprep.mubr.bf16.mxu0 %v860_v60 }
  0x27   :  { %719 = vmatprep.mubr.bf16.mxu1 %v862_v2 }
  0x28   :  { %1009 = vmatpush3.bf16.msra.mxu0 %v1100_v46 }
  0x29   :  { %1037 = vmatpush3.bf16.msra.mxu1 %v1101_v47  ;;  %1010 = vmatprep.subr.bf16.mxu0 %v1102_v48  ;;  %v850_v47 = vld [vmem:[%s1397_s2] ss:$0 sm:$0xff] }
  0x2a   :  { %1038 = vmatprep.subr.bf16.mxu1 %v1103_v49 }
  0x2b   :  { %671 = vmatmul.mubr.bf16.gmra.mxu0 %v859_v62 }
  0x2c   :  { %1011 = vmatpush3.bf16.msra.mxu0 %v1104_v50  ;;  %720 = vmatmul.mubr.bf16.gmra.mxu1 %v861_v3 }
  0x2d   :  { %1039 = vmatpush3.bf16.msra.mxu1 %v1105_v51  ;;  %1012 = vmatprep.subr.bf16.mxu0 %v1106_v52 }
  0x2e   :  { %1040 = vmatprep.subr.bf16.mxu1 %v1107_v53  ;;  %760 = vmatprep.mubr.bf16.mxu0 %v856_v21 }
  0x2f   :  { %809 = vmatprep.mubr.bf16.mxu1 %v858_v23 }
  0x30   :  { %1013 = vmatpush3.bf16.msra.mxu0 %v1108_v54 }
  0x31   :  { %1041 = vmatpush3.bf16.msra.mxu1 %v1109_v55  ;;  %1014 = vmatprep.subr.bf16.mxu0 %v1110_v56 }
  0x32   :  { %1042 = vmatprep.subr.bf16.mxu1 %v1111_v57 }
  0x34   :  { %1015 = vmatpush3.bf16.msra.mxu0 %v1112_v61 }
  0x35   :  { %1043 = vmatpush3.bf16.msra.mxu1 %v1113_v63  ;;  %1016 = vmatprep.subr.bf16.mxu0 %v1114_v4 }
  0x36   :  { %1044 = vmatprep.subr.bf16.mxu1 %v1115_v5 }
  0x38   :  { %1017 = vmatpush3.bf16.msra.mxu0 %v1116_v6 }
  0x39   :  { %1045 = vmatpush3.bf16.msra.mxu1 %v1117_v7  ;;  %1018 = vmatprep.subr.bf16.mxu0 %v1118_v8 }
  0x3a   :  { %1046 = vmatprep.subr.bf16.mxu1 %v1119_v9 }
  0x3c   :  { %1019 = vmatpush3.bf16.msra.mxu0 %v1120_v10 }
  0x3d   :  { %1047 = vmatpush3.bf16.msra.mxu1 %v1121_v11  ;;  %1020 = vmatprep.subr.bf16.mxu0 %v1122_v12 }
  0x3e   :  { %1048 = vmatprep.subr.bf16.mxu1 %v1123_v13 }
  0x40   :  { %1021 = vmatpush3.bf16.msra.mxu0 %v1124_v14 }
  0x41   :  { %1049 = vmatpush3.bf16.msra.mxu1 %v1125_v15 }
  0x43   :  { %761 = vmatmul.mubr.bf16.vlgmr.msra.gmra.mxu0 %v855_v20 }
  0x44   :  { %810 = vmatmul.mubr.bf16.vlgmr.msra.gmra.mxu1 %v857_v22  ;;  %768 = vmatprep.mubr.bf16.mxu0 %v864_v27 }
  0x45   :  { %817 = vmatprep.mubr.bf16.mxu1 %v866_v29 }
  0x4b   :  { %769 = vmatmul.mubr.bf16.gmra.mxu0 %v863_v30 }
  0x4c   :  { %818 = vmatmul.mubr.bf16.gmra.mxu1 %v865_v31 }
  0xe3   :  { %v966_v32 = vpop.f32.mrf.mxu0 }
  0xe4   :  { %v994_v33 = vpop.f32.mrf.mxu1 }
  0xe5   :  { %v967_v34 = vpop.f32.mrf.mxu0 }
  0xe6   :  { %v995_v35 = vpop.f32.mrf.mxu1  ;;  %v968_v46 = vadd.f32 %v967_v34, %v966_v32 }
  0xe7   :  { %v969_v36 = vpop.f32.mrf.mxu0  ;;  %v996_v54 = vadd.f32 %v995_v35, %v994_v33 }
  0xe8   :  { %v997_v37 = vpop.f32.mrf.mxu1  ;;  %v665_v53 = vadd.f32 %v968_v46, %v850_v47 }
  0xe9   :  { %v970_v38 = vpop.f32.mrf.mxu0 }
  0xea   :  { %v998_v39 = vpop.f32.mrf.mxu1  ;;  %v971_v50 = vadd.f32 %v970_v38, %v969_v36  ;;  %v714_v62 = vadd.f32 %v996_v54, %v665_v53 }
  0xeb   :  { %v972_v40 = vpop.f32.mrf.mxu0  ;;  %v999_v63 = vadd.f32 %v998_v39, %v997_v37 }
  0xec   :  { %v1000_v41 = vpop.f32.mrf.mxu1  ;;  %v668_v57 = vadd.f32 %v971_v50, %v850_v47 }
  0xed   :  { %v973_v42 = vpop.f32.mrf.mxu0 }
  0xee   :  { %v1001_v43 = vpop.f32.mrf.mxu1  ;;  %v974_v59 = vadd.f32 %v973_v42, %v972_v40  ;;  %v717_v3 = vadd.f32 %v999_v63, %v668_v57 }
  0xef   :  { %v975_v44 = vpop.f32.mrf.mxu0  ;;  %v1002_v9 = vadd.f32 %v1001_v43, %v1000_v41 }
  0xf0   :  { %v1003_v45 = vpop.f32.mrf.mxu1  ;;  %v673_v6 = vadd.f32 %v974_v59, %v850_v47 }
  0xf1   :  { %v976_v48 = vpop.f32.mrf.mxu0 }
  0xf2   :  { %v1004_v49 = vpop.f32.mrf.mxu1  ;;  %v977_v0 = vadd.f32 %v976_v48, %v975_v44  ;;  %v722_v22 = vadd.f32 %v1002_v9, %v673_v6 }
  0xf3   :  { %v1005_v16 = vadd.f32 %v1004_v49, %v1003_v45 }
  0xf4   :  { %v676_v13 = vadd.f32 %v977_v0, %v850_v47 }
  0xf6   :  { %v725_v26 = vadd.f32 %v1005_v16, %v676_v13 }
 0x103   :  { %v1022_v51 = vpop.f32.mrf.mxu0 }
 0x104   :  { %v1050_v52 = vpop.f32.mrf.mxu1 }
 0x105   :  { %v1023_v55 = vpop.f32.mrf.mxu0 }
 0x106   :  { %v1051_v56 = vpop.f32.mrf.mxu1  ;;  %v1024_v58 = vadd.f32 %v1023_v55, %v1022_v51 }
 0x107   :  { %v1025_v60 = vpop.f32.mrf.mxu0  ;;  %v1052_v10 = vadd.f32 %v1051_v56, %v1050_v52 }
 0x108   :  { %v1053_v61 = vpop.f32.mrf.mxu1  ;;  %v763_v4 = vadd.f32 %v1024_v58, %v714_v62 }
 0x109   :  { %v1026_v1 = vpop.f32.mrf.mxu0 }
 0x10a   :  { %v1054_v2 = vpop.f32.mrf.mxu1  ;;  %v1027_v5 = vadd.f32 %v1026_v1, %v1025_v60  ;;  %v812_v17 = vadd.f32 %v1052_v10, %v763_v4 }
 0x10b   :  { %v1028_v7 = vpop.f32.mrf.mxu0  ;;  %v1055_v12 = vadd.f32 %v1054_v2, %v1053_v61 }
 0x10c   :  { %v1056_v8 = vpop.f32.mrf.mxu1  ;;  %v766_v11 = vadd.f32 %v1027_v5, %v717_v3 }
 0x10d   :  { %v1029_v14 = vpop.f32.mrf.mxu0 }
 0x10e   :  { %v1057_v15 = vpop.f32.mrf.mxu1  ;;  %v815_v18 = vadd.f32 %v1055_v12, %v766_v11  ;;  %v1030_v19 = vadd.f32 %v1029_v14, %v1028_v7 }
 0x10f   :  { %v1031_v20 = vpop.f32.mrf.mxu0  ;;  %v1058_v29 = vadd.f32 %v1057_v15, %v1056_v8 }
 0x110   :  { %v1059_v21 = vpop.f32.mrf.mxu1  ;;  %v942_v23 = vpack.c.bf16 %v815_v18, %v812_v17  ;;  %v771_v27 = vadd.f32 %v1030_v19, %v722_v22 }
 0x111   :  { %v1032_v24 = vpop.f32.mrf.mxu0 }
 0x112   :  { %v1060_v25 = vpop.f32.mrf.mxu1  ;;  %943 = vst [vmem:[%s1398_s3] sm:$0xff] %v942_v23   ;;  %v1033_v28 = vadd.f32 %v1032_v24, %v1031_v20  ;;  %v820_v32 = vadd.f32 %v1058_v29, %v771_v27 }
 0x113   :  { %v1061_v31 = vadd.f32 %v1060_v25, %v1059_v21 }
 0x114   :  { %v774_v30 = vadd.f32 %v1033_v28, %v725_v26 }
 0x116   :  { %v823_v33 = vadd.f32 %v1061_v31, %v774_v30 }
 0x118   :  { %v947_v34 = vpack.c.bf16 %v823_v33, %v820_v32 }
 0x11a   :  { %949 = vst [vmem:[%s1398_s3 + $0x8] sm:$0xff] %v947_v34  }

</bundles_post_ra>
